<compile_context>
chip_gen: v6e
topology: v6e:2x2x1
jax: 0.10.0
libtpu: 0.0.40
codegen_flags: <defaults>
</compile_context>

<pallas_src>
import functools

import jax
import jax.numpy as jnp
from jax.experimental import pallas as pl
from jax.experimental.pallas import tpu as pltpu


def _round_up(a, m):
    return (a + m - 1) // m * m


# Layer dims fixed by the module: 1 -> 18 -> 36 -> 64 -> 128 -> shape.
# Static row offsets of each tensor inside the packed parameter buffer.
# Weight slabs for MXU layers are 128 rows tall (zero-filled past the real
# fan-in); biases get an 8-row (sublane-aligned) slab each.
_W1_OFF, _B1_OFF = 0, 8          # W1 is a single broadcast row (fan-in 1)
_W2_OFF, _B2_OFF = 16, 144
_W3_OFF, _B3_OFF = 152, 280
_W4_OFF, _B4_OFF = 288, 416
_W5_OFF, _B5_OFF = 424, 552
_PARAM_ROWS = 560
_W_OFFS = (_W1_OFF, _W2_OFF, _W3_OFF, _W4_OFF, _W5_OFF)
_B_OFFS = (_B1_OFF, _B2_OFF, _B3_OFF, _B4_OFF, _B5_OFF)


def pack_decoder_params(params):
    """Pack [(W[in,out], b[1,out]), ...] into one zero-padded f32 buffer.

    Do this ONCE (e.g. at model load time), not per forward call.
    Returns (packed_buffer [560, max(128, rup128(shape))], out_dim).
    """
    assert len(params) == 5
    out_dim = params[-1][0].shape[1]
    wbuf = max(128, _round_up(out_dim, 128))
    buf = jnp.zeros((_PARAM_ROWS, wbuf), jnp.float32)
    for (w, b), wo, bo in zip(params, _W_OFFS, _B_OFFS):
        k, m = w.shape
        buf = buf.at[wo:wo + k, :m].set(w.astype(jnp.float32))
        buf = buf.at[bo:bo + 1, :m].set(b.reshape(1, -1).astype(jnp.float32))
    return buf, out_dim


def _decoder_kernel(x_ref, p_ref, o_ref, *, out_dim):
    x = x_ref[...]                                            # [tm, 1] f32

    # Linear(1, 18) + ReLU: K=1 matmul == outer product -> VPU broadcast.
    w1 = p_ref[_W1_OFF:_W1_OFF + 1, :]                        # [1, wbuf]
    b1 = p_ref[_B1_OFF:_B1_OFF + 1, :]
    h = jnp.maximum(x * w1 + b1, 0.0)                         # [tm, wbuf]

    # Hidden layers on the MXU. Padded weight rows/cols are zero, so bias+ReLU
    # keeps the pad lanes exactly zero and they never contaminate real lanes.
    # (On v5e one could move the K=18 layer to a VPU broadcast-MAC as well if
    #  the MXU push/pop chain shows up on the critical path.)
    for wo, bo in ((_W2_OFF, _B2_OFF), (_W3_OFF, _B3_OFF), (_W4_OFF, _B4_OFF)):
        w = p_ref[wo:wo + 128, :]                             # [128, wbuf]
        b = p_ref[bo:bo + 1, :]
        h = jnp.dot(h[:, :128], w, preferred_element_type=jnp.float32) + b
        h = jnp.maximum(h, 0.0)

    # Linear(128, shape) + Sigmoid.
    w5 = p_ref[_W5_OFF:_W5_OFF + 128, :]
    b5 = p_ref[_B5_OFF:_B5_OFF + 1, :]
    z = jnp.dot(h[:, :128], w5, preferred_element_type=jnp.float32) + b5

    # Numerically safe sigmoid: clamp so exp(-z) <= e^30 (never inf, so the
    # Newton step can't produce NaN); sigmoid(-30) ~ 9e-14, far below f32
    # noise. exp and the approx reciprocal ride the EUP slot.
    z = jnp.maximum(z, -30.0)
    d = 1.0 + jnp.exp(-z)
    r = pl.reciprocal(d, approx=True)
    r = r * (2.0 - d * r)                 # one Newton step -> ~f32 accuracy
    o_ref[...] = r[:, :out_dim].astype(o_ref.dtype)


def decoder_forward(x, packed_params, out_dim, *, tile_m=512):
    """x: [N, 1] float32; packed_params from pack_decoder_params()."""
    n, in_dim = x.shape
    assert in_dim == 1
    rows, wbuf = packed_params.shape
    assert rows == _PARAM_ROWS and wbuf >= max(128, out_dim)

    # Row tile: sublane multiple (8). Default 512 keeps the 256-wide v6e/v7x
    # MXU fed and gives >=2 balanced grid steps at N~1000 so both v7x TCs get
    # work; sweep up to 2048 on single-TC v5e/v6e to cut per-step overhead.
    # Ragged N: the cdiv grid lets Pallas clamp the boundary block, so no row
    # padding and no post-kernel slice copy are needed.
    tm = max(8, min(_round_up(tile_m, 8), _round_up(n, 8)))
    grid = (pl.cdiv(n, tm),)

    macs = n * (1 * 18 + 18 * 36 + 36 * 64 + 64 * 128 + 128 * out_dim)
    cost = pl.CostEstimate(
        flops=2 * macs,
        transcendentals=2 * n * out_dim,          # exp + approx reciprocal
        bytes_accessed=4 * (x.size + packed_params.size + n * out_dim),
    )

    kernel = functools.partial(_decoder_kernel, out_dim=out_dim)

    return pl.pallas_call(
        kernel,
        out_shape=jax.ShapeDtypeStruct((n, out_dim), jnp.float32),
        grid_spec=pltpu.PrefetchScalarGridSpec(
            num_scalar_prefetch=0,
            grid=grid,
            in_specs=[
                pl.BlockSpec((tm, 1), lambda i: (i, 0)),
                # Single packed parameter buffer; constant index map => one DMA
                # reused across every grid step.
                pl.BlockSpec((_PARAM_ROWS, wbuf), lambda i: (0, 0)),
            ],
            out_specs=pl.BlockSpec((tm, out_dim), lambda i: (i, 0)),
        ),
        compiler_params=pltpu.CompilerParams(
            dimension_semantics=("parallel",)),   # row axis -> megacore / both v7x TCs
        cost_estimate=cost,
    )(x, packed_params)


def init_linear(key, fan_in, fan_out):
    """Mimics torch.nn.Linear default init: U[-1/sqrt(fan_in), 1/sqrt(fan_in)]."""
    kw, kb = jax.random.split(key)
    bound = 1.0 / (fan_in ** 0.5)
    w = jax.random.uniform(kw, (fan_in, fan_out), jnp.float32, -bound, bound)
    b = jax.random.uniform(kb, (1, fan_out), jnp.float32, -bound, bound)
    return w, b


def reference_forward(x, params):
    h = x
    for i, (w, b) in enumerate(params):
        h = h @ w + b
        h = jnp.maximum(h, 0.0) if i < len(params) - 1 else jax.nn.sigmoid(h)
    return h


if __name__ == "__main__":
    out_shape_dim = 32   # the `shape` ctor arg of Decoder
    n = 1000             # deliberately not a tile multiple (exercises cdiv grid)

    key = jax.random.PRNGKey(0)
    keys = jax.random.split(key, 6)

    dims = [(1, 18), (18, 36), (36, 64), (64, 128), (128, out_shape_dim)]
    params = [init_linear(keys[i], fi, fo) for i, (fi, fo) in enumerate(dims)]
    x = jax.random.normal(keys[5], (n, 1), jnp.float32)

    packed, out_dim = pack_decoder_params(params)   # pack once, reuse per call

    out = decoder_forward(x, packed, out_dim, tile_m=512)
    out = jax.block_until_ready(out)

    ref = reference_forward(x, params)
    assert out.shape == (n, out_shape_dim)
    # Newton-refined approx reciprocal keeps sigmoid within ~1e-6 of exact.
    assert jnp.allclose(out, ref, atol=1e-4, rtol=1e-4), "mismatch vs reference"

    print("KERNEL_OK")
</pallas_src>

<mosaic_0001>
module attributes {stable_mosaic.version = 11 : i64} {
  func.func @_decoder_kernel(%arg0: i32, %arg1: memref<512x1xf32, #tpu.memory_space<vmem>>, %arg2: memref<560x128xf32, #tpu.memory_space<vmem>>, %arg3: memref<512x32xf32, #tpu.memory_space<vmem>>) attributes {dimension_semantics = [#tpu.dimension_semantics<parallel>], iteration_bounds = array<i64: 2>, scalar_prefetch = 0 : i64, scratch_operands = 0 : i64, tpu.core_type = #tpu.core_type<tc>, window_params = [{transform_indices = @transform_0, window_bounds = array<i64: 512, 1>}, {pipeline_mode = #tpu.pipeline_mode<synchronous>, transform_indices = @transform_1, window_bounds = array<i64: 560, 128>}, {transform_indices = @transform_2, window_bounds = array<i64: 512, 32>}]} {
    %c0 = arith.constant 0 : index
    %c0_0 = arith.constant 0 : index
    %0 = vector.load %arg1[%c0, %c0_0] : memref<512x1xf32, #tpu.memory_space<vmem>>, vector<512x1xf32>
    %c0_1 = arith.constant 0 : index
    %c0_2 = arith.constant 0 : index
    %1 = vector.load %arg2[%c0_1, %c0_2] : memref<560x128xf32, #tpu.memory_space<vmem>>, vector<1x128xf32>
    %c8 = arith.constant 8 : index
    %c0_3 = arith.constant 0 : index
    %2 = vector.load %arg2[%c8, %c0_3] : memref<560x128xf32, #tpu.memory_space<vmem>>, vector<1x128xf32>
    %3 = vector.broadcast %0 : vector<512x1xf32> to vector<512x128xf32>
    %4 = vector.broadcast %1 : vector<1x128xf32> to vector<512x128xf32>
    %5 = arith.mulf %3, %4 : vector<512x128xf32>
    %6 = vector.broadcast %2 : vector<1x128xf32> to vector<512x128xf32>
    %7 = arith.addf %5, %6 : vector<512x128xf32>
    %cst = arith.constant 0.000000e+00 : f32
    %8 = vector.broadcast %cst : f32 to vector<512x128xf32>
    %9 = arith.maximumf %7, %8 : vector<512x128xf32>
    %c16 = arith.constant 16 : index
    %c0_4 = arith.constant 0 : index
    %10 = vector.load %arg2[%c16, %c0_4] : memref<560x128xf32, #tpu.memory_space<vmem>>, vector<128x128xf32>
    %c144 = arith.constant 144 : index
    %c0_5 = arith.constant 0 : index
    %11 = vector.load %arg2[%c144, %c0_5] : memref<560x128xf32, #tpu.memory_space<vmem>>, vector<1x128xf32>
    %cst_6 = arith.constant dense<0.000000e+00> : vector<512x128xf32>
    %12 = tpu.matmul %9, %10, %cst_6 {dimension_numbers = #tpu.dot_dimension_numbers<[1], [0], [0], [1], [0, 0, 1, 1], [], []>} : vector<512x128xf32>, vector<128x128xf32>, vector<512x128xf32> -> vector<512x128xf32>
    %13 = vector.broadcast %11 : vector<1x128xf32> to vector<512x128xf32>
    %14 = arith.addf %12, %13 : vector<512x128xf32>
    %cst_7 = arith.constant 0.000000e+00 : f32
    %15 = vector.broadcast %cst_7 : f32 to vector<512x128xf32>
    %16 = arith.maximumf %14, %15 : vector<512x128xf32>
    %c152 = arith.constant 152 : index
    %c0_8 = arith.constant 0 : index
    %17 = vector.load %arg2[%c152, %c0_8] : memref<560x128xf32, #tpu.memory_space<vmem>>, vector<128x128xf32>
    %c280 = arith.constant 280 : index
    %c0_9 = arith.constant 0 : index
    %18 = vector.load %arg2[%c280, %c0_9] : memref<560x128xf32, #tpu.memory_space<vmem>>, vector<1x128xf32>
    %cst_10 = arith.constant dense<0.000000e+00> : vector<512x128xf32>
    %19 = tpu.matmul %16, %17, %cst_10 {dimension_numbers = #tpu.dot_dimension_numbers<[1], [0], [0], [1], [0, 0, 1, 1], [], []>} : vector<512x128xf32>, vector<128x128xf32>, vector<512x128xf32> -> vector<512x128xf32>
    %20 = vector.broadcast %18 : vector<1x128xf32> to vector<512x128xf32>
    %21 = arith.addf %19, %20 : vector<512x128xf32>
    %cst_11 = arith.constant 0.000000e+00 : f32
    %22 = vector.broadcast %cst_11 : f32 to vector<512x128xf32>
    %23 = arith.maximumf %21, %22 : vector<512x128xf32>
    %c288 = arith.constant 288 : index
    %c0_12 = arith.constant 0 : index
    %24 = vector.load %arg2[%c288, %c0_12] : memref<560x128xf32, #tpu.memory_space<vmem>>, vector<128x128xf32>
    %c416 = arith.constant 416 : index
    %c0_13 = arith.constant 0 : index
    %25 = vector.load %arg2[%c416, %c0_13] : memref<560x128xf32, #tpu.memory_space<vmem>>, vector<1x128xf32>
    %cst_14 = arith.constant dense<0.000000e+00> : vector<512x128xf32>
    %26 = tpu.matmul %23, %24, %cst_14 {dimension_numbers = #tpu.dot_dimension_numbers<[1], [0], [0], [1], [0, 0, 1, 1], [], []>} : vector<512x128xf32>, vector<128x128xf32>, vector<512x128xf32> -> vector<512x128xf32>
    %27 = vector.broadcast %25 : vector<1x128xf32> to vector<512x128xf32>
    %28 = arith.addf %26, %27 : vector<512x128xf32>
    %cst_15 = arith.constant 0.000000e+00 : f32
    %29 = vector.broadcast %cst_15 : f32 to vector<512x128xf32>
    %30 = arith.maximumf %28, %29 : vector<512x128xf32>
    %c424 = arith.constant 424 : index
    %c0_16 = arith.constant 0 : index
    %31 = vector.load %arg2[%c424, %c0_16] : memref<560x128xf32, #tpu.memory_space<vmem>>, vector<128x128xf32>
    %c552 = arith.constant 552 : index
    %c0_17 = arith.constant 0 : index
    %32 = vector.load %arg2[%c552, %c0_17] : memref<560x128xf32, #tpu.memory_space<vmem>>, vector<1x128xf32>
    %cst_18 = arith.constant dense<0.000000e+00> : vector<512x128xf32>
    %33 = tpu.matmul %30, %31, %cst_18 {dimension_numbers = #tpu.dot_dimension_numbers<[1], [0], [0], [1], [0, 0, 1, 1], [], []>} : vector<512x128xf32>, vector<128x128xf32>, vector<512x128xf32> -> vector<512x128xf32>
    %34 = vector.broadcast %32 : vector<1x128xf32> to vector<512x128xf32>
    %35 = arith.addf %33, %34 : vector<512x128xf32>
    %cst_19 = arith.constant -3.000000e+01 : f32
    %36 = vector.broadcast %cst_19 : f32 to vector<512x128xf32>
    %37 = arith.maximumf %35, %36 : vector<512x128xf32>
    %cst_20 = arith.constant 0.000000e+00 : f32
    %38 = vector.broadcast %cst_20 : f32 to vector<512x128xf32>
    %39 = arith.subf %38, %37 : vector<512x128xf32>
    %40 = math.exp %39 : vector<512x128xf32>
    %cst_21 = arith.constant 1.000000e+00 : f32
    %41 = vector.broadcast %cst_21 : f32 to vector<512x128xf32>
    %42 = arith.addf %41, %40 : vector<512x128xf32>
    %43 = tpu.reciprocal %42 {approx = true} : vector<512x128xf32> -> vector<512x128xf32>
    %44 = arith.mulf %42, %43 : vector<512x128xf32>
    %cst_22 = arith.constant 2.000000e+00 : f32
    %45 = vector.broadcast %cst_22 : f32 to vector<512x128xf32>
    %46 = arith.subf %45, %44 : vector<512x128xf32>
    %47 = arith.mulf %43, %46 : vector<512x128xf32>
    %48 = vector.extract_strided_slice %47 {offsets = [0, 0], sizes = [512, 32], strides = [1, 1]} : vector<512x128xf32> to vector<512x32xf32>
    %c0_23 = arith.constant 0 : index
    %c0_24 = arith.constant 0 : index
    %49 = vector.load %arg3[%c0_23, %c0_24] : memref<512x32xf32, #tpu.memory_space<vmem>>, vector<512x32xf32>
    tpu.vector_store %arg3[%c0_23, %c0_24], %48 {strides = array<i32>} : memref<512x32xf32, #tpu.memory_space<vmem>>, vector<512x32xf32>,
    return
  }
  func.func @transform_0(%arg0: i32) -> (i32, i32) {
    %c0_i32 = arith.constant 0 : i32
    %c0_i32_0 = arith.constant 0 : i32
    return %arg0, %c0_i32 : i32, i32
  }
  func.func @transform_1(%arg0: i32) -> (i32, i32) {
    %c0_i32 = arith.constant 0 : i32
    %c0_i32_0 = arith.constant 0 : i32
    %c0_i32_1 = arith.constant 0 : i32
    return %c0_i32, %c0_i32_0 : i32, i32
  }
  func.func @transform_2(%arg0: i32) -> (i32, i32) {
    %c0_i32 = arith.constant 0 : i32
    %c0_i32_0 = arith.constant 0 : i32
    return %arg0, %c0_i32 : i32, i32
  }
}

</mosaic_0001>

<bundles_post_ra>
// kernel: tpu_custom_call.1
= control target key start
LH: loop header
LB: loop body
LE: loop exit
PB: predicated region body
PF: predicated region fallthrough
CT: control target
= control target key end

     0   :  { %s4993_s9 = smov 0   ;;  %s4995_s10 = smov 0   ;;  %s6355_s0 = inlined_call_operand.vmem [shape: f32[1000,1], index: 0, kind: input, shape index: {}]   ;;  %s6356_s1 = inlined_call_operand.vmem [shape: f32[560,128], index: 1, kind: input, shape index: {}]   ;;  %s6357_s2 = inlined_call_operand.vmem [shape: f32[1000,32], index: 2, kind: output, shape index: {}]  }
   0x1   :  { %s4997_s11 = smov 0  }
   0x2 LB: > { %s5006_s12 = sadd.s32 4294967295, %s4943_s11   ;;  %s5008_s13 = sadd.s32 1, %s4943_s11   ;;  %s4943_s11 = sphi %s4997_s11, %s6366_s11   ;;  %s4939_s10 = sphi %s4995_s10, %s6365_s10   ;;  %s4935_s9 = sphi %s4993_s9, %s6364_s9  }
   0x3   : > { %s63_s14 = ssub.s32 %s4943_s11, %s5008_s13  ;;  %s66_s15 = sadd.s32 1, %s4939_s10 }
   0x4   : > { %p64_p0 = scmp.eq.s32.totalorder %s63_s14, 0  ;;  %p76_p1 = scmp.ne.s32.totalorder %s4939_s10, %s4935_s9 }
   0x5   : > { %p77_p2 = scmp.eq.s32.totalorder %s5006_s12, 1  ;;  %p3679_p3 = scmp.ge.s32.totalorder %s4943_s11, 1 }
   0x6   : > { %s5016_s16 = scalar_select %p64_p0, %s4939_s10, %s66_s15  }
   0x7   : > { %p5018_p4 = por %p77_p2, %p76_p1  ;;  %p121_p5 = scmp.lt.s32.totalorder %s4943_s11, 3 }
   0x9   : > { %p122_p6 = pnand %p3679_p3, %p121_p5 }
   0xa   : > { %s5023_s18 = sshll.u32 (!%p122_p6), %s5006_s12, 6  ;;  %s143_s15 = sand.u32 (!%p122_p6), 1, %s4935_s9  }
   0xb   : > { %125 = sbr.rel (%p122_p6) target bundleno = 1211 (0x4bb), region = 28  ;;  %p151_p7 = scmp.lt.s32.totalorder (!%p122_p6), %s5023_s18, 124 }
   0xc   : > { %s5681_s9 = sshll.u32 (!%p122_p6), %s143_s15, 9 }
  0x10   : > { %v766_v0 = vld [vmem:[%s6356_s1 + $0x88] sm:$0xff]  ;;  %v4977_v1 = vmov 0   ;;  %v765_v2 = vld [vmem:[%s6356_s1 + $0x80] sm:$0xff]  ;;  %s152_s23 = scalar_select %p151_p7, %s5023_s18, 124  ;;  %v764_v3 = vld [vmem:[%s6356_s1 + $0x78] sm:$0xff]  ;;  %vm3143_vm0 = vcmask 261120  }
  0x11   : > { %4631 = vset.pattern.permute.xlu1 %v4977_v1  ;;  %4630 = vset.pattern.permute.xlu0 %v4977_v1  ;;  %v763_v4 = vld [vmem:[%s6356_s1 + $0x70] sm:$0xff]  ;;  %v762_v7 = vld [vmem:[%s6356_s1 + $0x68] sm:$0xff]  ;;  %v761_v10 = vld [vmem:[%s6356_s1 + $0x60] sm:$0xff]  ;;  %s3216_s21 = ssub.s32 (%p5018_p4), 125, %s5023_s18  ;;  %s3706_s22 = sshll.u32 (%p5018_p4), %s5006_s12, 9 }
  0x12   : > { %4029 = vmatprep.subr.mxu0 %v766_v0  ;;  %s3682_s26 = sshll.u32 %s152_s23, 3  ;;  %v760_v13 = vld [vmem:[%s6356_s1 + $0x58] sm:$0xff]  ;;  %v759_v14 = vld [vmem:[%s6356_s1 + $0x50] sm:$0xff]  ;;  %v758_v17 = vld [vmem:[%s6356_s1 + $0x48] sm:$0xff]  ;;  %p3217_p8 = scmp.lt.s32.totalorder (%p5018_p4), %s3216_s21, 64 }
  0x13   : > { %4030 = vmatpush3.msra.mxu0 %v766_v0  ;;  %s5039_s29 = scalar_lea.vmem %s6355_s0, %s3682_s26  ;;  %v757_v20 = vld [vmem:[%s6356_s1 + $0x40] sm:$0xff]  ;;  %v756_v21 = vld [vmem:[%s6356_s1 + $0x38] sm:$0xff]  ;;  %v755_v24 = vld [vmem:[%s6356_s1 + $0x30] sm:$0xff]  ;;  %s6156_s25 = scalar_lea.vmem (%p5018_p4), %s6357_s2, %s3706_s22  }
  0x14   : > { %4031 = vmatprep.subr.mxu0 %v765_v2  ;;  %v167_v5 = vld [vmem:[%s5039_s29 + $0x10] sm:$0xff]  ;;  %v165_v6 = vld [vmem:[%s5039_s29] sm:$0xff]  ;;  %v168_v8 = vld [vmem:[%s5039_s29 + $0x18] sm:$0xff] }
  0x15   : > { %4032 = vmatpush3.msra.mxu0 %v765_v2  ;;  %243 = vperm.xlu1 %4631, %v167_v5   ;;  %v166_v9 = vld [vmem:[%s5039_s29 + $0x8] sm:$0xff]  ;;  %v169_v12 = vld [vmem:[%s5039_s29 + $0x20] sm:$0xff]  ;;  %v172_v15 = vld [vmem:[%s5039_s29 + $0x38] sm:$0xff] }
  0x16   : > { %4033 = vmatprep.subr.mxu0 %v764_v3  ;;  %233 = vperm.xlu0 %4630, %v165_v6   ;;  %v170_v11 = vld [vmem:[%s5039_s29 + $0x28] sm:$0xff]  ;;  %v171_v16 = vld [vmem:[%s5039_s29 + $0x30] sm:$0xff]  ;;  %v173_v19 = vld [vmem:[%s5039_s29 + $0x40] sm:$0xff] }
  0x17   : > { %4034 = vmatpush3.msra.mxu0 %v764_v3  ;;  %v174_v18 = vld [vmem:[%s5039_s29 + $0x48] sm:$0xff]  ;;  %v176_v22 = vld [vmem:[%s5039_s29 + $0x58] sm:$0xff]  ;;  %v175_v23 = vld [vmem:[%s5039_s29 + $0x50] sm:$0xff] }
  0x18   : > { %4035 = vmatprep.subr.mxu0 %v763_v4  ;;  %v178_v25 = vld [vmem:[%s5039_s29 + $0x68] sm:$0xff]  ;;  %v177_v26 = vld [vmem:[%s5039_s29 + $0x60] sm:$0xff]  ;;  %v180_v29 = vld [vmem:[%s5039_s29 + $0x78] sm:$0xff] }
  0x19   : > { %4036 = vmatpush3.msra.mxu0 %v763_v4  ;;  %248 = vperm.xlu1 %4631, %v168_v8   ;;  %v754_v27 = vld [vmem:[%s6356_s1 + $0x28] sm:$0xff]  ;;  %v753_v28 = vld [vmem:[%s6356_s1 + $0x20] sm:$0xff]  ;;  %v179_v30 = vld [vmem:[%s5039_s29 + $0x70] sm:$0xff] }
  0x1a   : > { %4037 = vmatprep.subr.mxu0 %v762_v7  ;;  %238 = vperm.xlu0 %4630, %v166_v9   ;;  %v752_v31 = vld [vmem:[%s6356_s1 + $0x18] sm:$0xff]  ;;  %v182_v32 = vld [vmem:[%s5039_s29 + $0x88] sm:$0xff]  ;;  %v181_v33 = vld [vmem:[%s5039_s29 + $0x80] sm:$0xff] }
  0x1b   : > { %4038 = vmatpush3.msra.mxu0 %v762_v7  ;;  %v751_v34 = vld [vmem:[%s6356_s1 + $0x10] sm:$0xff]  ;;  %v184_v35 = vld [vmem:[%s5039_s29 + $0x98] sm:$0xff]  ;;  %v186_v37 = vld [vmem:[%s5039_s29 + $0xa8] sm:$0xff] }
  0x1c   : > { %4039 = vmatprep.subr.mxu0 %v761_v10  ;;  %v183_v36 = vld [vmem:[%s5039_s29 + $0x90] sm:$0xff]  ;;  %v185_v38 = vld [vmem:[%s5039_s29 + $0xa0] sm:$0xff]  ;;  %v188_v39 = vld [vmem:[%s5039_s29 + $0xb8] sm:$0xff] }
  0x1d   : > { %4040 = vmatpush3.msra.mxu0 %v761_v10  ;;  %258 = vperm.xlu1 %4631, %v170_v11   ;;  %v187_v40 = vld [vmem:[%s5039_s29 + $0xb0] sm:$0xff]  ;;  %v190_v41 = vld [vmem:[%s5039_s29 + $0xc8] sm:$0xff]  ;;  %v189_v42 = vld [vmem:[%s5039_s29 + $0xc0] sm:$0xff] }
  0x1e   : > { %253 = vperm.xlu0 %4630, %v169_v12   ;;  %4041 = vmatprep.subr.mxu0 %v760_v13  ;;  %v192_v43 = vld [vmem:[%s5039_s29 + $0xd8] sm:$0xff]  ;;  %v191_v44 = vld [vmem:[%s5039_s29 + $0xd0] sm:$0xff]  ;;  %v194_v45 = vld [vmem:[%s5039_s29 + $0xe8] sm:$0xff] }
  0x1f   : > { %4042 = vmatpush3.msra.mxu0 %v760_v13  ;;  %v193_v46 = vld [vmem:[%s5039_s29 + $0xe0] sm:$0xff]  ;;  %v196_v47 = vld [vmem:[%s5039_s29 + $0xf8] sm:$0xff]  ;;  %v195_v48 = vld [vmem:[%s5039_s29 + $0xf0] sm:$0xff] }
  0x20   : > { %4043 = vmatprep.subr.mxu0 %v759_v14  ;;  %v198_v49 = vld [vmem:[%s5039_s29 + $0x108] sm:$0xff]  ;;  %v197_v50 = vld [vmem:[%s5039_s29 + $0x100] sm:$0xff]  ;;  %v200_v51 = vld [vmem:[%s5039_s29 + $0x118] sm:$0xff] }
  0x21   : > { %268 = vperm.xlu1 %4631, %v172_v15   ;;  %4044 = vmatpush3.msra.mxu0 %v759_v14  ;;  %v199_v52 = vld [vmem:[%s5039_s29 + $0x110] sm:$0xff]  ;;  %v202_v53 = vld [vmem:[%s5039_s29 + $0x128] sm:$0xff]  ;;  %v201_v54 = vld [vmem:[%s5039_s29 + $0x120] sm:$0xff] }
  0x22   : > { %263 = vperm.xlu0 %4630, %v171_v16   ;;  %4045 = vmatprep.subr.mxu0 %v758_v17  ;;  %v204_v55 = vld [vmem:[%s5039_s29 + $0x138] sm:$0xff]  ;;  %v203_v56 = vld [vmem:[%s5039_s29 + $0x130] sm:$0xff]  ;;  %v206_v57 = vld [vmem:[%s5039_s29 + $0x148] sm:$0xff] }
  0x23   : > { %4046 = vmatpush3.msra.mxu0 %v758_v17  ;;  %v205_v58 = vld [vmem:[%s5039_s29 + $0x140] sm:$0xff]  ;;  %v208_v59 = vld [vmem:[%s5039_s29 + $0x158] sm:$0xff]  ;;  %v207_v60 = vld [vmem:[%s5039_s29 + $0x150] sm:$0xff] }
  0x24   : > { %4047 = vmatprep.subr.mxu0 %v757_v20  ;;  %v210_v61 = vld [vmem:[%s5039_s29 + $0x168] sm:$0xff]  ;;  %v209_v62 = vld [vmem:[%s5039_s29 + $0x160] sm:$0xff]  ;;  %v212_v63 = vld [vmem:[%s5039_s29 + $0x178] sm:$0xff] }
  0x25   : > { %278 = vperm.xlu1 %4631, %v174_v18   ;;  %4048 = vmatpush3.msra.mxu0 %v757_v20  ;;  %v211_v0 = vld [vmem:[%s5039_s29 + $0x170] sm:$0xff]  ;;  %v214_v1 = vld [vmem:[%s5039_s29 + $0x188] sm:$0xff]  ;;  %v213_v2 = vld [vmem:[%s5039_s29 + $0x180] sm:$0xff] }
  0x26   : > { %273 = vperm.xlu0 %4630, %v173_v19   ;;  %4049 = vmatprep.subr.mxu0 %v756_v21  ;;  %v216_v3 = vld [vmem:[%s5039_s29 + $0x198] sm:$0xff]  ;;  %v215_v4 = vld [vmem:[%s5039_s29 + $0x190] sm:$0xff]  ;;  %v218_v5 = vld [vmem:[%s5039_s29 + $0x1a8] sm:$0xff] }
  0x27   : > { %4050 = vmatpush3.msra.mxu0 %v756_v21  ;;  %v217_v6 = vld [vmem:[%s5039_s29 + $0x1a0] sm:$0xff]  ;;  %v220_v7 = vld [vmem:[%s5039_s29 + $0x1b8] sm:$0xff]  ;;  %v219_v8 = vld [vmem:[%s5039_s29 + $0x1b0] sm:$0xff] }
  0x28   : > { %4051 = vmatprep.subr.mxu0 %v755_v24  ;;  %v222_v9 = vld [vmem:[%s5039_s29 + $0x1c8] sm:$0xff]  ;;  %v221_v10 = vld [vmem:[%s5039_s29 + $0x1c0] sm:$0xff]  ;;  %v224_v11 = vld [vmem:[%s5039_s29 + $0x1d8] sm:$0xff] }
  0x29   : > { %288 = vperm.xlu1 %4631, %v176_v22   ;;  %4052 = vmatpush3.msra.mxu0 %v755_v24  ;;  %v223_v12 = vld [vmem:[%s5039_s29 + $0x1d0] sm:$0xff]  ;;  %v226_v13 = vld [vmem:[%s5039_s29 + $0x1e8] sm:$0xff]  ;;  %v225_v14 = vld [vmem:[%s5039_s29 + $0x1e0] sm:$0xff] }
  0x2a   : > { %283 = vperm.xlu0 %4630, %v175_v23   ;;  %4053 = vmatprep.subr.mxu0 %v754_v27  ;;  %v5145_v15 = vld [vmem:[%s6356_s1] ss:$0 sm:$0xff]  ;;  %v228_v16 = vld [vmem:[%s5039_s29 + $0x1f8] sm:$0xff]  ;;  %v227_v17 = vld [vmem:[%s5039_s29 + $0x1f0] sm:$0xff]  ;;  %s5698_s29 = scalar_lea.vmem [#allocation2], %s5681_s9  }
  0x2b   : > { %4054 = vmatpush3.msra.mxu0 %v754_v27  ;;  %v5152_v18 = vld [vmem:[%s6356_s1 + $0x8] ss:$0 sm:$0xff] }
  0x2c   : > { %4055 = vmatprep.subr.mxu0 %v753_v28 }
  0x2d   : > { %298 = vperm.xlu1 %4631, %v178_v25   ;;  %4056 = vmatpush3.msra.mxu0 %v753_v28 }
  0x2e   : > { %293 = vperm.xlu0 %4630, %v177_v26   ;;  %4057 = vmatprep.subr.mxu0 %v752_v31 }
  0x2f   : > { %4058 = vmatpush3.msra.mxu0 %v752_v31  ;;  %v1236_v31 = vld [vmem:[%s6356_s1 + $0x110] sm:$0xff] }
  0x30   : > { %4059 = vmatprep.subr.mxu0 %v751_v34  ;;  %4157 = vmatprep.subr.mxu1 %v1236_v31 }
  0x31   : > { %308 = vperm.xlu1 %4631, %v180_v29   ;;  %4060 = vmatpush3.msra.mxu0 %v751_v34 }
  0x32   : > { %303 = vperm.xlu0 %4630, %v179_v30   ;;  %4158 = vmatpush3.msra.mxu1 %v1236_v31 }
  0x35   : > { %318 = vperm.xlu1 %4631, %v182_v32   ;;  %v1235_v32 = vld [vmem:[%s6356_s1 + $0x108] sm:$0xff] }
  0x36   : > { %313 = vperm.xlu0 %4630, %v181_v33   ;;  %4159 = vmatprep.subr.mxu1 %v1235_v32 }
  0x37   : > { %4160 = vmatpush3.msra.mxu1 %v1235_v32 }
  0x39   : > { %328 = vperm.xlu1 %4631, %v184_v35  }
  0x3a   : > { %323 = vperm.xlu0 %4630, %v183_v36  }
  0x3d   : > { %338 = vperm.xlu1 %4631, %v186_v37  }
  0x3e   : > { %333 = vperm.xlu0 %4630, %v185_v38  }
  0x41   : > { %348 = vperm.xlu1 %4631, %v188_v39  }
  0x42   : > { %343 = vperm.xlu0 %4630, %v187_v40   ;;  %v1234_v40 = vld [vmem:[%s6356_s1 + $0x100] sm:$0xff] }
  0x43   : > { %4161 = vmatprep.subr.mxu1 %v1234_v40 }
  0x44   : > { %4162 = vmatpush3.msra.mxu1 %v1234_v40 }
  0x45   : > { %358 = vperm.xlu1 %4631, %v190_v41  }
  0x46   : > { %353 = vperm.xlu0 %4630, %v189_v42   ;;  %v1233_v42 = vld [vmem:[%s6356_s1 + $0xf8] sm:$0xff] }
  0x47   : > { %4163 = vmatprep.subr.mxu1 %v1233_v42 }
  0x48   : > { %4164 = vmatpush3.msra.mxu1 %v1233_v42 }
  0x49   : > { %368 = vperm.xlu1 %4631, %v192_v43  }
  0x4a   : > { %363 = vperm.xlu0 %4630, %v191_v44  }
  0x4d   : > { %378 = vperm.xlu1 %4631, %v194_v45  }
  0x4e   : > { %373 = vperm.xlu0 %4630, %v193_v46  }
  0x51   : > { %388 = vperm.xlu1 %4631, %v196_v47  }
  0x52   : > { %383 = vperm.xlu0 %4630, %v195_v48  }
  0x55   : > { %398 = vperm.xlu1 %4631, %v198_v49  }
  0x56   : > { %393 = vperm.xlu0 %4630, %v197_v50   ;;  %v1232_v50 = vld [vmem:[%s6356_s1 + $0xf0] sm:$0xff] }
  0x57   : > { %4165 = vmatprep.subr.mxu1 %v1232_v50 }
  0x58   : > { %4166 = vmatpush3.msra.mxu1 %v1232_v50 }
  0x59   : > { %408 = vperm.xlu1 %4631, %v200_v51  }
  0x5a   : > { %403 = vperm.xlu0 %4630, %v199_v52   ;;  %v1231_v52 = vld [vmem:[%s6356_s1 + $0xe8] sm:$0xff] }
  0x5b   : > { %4167 = vmatprep.subr.mxu1 %v1231_v52 }
  0x5c   : > { %4168 = vmatpush3.msra.mxu1 %v1231_v52 }
  0x5d   : > { %418 = vperm.xlu1 %4631, %v202_v53  }
  0x5e   : > { %413 = vperm.xlu0 %4630, %v201_v54  }
  0x61   : > { %428 = vperm.xlu1 %4631, %v204_v55  }
  0x62   : > { %423 = vperm.xlu0 %4630, %v203_v56  }
  0x65   : > { %438 = vperm.xlu1 %4631, %v206_v57  }
  0x66   : > { %433 = vperm.xlu0 %4630, %v205_v58  }
  0x69   : > { %448 = vperm.xlu1 %4631, %v208_v59  }
  0x6a   : > { %443 = vperm.xlu0 %4630, %v207_v60   ;;  %v1230_v60 = vld [vmem:[%s6356_s1 + $0xe0] sm:$0xff] }
  0x6b   : > { %4169 = vmatprep.subr.mxu1 %v1230_v60 }
  0x6c   : > { %4170 = vmatpush3.msra.mxu1 %v1230_v60 }
  0x6d   : > { %458 = vperm.xlu1 %4631, %v210_v61  }
  0x6e   : > { %453 = vperm.xlu0 %4630, %v209_v62   ;;  %v1229_v62 = vld [vmem:[%s6356_s1 + $0xd8] sm:$0xff] }
  0x6f   : > { %4171 = vmatprep.subr.mxu1 %v1229_v62 }
  0x70   : > { %4172 = vmatpush3.msra.mxu1 %v1229_v62 }
  0x71   : > { %468 = vperm.xlu1 %4631, %v212_v63  }
  0x72   : > { %463 = vperm.xlu0 %4630, %v211_v0  }
  0x75   : > { %478 = vperm.xlu1 %4631, %v214_v1  }
  0x76   : > { %473 = vperm.xlu0 %4630, %v213_v2  }
  0x79   : > { %488 = vperm.xlu1 %4631, %v216_v3  }
  0x7a   : > { %483 = vperm.xlu0 %4630, %v215_v4  }
  0x7d   : > { %498 = vperm.xlu1 %4631, %v218_v5  }
  0x7e   : > { %493 = vperm.xlu0 %4630, %v217_v6   ;;  %v1228_v6 = vld [vmem:[%s6356_s1 + $0xd0] sm:$0xff] }
  0x7f   : > { %4173 = vmatprep.subr.mxu1 %v1228_v6 }
  0x80   : > { %4174 = vmatpush3.msra.mxu1 %v1228_v6 }
  0x81   : > { %508 = vperm.xlu1 %4631, %v220_v7  }
  0x82   : > { %503 = vperm.xlu0 %4630, %v219_v8   ;;  %v1227_v8 = vld [vmem:[%s6356_s1 + $0xc8] sm:$0xff] }
  0x83   : > { %4175 = vmatprep.subr.mxu1 %v1227_v8 }
  0x84   : > { %4176 = vmatpush3.msra.mxu1 %v1227_v8 }
  0x85   : > { %518 = vperm.xlu1 %4631, %v222_v9  }
  0x86   : > { %513 = vperm.xlu0 %4630, %v221_v10  }
  0x89   : > { %528 = vperm.xlu1 %4631, %v224_v11  }
  0x8a   : > { %523 = vperm.xlu0 %4630, %v223_v12  }
  0x8d   : > { %538 = vperm.xlu1 %4631, %v226_v13  }
  0x8e   : > { %533 = vperm.xlu0 %4630, %v225_v14  }
  0x90   : > { %v244_v19 = vpop.permute.xlu1 %243 }
  0x91   : > { %v234_v20 = vpop.permute.xlu0 %233  ;;  %v557_v21 = vmul.f32 %v5145_v15, %v244_v19  ;;  %548 = vperm.xlu1 %4631, %v228_v16  }
  0x92   : > { %v555_v22 = vmul.f32 %v5145_v15, %v234_v20  ;;  %543 = vperm.xlu0 %4630, %v227_v17   ;;  %v1226_v17 = vld [vmem:[%s6356_s1 + $0xc0] sm:$0xff]  ;;  %v1225_v20 = vld [vmem:[%s6356_s1 + $0xb8] sm:$0xff] }
  0x93   : > { %v625_v24 = vadd.f32 %v5152_v18, %v557_v21  ;;  %4177 = vmatprep.subr.mxu1 %v1226_v17 }
  0x94   : > { %v623_v23 = vadd.f32 %v5152_v18, %v555_v22  ;;  %v249_v25 = vpop.permute.xlu1 %248  ;;  %4178 = vmatpush3.msra.mxu1 %v1226_v17 }
  0x95   : > { %v239_v26 = vpop.permute.xlu0 %238  ;;  %v558_v27 = vmul.f32 %v5145_v15, %v249_v25  ;;  %v689_v33 = vmax.f32 %v625_v24, 0.0  ;;  %4179 = vmatprep.subr.mxu1 %v1225_v20 }
  0x96   : > { %v556_v28 = vmul.f32 %v5145_v15, %v239_v26  ;;  %v687_v29 = vmax.f32 %v623_v23, 0.0  ;;  %4180 = vmatpush3.msra.mxu1 %v1225_v20 }
  0x97   : > { %v626_v34 = vadd.f32 %v5152_v18, %v558_v27 }
  0x98   : > { %v624_v30 = vadd.f32 %v5152_v18, %v556_v28  ;;  %4061 = vmatprep.mubr.f32.mxu0 %v687_v29  ;;  %v259_v35 = vpop.permute.xlu1 %258 }
  0x99   : > { %v254_v36 = vpop.permute.xlu0 %253  ;;  %v560_v38 = vmul.f32 %v5145_v15, %v259_v35  ;;  %v690_v43 = vmax.f32 %v626_v34, 0.0 }
  0x9a   : > { %v688_v37 = vmax.f32 %v624_v30, 0.0  ;;  %v559_v39 = vmul.f32 %v5145_v15, %v254_v36 }
  0x9b   : > { %v628_v46 = vadd.f32 %v5152_v18, %v560_v38 }
  0x9c   : > { %v627_v41 = vadd.f32 %v5152_v18, %v559_v39  ;;  %4062 = vmatmul.mubr.f32.vlgmr.msra.gmra.mxu0 %v688_v37  ;;  %v269_v44 = vpop.permute.xlu1 %268 }
  0x9d   : > { %4064 = vmatprep.mubr.f32.mxu0 %v689_v33  ;;  %v264_v45 = vpop.permute.xlu0 %263  ;;  %v562_v48 = vmul.f32 %v5145_v15, %v269_v44  ;;  %v692_v56 = vmax.f32 %v628_v46, 0.0 }
  0x9e   : > { %v691_v47 = vmax.f32 %v627_v41, 0.0  ;;  %v561_v49 = vmul.f32 %v5145_v15, %v264_v45 }
  0x9f   : > { %v630_v53 = vadd.f32 %v5152_v18, %v562_v48 }
  0xa0   : > { %v629_v51 = vadd.f32 %v5152_v18, %v561_v49  ;;  %4065 = vmatmul.mubr.f32.gmra.mxu0 %v690_v43  ;;  %v279_v54 = vpop.permute.xlu1 %278 }
  0xa1   : > { %4067 = vmatprep.mubr.f32.mxu0 %v691_v47  ;;  %v274_v55 = vpop.permute.xlu0 %273  ;;  %v564_v58 = vmul.f32 %v5145_v15, %v279_v54  ;;  %v694_v63 = vmax.f32 %v630_v53, 0.0 }
  0xa2   : > { %v693_v57 = vmax.f32 %v629_v51, 0.0  ;;  %v563_v59 = vmul.f32 %v5145_v15, %v274_v55 }
  0xa3   : > { %v632_v2 = vadd.f32 %v5152_v18, %v564_v58 }
  0xa4   : > { %v631_v61 = vadd.f32 %v5152_v18, %v563_v59  ;;  %4068 = vmatmul.mubr.f32.gmra.mxu0 %v692_v56  ;;  %v289_v0 = vpop.permute.xlu1 %288 }
  0xa5   : > { %4070 = vmatprep.mubr.f32.mxu0 %v693_v57  ;;  %v284_v1 = vpop.permute.xlu0 %283  ;;  %v566_v4 = vmul.f32 %v5145_v15, %v289_v0  ;;  %v696_v12 = vmax.f32 %v632_v2, 0.0 }
  0xa6   : > { %v695_v3 = vmax.f32 %v631_v61, 0.0  ;;  %v565_v5 = vmul.f32 %v5145_v15, %v284_v1 }
  0xa7   : > { %v634_v9 = vadd.f32 %v5152_v18, %v566_v4 }
  0xa8   : > { %v633_v7 = vadd.f32 %v5152_v18, %v565_v5  ;;  %4071 = vmatmul.mubr.f32.gmra.mxu0 %v694_v63  ;;  %v299_v10 = vpop.permute.xlu1 %298 }
  0xa9   : > { %4073 = vmatprep.mubr.f32.mxu0 %v695_v3  ;;  %v294_v11 = vpop.permute.xlu0 %293  ;;  %v568_v14 = vmul.f32 %v5145_v15, %v299_v10  ;;  %v698_v21 = vmax.f32 %v634_v9, 0.0 }
  0xaa   : > { %v697_v13 = vmax.f32 %v633_v7, 0.0  ;;  %v567_v16 = vmul.f32 %v5145_v15, %v294_v11 }
  0xab   : > { %v636_v24 = vadd.f32 %v5152_v18, %v568_v14 }
  0xac   : > { %v635_v19 = vadd.f32 %v5152_v18, %v567_v16  ;;  %4074 = vmatmul.mubr.f32.gmra.mxu0 %v696_v12  ;;  %v309_v22 = vpop.permute.xlu1 %308 }
  0xad   : > { %4076 = vmatprep.mubr.f32.mxu0 %v697_v13  ;;  %v304_v23 = vpop.permute.xlu0 %303  ;;  %v570_v26 = vmul.f32 %v5145_v15, %v309_v22  ;;  %v700_v32 = vmax.f32 %v636_v24, 0.0 }
  0xae   : > { %v699_v25 = vmax.f32 %v635_v19, 0.0  ;;  %v569_v27 = vmul.f32 %v5145_v15, %v304_v23 }
  0xaf   : > { %v638_v29 = vadd.f32 %v5152_v18, %v570_v26 }
  0xb0   : > { %v637_v28 = vadd.f32 %v5152_v18, %v569_v27  ;;  %4077 = vmatmul.mubr.f32.gmra.mxu0 %v698_v21  ;;  %v319_v30 = vpop.permute.xlu1 %318 }
  0xb1   : > { %4079 = vmatprep.mubr.f32.mxu0 %v699_v25  ;;  %v314_v31 = vpop.permute.xlu0 %313  ;;  %v572_v34 = vmul.f32 %v5145_v15, %v319_v30  ;;  %v702_v37 = vmax.f32 %v638_v29, 0.0 }
  0xb2   : > { %v701_v33 = vmax.f32 %v637_v28, 0.0  ;;  %v571_v35 = vmul.f32 %v5145_v15, %v314_v31 }
  0xb3   : > { %v640_v40 = vadd.f32 %v5152_v18, %v572_v34 }
  0xb4   : > { %v639_v36 = vadd.f32 %v5152_v18, %v571_v35  ;;  %4080 = vmatmul.mubr.f32.gmra.mxu0 %v700_v32  ;;  %v329_v38 = vpop.permute.xlu1 %328 }
  0xb5   : > { %4082 = vmatprep.mubr.f32.mxu0 %v701_v33  ;;  %v324_v39 = vpop.permute.xlu0 %323  ;;  %v574_v42 = vmul.f32 %v5145_v15, %v329_v38  ;;  %v704_v48 = vmax.f32 %v640_v40, 0.0 }
  0xb6   : > { %v703_v41 = vmax.f32 %v639_v36, 0.0  ;;  %v573_v43 = vmul.f32 %v5145_v15, %v324_v39 }
  0xb7   : > { %v642_v45 = vadd.f32 %v5152_v18, %v574_v42 }
  0xb8   : > { %v641_v44 = vadd.f32 %v5152_v18, %v573_v43  ;;  %4083 = vmatmul.mubr.f32.gmra.mxu0 %v702_v37  ;;  %v339_v46 = vpop.permute.xlu1 %338 }
  0xb9   : > { %4085 = vmatprep.mubr.f32.mxu0 %v703_v41  ;;  %v334_v47 = vpop.permute.xlu0 %333  ;;  %v576_v50 = vmul.f32 %v5145_v15, %v339_v46  ;;  %v706_v53 = vmax.f32 %v642_v45, 0.0 }
  0xba   : > { %v705_v49 = vmax.f32 %v641_v44, 0.0  ;;  %v575_v51 = vmul.f32 %v5145_v15, %v334_v47 }
  0xbb   : > { %v644_v56 = vadd.f32 %v5152_v18, %v576_v50 }
  0xbc   : > { %v643_v52 = vadd.f32 %v5152_v18, %v575_v51  ;;  %4086 = vmatmul.mubr.f32.gmra.mxu0 %v704_v48  ;;  %v349_v54 = vpop.permute.xlu1 %348 }
  0xbd   : > { %4088 = vmatprep.mubr.f32.mxu0 %v705_v49  ;;  %v344_v55 = vpop.permute.xlu0 %343  ;;  %v578_v58 = vmul.f32 %v5145_v15, %v349_v54  ;;  %v708_v0 = vmax.f32 %v644_v56, 0.0  ;;  %v1224_v54 = vld [vmem:[%s6356_s1 + $0xb0] sm:$0xff] }
  0xbe   : > { %v707_v57 = vmax.f32 %v643_v52, 0.0  ;;  %v577_v59 = vmul.f32 %v5145_v15, %v344_v55  ;;  %4181 = vmatprep.subr.mxu1 %v1224_v54 }
  0xbf   : > { %v646_v61 = vadd.f32 %v5152_v18, %v578_v58  ;;  %4182 = vmatpush3.msra.mxu1 %v1224_v54 }
  0xc0   : > { %v645_v60 = vadd.f32 %v5152_v18, %v577_v59  ;;  %4089 = vmatmul.mubr.f32.gmra.mxu0 %v706_v53  ;;  %v359_v62 = vpop.permute.xlu1 %358  ;;  %v1223_v59 = vld [vmem:[%s6356_s1 + $0xa8] sm:$0xff] }
  0xc1   : > { %4091 = vmatprep.mubr.f32.mxu0 %v707_v57  ;;  %v354_v63 = vpop.permute.xlu0 %353  ;;  %v580_v2 = vmul.f32 %v5145_v15, %v359_v62  ;;  %v710_v5 = vmax.f32 %v646_v61, 0.0  ;;  %4183 = vmatprep.subr.mxu1 %v1223_v59 }
  0xc2   : > { %v709_v1 = vmax.f32 %v645_v60, 0.0  ;;  %v579_v3 = vmul.f32 %v5145_v15, %v354_v63  ;;  %4184 = vmatpush3.msra.mxu1 %v1223_v59 }
  0xc3   : > { %v648_v8 = vadd.f32 %v5152_v18, %v580_v2 }
  0xc4   : > { %v647_v4 = vadd.f32 %v5152_v18, %v579_v3  ;;  %4092 = vmatmul.mubr.f32.gmra.mxu0 %v708_v0  ;;  %v369_v6 = vpop.permute.xlu1 %368  ;;  %v1222_v0 = vld [vmem:[%s6356_s1 + $0xa0] sm:$0xff] }
  0xc5   : > { %4094 = vmatprep.mubr.f32.mxu0 %v709_v1  ;;  %v364_v7 = vpop.permute.xlu0 %363  ;;  %v582_v10 = vmul.f32 %v5145_v15, %v369_v6  ;;  %v712_v17 = vmax.f32 %v648_v8, 0.0  ;;  %4185 = vmatprep.subr.mxu1 %v1222_v0 }
  0xc6   : > { %v711_v9 = vmax.f32 %v647_v4, 0.0  ;;  %v581_v11 = vmul.f32 %v5145_v15, %v364_v7  ;;  %4186 = vmatpush3.msra.mxu1 %v1222_v0 }
  0xc7   : > { %v650_v13 = vadd.f32 %v5152_v18, %v582_v10 }
  0xc8   : > { %v649_v12 = vadd.f32 %v5152_v18, %v581_v11  ;;  %4095 = vmatmul.mubr.f32.gmra.mxu0 %v710_v5  ;;  %v379_v14 = vpop.permute.xlu1 %378  ;;  %v1221_v5 = vld [vmem:[%s6356_s1 + $0x98] sm:$0xff] }
  0xc9   : > { %4097 = vmatprep.mubr.f32.mxu0 %v711_v9  ;;  %v374_v16 = vpop.permute.xlu0 %373  ;;  %v584_v20 = vmul.f32 %v5145_v15, %v379_v14  ;;  %v714_v23 = vmax.f32 %v650_v13, 0.0  ;;  %4187 = vmatprep.subr.mxu1 %v1221_v5 }
  0xca   : > { %v713_v19 = vmax.f32 %v649_v12, 0.0  ;;  %v583_v21 = vmul.f32 %v5145_v15, %v374_v16  ;;  %4188 = vmatpush3.msra.mxu1 %v1221_v5 }
  0xcb   : > { %v652_v26 = vadd.f32 %v5152_v18, %v584_v20 }
  0xcc   : > { %v651_v22 = vadd.f32 %v5152_v18, %v583_v21  ;;  %4098 = vmatmul.mubr.f32.gmra.mxu0 %v712_v17  ;;  %v389_v24 = vpop.permute.xlu1 %388 }
  0xcd   : > { %4100 = vmatprep.mubr.f32.mxu0 %v713_v19  ;;  %v384_v25 = vpop.permute.xlu0 %383  ;;  %v586_v28 = vmul.f32 %v5145_v15, %v389_v24  ;;  %v716_v34 = vmax.f32 %v652_v26, 0.0 }
  0xce   : > { %v715_v27 = vmax.f32 %v651_v22, 0.0  ;;  %v585_v29 = vmul.f32 %v5145_v15, %v384_v25 }
  0xcf   : > { %v654_v31 = vadd.f32 %v5152_v18, %v586_v28 }
  0xd0   : > { %v653_v30 = vadd.f32 %v5152_v18, %v585_v29  ;;  %4101 = vmatmul.mubr.f32.gmra.mxu0 %v714_v23  ;;  %v399_v32 = vpop.permute.xlu1 %398 }
  0xd1   : > { %4103 = vmatprep.mubr.f32.mxu0 %v715_v27  ;;  %v394_v33 = vpop.permute.xlu0 %393  ;;  %v588_v36 = vmul.f32 %v5145_v15, %v399_v32  ;;  %v718_v39 = vmax.f32 %v654_v31, 0.0 }
  0xd2   : > { %v717_v35 = vmax.f32 %v653_v30, 0.0  ;;  %v587_v37 = vmul.f32 %v5145_v15, %v394_v33 }
  0xd3   : > { %v656_v42 = vadd.f32 %v5152_v18, %v588_v36 }
  0xd4   : > { %v655_v38 = vadd.f32 %v5152_v18, %v587_v37  ;;  %4104 = vmatmul.mubr.f32.gmra.mxu0 %v716_v34  ;;  %v409_v40 = vpop.permute.xlu1 %408 }
  0xd5   : > { %4106 = vmatprep.mubr.f32.mxu0 %v717_v35  ;;  %v404_v41 = vpop.permute.xlu0 %403  ;;  %v590_v44 = vmul.f32 %v5145_v15, %v409_v40  ;;  %v720_v50 = vmax.f32 %v656_v42, 0.0 }
  0xd6   : > { %v719_v43 = vmax.f32 %v655_v38, 0.0  ;;  %v589_v45 = vmul.f32 %v5145_v15, %v404_v41 }
  0xd7   : > { %v658_v47 = vadd.f32 %v5152_v18, %v590_v44 }
  0xd8   : > { %v657_v46 = vadd.f32 %v5152_v18, %v589_v45  ;;  %4107 = vmatmul.mubr.f32.gmra.mxu0 %v718_v39  ;;  %v419_v48 = vpop.permute.xlu1 %418 }
  0xd9   : > { %4109 = vmatprep.mubr.f32.mxu0 %v719_v43  ;;  %v414_v49 = vpop.permute.xlu0 %413  ;;  %v592_v52 = vmul.f32 %v5145_v15, %v419_v48  ;;  %v722_v56 = vmax.f32 %v658_v47, 0.0 }
  0xda   : > { %v721_v51 = vmax.f32 %v657_v46, 0.0  ;;  %v591_v53 = vmul.f32 %v5145_v15, %v414_v49 }
  0xdb   : > { %v660_v60 = vadd.f32 %v5152_v18, %v592_v52 }
  0xdc   : > { %v659_v55 = vadd.f32 %v5152_v18, %v591_v53  ;;  %4110 = vmatmul.mubr.f32.gmra.mxu0 %v720_v50  ;;  %v429_v57 = vpop.permute.xlu1 %428 }
  0xdd   : > { %4112 = vmatprep.mubr.f32.mxu0 %v721_v51  ;;  %v424_v58 = vpop.permute.xlu0 %423  ;;  %v594_v62 = vmul.f32 %v5145_v15, %v429_v57  ;;  %v724_v6 = vmax.f32 %v660_v60, 0.0 }
  0xde   : > { %v723_v61 = vmax.f32 %v659_v55, 0.0  ;;  %v593_v63 = vmul.f32 %v5145_v15, %v424_v58 }
  0xdf   : > { %v662_v2 = vadd.f32 %v5152_v18, %v594_v62 }
  0xe0   : > { %v661_v1 = vadd.f32 %v5152_v18, %v593_v63  ;;  %4113 = vmatmul.mubr.f32.gmra.mxu0 %v722_v56  ;;  %v439_v3 = vpop.permute.xlu1 %438 }
  0xe1   : > { %4115 = vmatprep.mubr.f32.mxu0 %v723_v61  ;;  %v434_v4 = vpop.permute.xlu0 %433  ;;  %v596_v8 = vmul.f32 %v5145_v15, %v439_v3  ;;  %v726_v11 = vmax.f32 %v662_v2, 0.0 }
  0xe2   : > { %v725_v7 = vmax.f32 %v661_v1, 0.0  ;;  %v595_v9 = vmul.f32 %v5145_v15, %v434_v4 }
  0xe3   : > { %v664_v14 = vadd.f32 %v5152_v18, %v596_v8 }
  0xe4   : > { %v663_v10 = vadd.f32 %v5152_v18, %v595_v9  ;;  %4116 = vmatmul.mubr.f32.gmra.mxu0 %v724_v6  ;;  %v449_v12 = vpop.permute.xlu1 %448 }
  0xe5   : > { %4118 = vmatprep.mubr.f32.mxu0 %v725_v7  ;;  %v444_v13 = vpop.permute.xlu0 %443  ;;  %v598_v17 = vmul.f32 %v5145_v15, %v449_v12  ;;  %v728_v24 = vmax.f32 %v664_v14, 0.0 }
  0xe6   : > { %v727_v16 = vmax.f32 %v663_v10, 0.0  ;;  %v597_v19 = vmul.f32 %v5145_v15, %v444_v13 }
  0xe7   : > { %v666_v21 = vadd.f32 %v5152_v18, %v598_v17 }
  0xe8   : > { %v665_v20 = vadd.f32 %v5152_v18, %v597_v19  ;;  %4119 = vmatmul.mubr.f32.gmra.mxu0 %v726_v11  ;;  %v459_v22 = vpop.permute.xlu1 %458 }
  0xe9   : > { %4121 = vmatprep.mubr.f32.mxu0 %v727_v16  ;;  %v454_v23 = vpop.permute.xlu0 %453  ;;  %v600_v26 = vmul.f32 %v5145_v15, %v459_v22  ;;  %v730_v29 = vmax.f32 %v666_v21, 0.0 }
  0xea   : > { %v729_v25 = vmax.f32 %v665_v20, 0.0  ;;  %v599_v27 = vmul.f32 %v5145_v15, %v454_v23 }
  0xeb   : > { %v668_v32 = vadd.f32 %v5152_v18, %v600_v26 }
  0xec   : > { %v667_v28 = vadd.f32 %v5152_v18, %v599_v27  ;;  %4122 = vmatmul.mubr.f32.gmra.mxu0 %v728_v24  ;;  %v469_v30 = vpop.permute.xlu1 %468 }
  0xed   : > { %4124 = vmatprep.mubr.f32.mxu0 %v729_v25  ;;  %v464_v31 = vpop.permute.xlu0 %463  ;;  %v602_v34 = vmul.f32 %v5145_v15, %v469_v30  ;;  %v732_v40 = vmax.f32 %v668_v32, 0.0 }
  0xee   : > { %v731_v33 = vmax.f32 %v667_v28, 0.0  ;;  %v601_v35 = vmul.f32 %v5145_v15, %v464_v31 }
  0xef   : > { %v670_v37 = vadd.f32 %v5152_v18, %v602_v34 }
  0xf0   : > { %v669_v36 = vadd.f32 %v5152_v18, %v601_v35  ;;  %4125 = vmatmul.mubr.f32.gmra.mxu0 %v730_v29  ;;  %v479_v38 = vpop.permute.xlu1 %478 }
  0xf1   : > { %4127 = vmatprep.mubr.f32.mxu0 %v731_v33  ;;  %v474_v39 = vpop.permute.xlu0 %473  ;;  %v604_v42 = vmul.f32 %v5145_v15, %v479_v38  ;;  %v734_v45 = vmax.f32 %v670_v37, 0.0 }
  0xf2   : > { %v733_v41 = vmax.f32 %v669_v36, 0.0  ;;  %v603_v43 = vmul.f32 %v5145_v15, %v474_v39 }
  0xf3   : > { %v672_v48 = vadd.f32 %v5152_v18, %v604_v42 }
  0xf4   : > { %v671_v44 = vadd.f32 %v5152_v18, %v603_v43  ;;  %4128 = vmatmul.mubr.f32.gmra.mxu0 %v732_v40  ;;  %v489_v46 = vpop.permute.xlu1 %488  ;;  %v1706_v43 = vld [vmem:[%s6356_s1 + $0x198] sm:$0xff] }
  0xf5   : > { %4130 = vmatprep.mubr.f32.mxu0 %v733_v41  ;;  %v484_v47 = vpop.permute.xlu0 %483  ;;  %v606_v50 = vmul.f32 %v5145_v15, %v489_v46  ;;  %v736_v56 = vmax.f32 %v672_v48, 0.0  ;;  %4285 = vmatprep.subr.mxu0 %v1706_v43  ;;  %v1701_v46 = vld [vmem:[%s6356_s1 + $0x170] sm:$0xff] }
  0xf6   : > { %v735_v49 = vmax.f32 %v671_v44, 0.0  ;;  %v605_v51 = vmul.f32 %v5145_v15, %v484_v47  ;;  %4286 = vmatpush3.msra.mxu0 %v1706_v43  ;;  %v1703_v44 = vld [vmem:[%s6356_s1 + $0x180] sm:$0xff]  ;;  %v5351_v47 = vld [vmem:[%s6356_s1 + $0x90] ss:$0 sm:$0xff] }
  0xf7   : > { %v674_v53 = vadd.f32 %v5152_v18, %v606_v50 }
  0xf8   : > { %v673_v52 = vadd.f32 %v5152_v18, %v605_v51  ;;  %4131 = vmatmul.mubr.f32.gmra.mxu0 %v734_v45  ;;  %v499_v54 = vpop.permute.xlu1 %498  ;;  %v1702_v45 = vld [vmem:[%s6356_s1 + $0x178] sm:$0xff] }
  0xf9   : > { %4133 = vmatprep.mubr.f32.mxu0 %v735_v49  ;;  %v494_v55 = vpop.permute.xlu0 %493  ;;  %v608_v58 = vmul.f32 %v5145_v15, %v499_v54  ;;  %v738_v61 = vmax.f32 %v674_v53, 0.0  ;;  %v1700_v49 = vld [vmem:[%s6356_s1 + $0x168] sm:$0xff]  ;;  %v1699_v54 = vld [vmem:[%s6356_s1 + $0x160] sm:$0xff] }
  0xfa   : > { %v737_v57 = vmax.f32 %v673_v52, 0.0  ;;  %v607_v59 = vmul.f32 %v5145_v15, %v494_v55  ;;  %v1698_v55 = vld [vmem:[%s6356_s1 + $0x158] sm:$0xff] }
  0xfb   : > { %v676_v0 = vadd.f32 %v5152_v18, %v608_v58 }
  0xfc   : > { %v675_v60 = vadd.f32 %v5152_v18, %v607_v59  ;;  %4134 = vmatmul.mubr.f32.gmra.mxu0 %v736_v56  ;;  %v509_v62 = vpop.permute.xlu1 %508 }
  0xfd   : > { %4136 = vmatprep.mubr.f32.mxu0 %v737_v57  ;;  %v504_v63 = vpop.permute.xlu0 %503  ;;  %v610_v2 = vmul.f32 %v5145_v15, %v509_v62  ;;  %v740_v8 = vmax.f32 %v676_v0, 0.0 }
  0xfe   : > { %v739_v1 = vmax.f32 %v675_v60, 0.0  ;;  %v609_v3 = vmul.f32 %v5145_v15, %v504_v63  ;;  %v1697_v60 = vld [vmem:[%s6356_s1 + $0x150] sm:$0xff]  ;;  %v1696_v63 = vld [vmem:[%s6356_s1 + $0x148] sm:$0xff] }
  0xff   : > { %v678_v5 = vadd.f32 %v5152_v18, %v610_v2 }
 0x100   : > { %v677_v4 = vadd.f32 %v5152_v18, %v609_v3  ;;  %4137 = vmatmul.mubr.f32.gmra.mxu0 %v738_v61  ;;  %v519_v6 = vpop.permute.xlu1 %518 }
 0x101   : > { %4139 = vmatprep.mubr.f32.mxu0 %v739_v1  ;;  %v514_v7 = vpop.permute.xlu0 %513  ;;  %v612_v10 = vmul.f32 %v5145_v15, %v519_v6  ;;  %v742_v13 = vmax.f32 %v678_v5, 0.0 }
 0x102   : > { %v741_v9 = vmax.f32 %v677_v4, 0.0  ;;  %v611_v11 = vmul.f32 %v5145_v15, %v514_v7  ;;  %v1695_v4 = vld [vmem:[%s6356_s1 + $0x140] sm:$0xff]  ;;  %v1694_v7 = vld [vmem:[%s6356_s1 + $0x138] sm:$0xff] }
 0x103   : > { %v680_v17 = vadd.f32 %v5152_v18, %v612_v10 }
 0x104   : > { %v679_v12 = vadd.f32 %v5152_v18, %v611_v11  ;;  %4140 = vmatmul.mubr.f32.gmra.mxu0 %v740_v8  ;;  %v529_v14 = vpop.permute.xlu1 %528 }
 0x105   : > { %4142 = vmatprep.mubr.f32.mxu0 %v741_v9  ;;  %v524_v16 = vpop.permute.xlu0 %523  ;;  %v614_v20 = vmul.f32 %v5145_v15, %v529_v14  ;;  %v744_v26 = vmax.f32 %v680_v17, 0.0 }
 0x106   : > { %v743_v19 = vmax.f32 %v679_v12, 0.0  ;;  %v613_v21 = vmul.f32 %v5145_v15, %v524_v16  ;;  %v1693_v12 = vld [vmem:[%s6356_s1 + $0x130] sm:$0xff]  ;;  %v1692_v16 = vld [vmem:[%s6356_s1 + $0x128] sm:$0xff] }
 0x107   : > { %v682_v23 = vadd.f32 %v5152_v18, %v614_v20 }
 0x108   : > { %v681_v22 = vadd.f32 %v5152_v18, %v613_v21  ;;  %4143 = vmatmul.mubr.f32.gmra.mxu0 %v742_v13  ;;  %v539_v24 = vpop.permute.xlu1 %538 }
 0x109   : > { %4145 = vmatprep.mubr.f32.mxu0 %v743_v19  ;;  %v534_v25 = vpop.permute.xlu0 %533  ;;  %v616_v28 = vmul.f32 %v5145_v15, %v539_v24  ;;  %v746_v31 = vmax.f32 %v682_v23, 0.0 }
 0x10a   : > { %v745_v27 = vmax.f32 %v681_v22, 0.0  ;;  %v615_v29 = vmul.f32 %v5145_v15, %v534_v25  ;;  %v1691_v22 = vld [vmem:[%s6356_s1 + $0x120] sm:$0xff] }
 0x10b   : > { %v684_v34 = vadd.f32 %v5152_v18, %v616_v28 }
 0x10c   : > { %v683_v30 = vadd.f32 %v5152_v18, %v615_v29  ;;  %4146 = vmatmul.mubr.f32.gmra.mxu0 %v744_v26  ;;  %v549_v32 = vpop.permute.xlu1 %548 }
 0x10d   : > { %4148 = vmatprep.mubr.f32.mxu0 %v745_v27  ;;  %v544_v33 = vpop.permute.xlu0 %543  ;;  %v618_v36 = vmul.f32 %v5145_v15, %v549_v32  ;;  %v748_v39 = vmax.f32 %v684_v34, 0.0 }
 0x10e   : > { %v747_v35 = vmax.f32 %v683_v30, 0.0  ;;  %v617_v37 = vmul.f32 %v5145_v15, %v544_v33  ;;  %v1705_v15 = vld [vmem:[%s6356_s1 + $0x190] sm:$0xff] }
 0x10f   : > { %v686_v40 = vadd.f32 %v5152_v18, %v618_v36  ;;  %4287 = vmatprep.subr.mxu0 %v1705_v15 }
 0x110   : > { %v685_v38 = vadd.f32 %v5152_v18, %v617_v37  ;;  %4149 = vmatmul.mubr.f32.gmra.mxu0 %v746_v31  ;;  %v1704_v18 = vld [vmem:[%s6356_s1 + $0x188] sm:$0xff] }
 0x111   : > { %4151 = vmatprep.mubr.f32.mxu0 %v747_v35  ;;  %v750_v42 = vmax.f32 %v686_v40, 0.0  ;;  %4288 = vmatpush3.msra.mxu0 %v1705_v15 }
 0x112   : > { %v749_v41 = vmax.f32 %v685_v38, 0.0  ;;  %4289 = vmatprep.subr.mxu0 %v1704_v18 }
 0x113   : > { %4290 = vmatpush3.msra.mxu0 %v1704_v18 }
 0x114   : > { %4152 = vmatmul.mubr.f32.gmra.mxu0 %v748_v39  ;;  %4291 = vmatprep.subr.mxu0 %v1703_v44 }
 0x115   : > { %4154 = vmatprep.mubr.f32.mxu0 %v749_v41  ;;  %4292 = vmatpush3.msra.mxu0 %v1703_v44 }
 0x116   : > { %4293 = vmatprep.subr.mxu0 %v1702_v45 }
 0x117   : > { %4294 = vmatpush3.msra.mxu0 %v1702_v45 }
 0x118   : > { %4155 = vmatmul.mubr.f32.gmra.mxu0 %v750_v42  ;;  %4295 = vmatprep.subr.mxu0 %v1701_v46 }
 0x119   : > { %4296 = vmatpush3.msra.mxu0 %v1701_v46 }
 0x11a   : > { %4297 = vmatprep.subr.mxu0 %v1700_v49 }
 0x11b   : > { %4298 = vmatpush3.msra.mxu0 %v1700_v49 }
 0x11c   : > { %4299 = vmatprep.subr.mxu0 %v1699_v54 }
 0x11d   : > { %4300 = vmatpush3.msra.mxu0 %v1699_v54 }
 0x11e   : > { %4301 = vmatprep.subr.mxu0 %v1698_v55 }
 0x11f   : > { %4302 = vmatpush3.msra.mxu0 %v1698_v55 }
 0x120   : > { %4303 = vmatprep.subr.mxu0 %v1697_v60 }
 0x121   : > { %4304 = vmatpush3.msra.mxu0 %v1697_v60 }
 0x122   : > { %4305 = vmatprep.subr.mxu0 %v1696_v63 }
 0x123   : > { %4306 = vmatpush3.msra.mxu0 %v1696_v63 }
 0x124   : > { %4307 = vmatprep.subr.mxu0 %v1695_v4 }
 0x125   : > { %4308 = vmatpush3.msra.mxu0 %v1695_v4 }
 0x126   : > { %4309 = vmatprep.subr.mxu0 %v1694_v7 }
 0x127   : > { %4310 = vmatpush3.msra.mxu0 %v1694_v7 }
 0x128   : > { %4311 = vmatprep.subr.mxu0 %v1693_v12 }
 0x129   : > { %4312 = vmatpush3.msra.mxu0 %v1693_v12 }
 0x12a   : > { %4313 = vmatprep.subr.mxu0 %v1692_v16 }
 0x12b   : > { %4314 = vmatpush3.msra.mxu0 %v1692_v16 }
 0x12c   : > { %4315 = vmatprep.subr.mxu0 %v1691_v22 }
 0x12d   : > { %4316 = vmatpush3.msra.mxu0 %v1691_v22 }
 0x15c   : > { %v4063_v48 = vpop.f32.mrf.mxu0 }
 0x15d   : > { %v844_v50 = vadd.f32 %v4063_v48, %v5351_v47 }
 0x15e   : > { %v838_v51 = vpop.f32.mrf.mxu0 }
 0x15f   : > { %v839_v52 = vadd.f32 %v5351_v47, %v838_v51  ;;  %v1158_v57 = vmax.f32 %v844_v50, 0.0 }
 0x160   : > { %v4066_v53 = vpop.f32.mrf.mxu0 }
 0x161   : > { %v1157_v56 = vmax.f32 %v839_v52, 0.0  ;;  %v854_v58 = vadd.f32 %v4066_v53, %v5351_v47 }
 0x162   : > { %v848_v59 = vpop.f32.mrf.mxu0 }
 0x163   : > { %v849_v61 = vadd.f32 %v5351_v47, %v848_v59  ;;  %4189 = vmatprep.mubr.f32.mxu1 %v1157_v56  ;;  %v1160_v1 = vmax.f32 %v854_v58, 0.0 }
 0x164   : > { %v4069_v62 = vpop.f32.mrf.mxu0  ;;  %4190 = vmatmul.mubr.f32.vlgmr.msra.gmra.mxu1 %v1158_v57 }
 0x165   : > { %v1159_v0 = vmax.f32 %v849_v61, 0.0  ;;  %v864_v2 = vadd.f32 %v4069_v62, %v5351_v47 }
 0x166   : > { %v858_v3 = vpop.f32.mrf.mxu0 }
 0x167   : > { %v859_v5 = vadd.f32 %v5351_v47, %v858_v3  ;;  %4192 = vmatprep.mubr.f32.mxu1 %v1159_v0  ;;  %v1162_v9 = vmax.f32 %v864_v2, 0.0 }
 0x168   : > { %v4072_v6 = vpop.f32.mrf.mxu0  ;;  %4193 = vmatmul.mubr.f32.gmra.mxu1 %v1160_v1 }
 0x169   : > { %v1161_v8 = vmax.f32 %v859_v5, 0.0  ;;  %v874_v10 = vadd.f32 %v4072_v6, %v5351_v47 }
 0x16a   : > { %v868_v11 = vpop.f32.mrf.mxu0 }
 0x16b   : > { %v869_v13 = vadd.f32 %v5351_v47, %v868_v11  ;;  %4195 = vmatprep.mubr.f32.mxu1 %v1161_v8  ;;  %v1164_v19 = vmax.f32 %v874_v10, 0.0 }
 0x16c   : > { %v4075_v14 = vpop.f32.mrf.mxu0  ;;  %4196 = vmatmul.mubr.f32.gmra.mxu1 %v1162_v9 }
 0x16d   : > { %v1163_v17 = vmax.f32 %v869_v13, 0.0  ;;  %v884_v20 = vadd.f32 %v4075_v14, %v5351_v47 }
 0x16e   : > { %v878_v21 = vpop.f32.mrf.mxu0 }
 0x16f   : > { %v879_v23 = vadd.f32 %v5351_v47, %v878_v21  ;;  %4198 = vmatprep.mubr.f32.mxu1 %v1163_v17  ;;  %v1166_v26 = vmax.f32 %v884_v20, 0.0 }
 0x170   : > { %v4078_v24 = vpop.f32.mrf.mxu0  ;;  %4199 = vmatmul.mubr.f32.gmra.mxu1 %v1164_v19 }
 0x171   : > { %v1165_v25 = vmax.f32 %v879_v23, 0.0  ;;  %v894_v27 = vadd.f32 %v4078_v24, %v5351_v47 }
 0x172   : > { %v888_v28 = vpop.f32.mrf.mxu0 }
 0x173   : > { %v889_v29 = vadd.f32 %v5351_v47, %v888_v28  ;;  %4201 = vmatprep.mubr.f32.mxu1 %v1165_v25  ;;  %v1168_v32 = vmax.f32 %v894_v27, 0.0 }
 0x174   : > { %v4081_v30 = vpop.f32.mrf.mxu0  ;;  %4202 = vmatmul.mubr.f32.gmra.mxu1 %v1166_v26 }
 0x175   : > { %v1167_v31 = vmax.f32 %v889_v29, 0.0  ;;  %v904_v33 = vadd.f32 %v4081_v30, %v5351_v47 }
 0x176   : > { %v898_v34 = vpop.f32.mrf.mxu0 }
 0x177   : > { %v899_v35 = vadd.f32 %v5351_v47, %v898_v34  ;;  %4204 = vmatprep.mubr.f32.mxu1 %v1167_v31  ;;  %v1170_v38 = vmax.f32 %v904_v33, 0.0 }
 0x178   : > { %v4084_v36 = vpop.f32.mrf.mxu0  ;;  %4205 = vmatmul.mubr.f32.gmra.mxu1 %v1168_v32 }
 0x179   : > { %v1169_v37 = vmax.f32 %v899_v35, 0.0  ;;  %v914_v39 = vadd.f32 %v4084_v36, %v5351_v47 }
 0x17a   : > { %v908_v40 = vpop.f32.mrf.mxu0 }
 0x17b   : > { %v909_v41 = vadd.f32 %v5351_v47, %v908_v40  ;;  %4207 = vmatprep.mubr.f32.mxu1 %v1169_v37  ;;  %v1172_v15 = vmax.f32 %v914_v39, 0.0 }
 0x17c   : > { %v4087_v42 = vpop.f32.mrf.mxu0  ;;  %4208 = vmatmul.mubr.f32.gmra.mxu1 %v1170_v38 }
 0x17d   : > { %v1171_v43 = vmax.f32 %v909_v41, 0.0  ;;  %v924_v18 = vadd.f32 %v4087_v42, %v5351_v47 }
 0x17e   : > { %v918_v44 = vpop.f32.mrf.mxu0 }
 0x17f   : > { %v919_v45 = vadd.f32 %v5351_v47, %v918_v44  ;;  %4210 = vmatprep.mubr.f32.mxu1 %v1171_v43  ;;  %v1174_v49 = vmax.f32 %v924_v18, 0.0 }
 0x180   : > { %v4090_v46 = vpop.f32.mrf.mxu0  ;;  %4211 = vmatmul.mubr.f32.gmra.mxu1 %v1172_v15 }
 0x181   : > { %v1173_v48 = vmax.f32 %v919_v45, 0.0  ;;  %v934_v50 = vadd.f32 %v4090_v46, %v5351_v47 }
 0x182   : > { %v928_v51 = vpop.f32.mrf.mxu0 }
 0x183   : > { %v929_v52 = vadd.f32 %v5351_v47, %v928_v51  ;;  %4213 = vmatprep.mubr.f32.mxu1 %v1173_v48  ;;  %v1176_v55 = vmax.f32 %v934_v50, 0.0 }
 0x184   : > { %v4093_v53 = vpop.f32.mrf.mxu0  ;;  %4214 = vmatmul.mubr.f32.gmra.mxu1 %v1174_v49 }
 0x185   : > { %v1175_v54 = vmax.f32 %v929_v52, 0.0  ;;  %v944_v56 = vadd.f32 %v4093_v53, %v5351_v47 }
 0x186   : > { %v938_v57 = vpop.f32.mrf.mxu0 }
 0x187   : > { %v939_v58 = vadd.f32 %v5351_v47, %v938_v57  ;;  %4216 = vmatprep.mubr.f32.mxu1 %v1175_v54  ;;  %v1178_v61 = vmax.f32 %v944_v56, 0.0 }
 0x188   : > { %v4096_v59 = vpop.f32.mrf.mxu0  ;;  %4217 = vmatmul.mubr.f32.gmra.mxu1 %v1176_v55 }
 0x189   : > { %v1177_v60 = vmax.f32 %v939_v58, 0.0  ;;  %v954_v62 = vadd.f32 %v4096_v59, %v5351_v47 }
 0x18a   : > { %v948_v63 = vpop.f32.mrf.mxu0 }
 0x18b   : > { %v949_v0 = vadd.f32 %v5351_v47, %v948_v63  ;;  %4219 = vmatprep.mubr.f32.mxu1 %v1177_v60  ;;  %v1180_v3 = vmax.f32 %v954_v62, 0.0 }
 0x18c   : > { %v4099_v1 = vpop.f32.mrf.mxu0  ;;  %4220 = vmatmul.mubr.f32.gmra.mxu1 %v1178_v61 }
 0x18d   : > { %v1179_v2 = vmax.f32 %v949_v0, 0.0  ;;  %v964_v4 = vadd.f32 %v4099_v1, %v5351_v47 }
 0x18e   : > { %v958_v5 = vpop.f32.mrf.mxu0 }
 0x18f   : > { %v959_v6 = vadd.f32 %v5351_v47, %v958_v5  ;;  %4222 = vmatprep.mubr.f32.mxu1 %v1179_v2  ;;  %v1182_v9 = vmax.f32 %v964_v4, 0.0 }
 0x190   : > { %v4102_v7 = vpop.f32.mrf.mxu0  ;;  %4223 = vmatmul.mubr.f32.gmra.mxu1 %v1180_v3 }
 0x191   : > { %v1181_v8 = vmax.f32 %v959_v6, 0.0  ;;  %v974_v10 = vadd.f32 %v4102_v7, %v5351_v47 }
 0x192   : > { %v968_v11 = vpop.f32.mrf.mxu0 }
 0x193   : > { %v969_v12 = vadd.f32 %v5351_v47, %v968_v11  ;;  %4225 = vmatprep.mubr.f32.mxu1 %v1181_v8  ;;  %v1184_v16 = vmax.f32 %v974_v10, 0.0 }
 0x194   : > { %v4105_v13 = vpop.f32.mrf.mxu0  ;;  %4226 = vmatmul.mubr.f32.gmra.mxu1 %v1182_v9 }
 0x195   : > { %v1183_v14 = vmax.f32 %v969_v12, 0.0  ;;  %v984_v17 = vadd.f32 %v4105_v13, %v5351_v47 }
 0x196   : > { %v978_v19 = vpop.f32.mrf.mxu0 }
 0x197   : > { %v979_v20 = vadd.f32 %v5351_v47, %v978_v19  ;;  %4228 = vmatprep.mubr.f32.mxu1 %v1183_v14  ;;  %v1186_v23 = vmax.f32 %v984_v17, 0.0 }
 0x198   : > { %v4108_v21 = vpop.f32.mrf.mxu0  ;;  %4229 = vmatmul.mubr.f32.gmra.mxu1 %v1184_v16 }
 0x199   : > { %v1185_v22 = vmax.f32 %v979_v20, 0.0  ;;  %v994_v24 = vadd.f32 %v4108_v21, %v5351_v47 }
 0x19a   : > { %v988_v25 = vpop.f32.mrf.mxu0 }
 0x19b   : > { %v989_v26 = vadd.f32 %v5351_v47, %v988_v25  ;;  %4231 = vmatprep.mubr.f32.mxu1 %v1185_v22  ;;  %v1188_v29 = vmax.f32 %v994_v24, 0.0 }
 0x19c   : > { %v4111_v27 = vpop.f32.mrf.mxu0  ;;  %4232 = vmatmul.mubr.f32.gmra.mxu1 %v1186_v23 }
 0x19d   : > { %v1187_v28 = vmax.f32 %v989_v26, 0.0  ;;  %v1004_v30 = vadd.f32 %v4111_v27, %v5351_v47 }
 0x19e   : > { %v998_v31 = vpop.f32.mrf.mxu0 }
 0x19f   : > { %v999_v32 = vadd.f32 %v5351_v47, %v998_v31  ;;  %4234 = vmatprep.mubr.f32.mxu1 %v1187_v28  ;;  %v1190_v35 = vmax.f32 %v1004_v30, 0.0 }
 0x1a0   : > { %v4114_v33 = vpop.f32.mrf.mxu0  ;;  %4235 = vmatmul.mubr.f32.gmra.mxu1 %v1188_v29 }
 0x1a1   : > { %v1189_v34 = vmax.f32 %v999_v32, 0.0  ;;  %v1014_v36 = vadd.f32 %v4114_v33, %v5351_v47 }
 0x1a2   : > { %v1008_v37 = vpop.f32.mrf.mxu0 }
 0x1a3   : > { %v1009_v38 = vadd.f32 %v5351_v47, %v1008_v37  ;;  %4237 = vmatprep.mubr.f32.mxu1 %v1189_v34  ;;  %v1192_v41 = vmax.f32 %v1014_v36, 0.0 }
 0x1a4   : > { %v4117_v39 = vpop.f32.mrf.mxu0  ;;  %4238 = vmatmul.mubr.f32.gmra.mxu1 %v1190_v35 }
 0x1a5   : > { %v1191_v40 = vmax.f32 %v1009_v38, 0.0  ;;  %v1024_v42 = vadd.f32 %v4117_v39, %v5351_v47 }
 0x1a6   : > { %v1018_v43 = vpop.f32.mrf.mxu0 }
 0x1a7   : > { %v1019_v15 = vadd.f32 %v5351_v47, %v1018_v43  ;;  %4240 = vmatprep.mubr.f32.mxu1 %v1191_v40  ;;  %v1194_v45 = vmax.f32 %v1024_v42, 0.0 }
 0x1a8   : > { %v4120_v18 = vpop.f32.mrf.mxu0  ;;  %4241 = vmatmul.mubr.f32.gmra.mxu1 %v1192_v41 }
 0x1a9   : > { %v1193_v44 = vmax.f32 %v1019_v15, 0.0  ;;  %v1034_v46 = vadd.f32 %v4120_v18, %v5351_v47 }
 0x1aa   : > { %v1028_v48 = vpop.f32.mrf.mxu0 }
 0x1ab   : > { %v1029_v49 = vadd.f32 %v5351_v47, %v1028_v48  ;;  %4243 = vmatprep.mubr.f32.mxu1 %v1193_v44  ;;  %v1196_v52 = vmax.f32 %v1034_v46, 0.0 }
 0x1ac   : > { %v4123_v50 = vpop.f32.mrf.mxu0  ;;  %4244 = vmatmul.mubr.f32.gmra.mxu1 %v1194_v45 }
 0x1ad   : > { %v1195_v51 = vmax.f32 %v1029_v49, 0.0  ;;  %v1044_v53 = vadd.f32 %v4123_v50, %v5351_v47 }
 0x1ae   : > { %v1038_v54 = vpop.f32.mrf.mxu0 }
 0x1af   : > { %v1039_v55 = vadd.f32 %v5351_v47, %v1038_v54  ;;  %4246 = vmatprep.mubr.f32.mxu1 %v1195_v51  ;;  %v1198_v58 = vmax.f32 %v1044_v53, 0.0 }
 0x1b0   : > { %v4126_v56 = vpop.f32.mrf.mxu0  ;;  %4247 = vmatmul.mubr.f32.gmra.mxu1 %v1196_v52 }
 0x1b1   : > { %v1197_v57 = vmax.f32 %v1039_v55, 0.0  ;;  %v1054_v59 = vadd.f32 %v4126_v56, %v5351_v47 }
 0x1b2   : > { %v1048_v60 = vpop.f32.mrf.mxu0 }
 0x1b3   : > { %v1049_v61 = vadd.f32 %v5351_v47, %v1048_v60  ;;  %4249 = vmatprep.mubr.f32.mxu1 %v1197_v57  ;;  %v1200_v0 = vmax.f32 %v1054_v59, 0.0 }
 0x1b4   : > { %v4129_v62 = vpop.f32.mrf.mxu0  ;;  %4250 = vmatmul.mubr.f32.gmra.mxu1 %v1198_v58 }
 0x1b5   : > { %v1199_v63 = vmax.f32 %v1049_v61, 0.0  ;;  %v1064_v1 = vadd.f32 %v4129_v62, %v5351_v47  ;;  %v2176_v61 = vld [vmem:[%s6356_s1 + $0x220] sm:$0xff]  ;;  %v2175_v62 = vld [vmem:[%s6356_s1 + $0x218] sm:$0xff] }
 0x1b6   : > { %v1058_v2 = vpop.f32.mrf.mxu0  ;;  %4413 = vmatprep.subr.mxu1 %v2176_v61 }
 0x1b7   : > { %v1059_v3 = vadd.f32 %v5351_v47, %v1058_v2  ;;  %4252 = vmatprep.mubr.f32.mxu1 %v1199_v63  ;;  %v1202_v6 = vmax.f32 %v1064_v1, 0.0  ;;  %4414 = vmatpush3.msra.mxu1 %v2176_v61  ;;  %v2173_v63 = vld [vmem:[%s6356_s1 + $0x208] sm:$0xff]  ;;  %v2171_v1 = vld [vmem:[%s6356_s1 + $0x1f8] sm:$0xff] }
 0x1b8   : > { %v4132_v4 = vpop.f32.mrf.mxu0  ;;  %4253 = vmatmul.mubr.f32.gmra.mxu1 %v1200_v0  ;;  %4415 = vmatprep.subr.mxu1 %v2175_v62  ;;  %v2172_v0 = vld [vmem:[%s6356_s1 + $0x200] sm:$0xff]  ;;  %v5468_v2 = vld [vmem:[%s6356_s1 + $0x118] ss:$0 sm:$0xff] }
 0x1b9   : > { %v1201_v5 = vmax.f32 %v1059_v3, 0.0  ;;  %v1074_v7 = vadd.f32 %v4132_v4, %v5351_v47  ;;  %4416 = vmatpush3.msra.mxu1 %v2175_v62  ;;  %v2170_v4 = vld [vmem:[%s6356_s1 + $0x1f0] sm:$0xff] }
 0x1ba   : > { %v1068_v8 = vpop.f32.mrf.mxu0 }
 0x1bb   : > { %v1069_v9 = vadd.f32 %v5351_v47, %v1068_v8  ;;  %4255 = vmatprep.mubr.f32.mxu1 %v1201_v5  ;;  %v1204_v12 = vmax.f32 %v1074_v7, 0.0 }
 0x1bc   : > { %v4135_v10 = vpop.f32.mrf.mxu0  ;;  %4256 = vmatmul.mubr.f32.gmra.mxu1 %v1202_v6 }
 0x1bd   : > { %v1203_v11 = vmax.f32 %v1069_v9, 0.0  ;;  %v1084_v13 = vadd.f32 %v4135_v10, %v5351_v47  ;;  %v2169_v9 = vld [vmem:[%s6356_s1 + $0x1e8] sm:$0xff]  ;;  %v2168_v10 = vld [vmem:[%s6356_s1 + $0x1e0] sm:$0xff] }
 0x1be   : > { %v1078_v14 = vpop.f32.mrf.mxu0 }
 0x1bf   : > { %v1079_v16 = vadd.f32 %v5351_v47, %v1078_v14  ;;  %4258 = vmatprep.mubr.f32.mxu1 %v1203_v11  ;;  %v1206_v20 = vmax.f32 %v1084_v13, 0.0 }
 0x1c0   : > { %v4138_v17 = vpop.f32.mrf.mxu0  ;;  %4259 = vmatmul.mubr.f32.gmra.mxu1 %v1204_v12 }
 0x1c1   : > { %v1205_v19 = vmax.f32 %v1079_v16, 0.0  ;;  %v1094_v21 = vadd.f32 %v4138_v17, %v5351_v47  ;;  %v2167_v16 = vld [vmem:[%s6356_s1 + $0x1d8] sm:$0xff] }
 0x1c2   : > { %v1088_v22 = vpop.f32.mrf.mxu0 }
 0x1c3   : > { %v1089_v23 = vadd.f32 %v5351_v47, %v1088_v22  ;;  %4261 = vmatprep.mubr.f32.mxu1 %v1205_v19  ;;  %v1208_v26 = vmax.f32 %v1094_v21, 0.0 }
 0x1c4   : > { %v4141_v24 = vpop.f32.mrf.mxu0  ;;  %4262 = vmatmul.mubr.f32.gmra.mxu1 %v1206_v20  ;;  %v2166_v20 = vld [vmem:[%s6356_s1 + $0x1d0] sm:$0xff] }
 0x1c5   : > { %v1207_v25 = vmax.f32 %v1089_v23, 0.0  ;;  %v1104_v27 = vadd.f32 %v4141_v24, %v5351_v47 }
 0x1c6   : > { %v1098_v28 = vpop.f32.mrf.mxu0 }
 0x1c7   : > { %v1099_v29 = vadd.f32 %v5351_v47, %v1098_v28  ;;  %4264 = vmatprep.mubr.f32.mxu1 %v1207_v25  ;;  %v1210_v32 = vmax.f32 %v1104_v27, 0.0  ;;  %v2165_v25 = vld [vmem:[%s6356_s1 + $0x1c8] sm:$0xff]  ;;  %v2164_v28 = vld [vmem:[%s6356_s1 + $0x1c0] sm:$0xff] }
 0x1c8   : > { %v4144_v30 = vpop.f32.mrf.mxu0  ;;  %4265 = vmatmul.mubr.f32.gmra.mxu1 %v1208_v26 }
 0x1c9   : > { %v1209_v31 = vmax.f32 %v1099_v29, 0.0  ;;  %v1114_v33 = vadd.f32 %v4144_v30, %v5351_v47 }
 0x1ca   : > { %v1108_v34 = vpop.f32.mrf.mxu0 }
 0x1cb   : > { %v1109_v35 = vadd.f32 %v5351_v47, %v1108_v34  ;;  %4267 = vmatprep.mubr.f32.mxu1 %v1209_v31  ;;  %v1212_v38 = vmax.f32 %v1114_v33, 0.0  ;;  %v2163_v33 = vld [vmem:[%s6356_s1 + $0x1b8] sm:$0xff] }
 0x1cc   : > { %v4147_v36 = vpop.f32.mrf.mxu0  ;;  %4268 = vmatmul.mubr.f32.gmra.mxu1 %v1210_v32 }
 0x1cd   : > { %v1211_v37 = vmax.f32 %v1109_v35, 0.0  ;;  %v1124_v39 = vadd.f32 %v4147_v36, %v5351_v47  ;;  %v2162_v36 = vld [vmem:[%s6356_s1 + $0x1b0] sm:$0xff] }
 0x1ce   : > { %v1118_v40 = vpop.f32.mrf.mxu0 }
 0x1cf   : > { %v1119_v41 = vadd.f32 %v5351_v47, %v1118_v40  ;;  %4270 = vmatprep.mubr.f32.mxu1 %v1211_v37  ;;  %v1214_v15 = vmax.f32 %v1124_v39, 0.0 }
 0x1d0   : > { %v4150_v42 = vpop.f32.mrf.mxu0  ;;  %4271 = vmatmul.mubr.f32.gmra.mxu1 %v1212_v38 }
 0x1d1   : > { %v1213_v43 = vmax.f32 %v1119_v41, 0.0  ;;  %v1134_v18 = vadd.f32 %v4150_v42, %v5351_v47  ;;  %v2161_v41 = vld [vmem:[%s6356_s1 + $0x1a8] sm:$0xff] }
 0x1d2   : > { %v1128_v44 = vpop.f32.mrf.mxu0 }
 0x1d3   : > { %v1129_v45 = vadd.f32 %v5351_v47, %v1128_v44  ;;  %4273 = vmatprep.mubr.f32.mxu1 %v1213_v43  ;;  %v1216_v49 = vmax.f32 %v1134_v18, 0.0 }
 0x1d4   : > { %v4153_v46 = vpop.f32.mrf.mxu0  ;;  %4274 = vmatmul.mubr.f32.gmra.mxu1 %v1214_v15 }
 0x1d5   : > { %v1215_v48 = vmax.f32 %v1129_v45, 0.0  ;;  %v1144_v50 = vadd.f32 %v4153_v46, %v5351_v47 }
 0x1d6   : > { %v1138_v51 = vpop.f32.mrf.mxu0 }
 0x1d7   : > { %v1139_v52 = vadd.f32 %v5351_v47, %v1138_v51  ;;  %4276 = vmatprep.mubr.f32.mxu1 %v1215_v48  ;;  %v1218_v55 = vmax.f32 %v1144_v50, 0.0 }
 0x1d8   : > { %v4156_v53 = vpop.f32.mrf.mxu0  ;;  %4277 = vmatmul.mubr.f32.gmra.mxu1 %v1216_v49 }
 0x1d9   : > { %v1217_v54 = vmax.f32 %v1139_v52, 0.0  ;;  %v1154_v56 = vadd.f32 %v4156_v53, %v5351_v47 }
 0x1da   : > { %v1148_v57 = vpop.f32.mrf.mxu0 }
 0x1db   : > { %v1149_v58 = vadd.f32 %v5351_v47, %v1148_v57  ;;  %4279 = vmatprep.mubr.f32.mxu1 %v1217_v54  ;;  %v1220_v60 = vmax.f32 %v1154_v56, 0.0  ;;  %v2174_v47 = vld [vmem:[%s6356_s1 + $0x210] sm:$0xff] }
 0x1dc   : > { %4280 = vmatmul.mubr.f32.gmra.mxu1 %v1218_v55  ;;  %4417 = vmatprep.subr.mxu1 %v2174_v47 }
 0x1dd   : > { %v1219_v59 = vmax.f32 %v1149_v58, 0.0  ;;  %4418 = vmatpush3.msra.mxu1 %v2174_v47 }
 0x1de   : > { %4419 = vmatprep.subr.mxu1 %v2173_v63 }
 0x1df   : > { %4282 = vmatprep.mubr.f32.mxu1 %v1219_v59  ;;  %4420 = vmatpush3.msra.mxu1 %v2173_v63 }
 0x1e0   : > { %4283 = vmatmul.mubr.f32.gmra.mxu1 %v1220_v60  ;;  %4421 = vmatprep.subr.mxu1 %v2172_v0 }
 0x1e1   : > { %4422 = vmatpush3.msra.mxu1 %v2172_v0 }
 0x1e2   : > { %4423 = vmatprep.subr.mxu1 %v2171_v1 }
 0x1e3   : > { %4424 = vmatpush3.msra.mxu1 %v2171_v1 }
 0x1e4   : > { %4425 = vmatprep.subr.mxu1 %v2170_v4 }
 0x1e5   : > { %4426 = vmatpush3.msra.mxu1 %v2170_v4 }
 0x1e6   : > { %4427 = vmatprep.subr.mxu1 %v2169_v9 }
 0x1e7   : > { %4428 = vmatpush3.msra.mxu1 %v2169_v9 }
 0x1e8   : > { %4429 = vmatprep.subr.mxu1 %v2168_v10 }
 0x1e9   : > { %4430 = vmatpush3.msra.mxu1 %v2168_v10 }
 0x1ea   : > { %4431 = vmatprep.subr.mxu1 %v2167_v16 }
 0x1eb   : > { %4432 = vmatpush3.msra.mxu1 %v2167_v16 }
 0x1ec   : > { %4433 = vmatprep.subr.mxu1 %v2166_v20 }
 0x1ed   : > { %4434 = vmatpush3.msra.mxu1 %v2166_v20 }
 0x1ee   : > { %4435 = vmatprep.subr.mxu1 %v2165_v25 }
 0x1ef   : > { %4436 = vmatpush3.msra.mxu1 %v2165_v25 }
 0x1f0   : > { %4437 = vmatprep.subr.mxu1 %v2164_v28 }
 0x1f1   : > { %4438 = vmatpush3.msra.mxu1 %v2164_v28 }
 0x1f2   : > { %4439 = vmatprep.subr.mxu1 %v2163_v33 }
 0x1f3   : > { %4440 = vmatpush3.msra.mxu1 %v2163_v33 }
 0x1f4   : > { %4441 = vmatprep.subr.mxu1 %v2162_v36 }
 0x1f5   : > { %4442 = vmatpush3.msra.mxu1 %v2162_v36 }
 0x1f6   : > { %4443 = vmatprep.subr.mxu1 %v2161_v41 }
 0x1f7   : > { %4444 = vmatpush3.msra.mxu1 %v2161_v41 }
 0x224   : > { %v4191_v3 = vpop.f32.mrf.mxu1 }
 0x225   : > { %v1314_v5 = vadd.f32 %v4191_v3, %v5468_v2 }
 0x226   : > { %v1308_v6 = vpop.f32.mrf.mxu1 }
 0x227   : > { %v1309_v7 = vadd.f32 %v5468_v2, %v1308_v6  ;;  %v1628_v12 = vmax.f32 %v1314_v5, 0.0 }
 0x228   : > { %v4194_v8 = vpop.f32.mrf.mxu1 }
 0x229   : > { %v1627_v11 = vmax.f32 %v1309_v7, 0.0  ;;  %v1324_v13 = vadd.f32 %v4194_v8, %v5468_v2 }
 0x22a   : > { %v1318_v14 = vpop.f32.mrf.mxu1 }
 0x22b   : > { %v1319_v17 = vadd.f32 %v5468_v2, %v1318_v14  ;;  %4317 = vmatprep.mubr.f32.mxu0 %v1627_v11  ;;  %v1630_v22 = vmax.f32 %v1324_v13, 0.0 }
 0x22c   : > { %v4197_v19 = vpop.f32.mrf.mxu1  ;;  %4318 = vmatmul.mubr.f32.vlgmr.msra.gmra.mxu0 %v1628_v12 }
 0x22d   : > { %v1629_v21 = vmax.f32 %v1319_v17, 0.0  ;;  %v1334_v23 = vadd.f32 %v4197_v19, %v5468_v2 }
 0x22e   : > { %v1328_v24 = vpop.f32.mrf.mxu1 }
 0x22f   : > { %v1329_v26 = vadd.f32 %v5468_v2, %v1328_v24  ;;  %4320 = vmatprep.mubr.f32.mxu0 %v1629_v21  ;;  %v1632_v30 = vmax.f32 %v1334_v23, 0.0 }
 0x230   : > { %v4200_v27 = vpop.f32.mrf.mxu1  ;;  %4321 = vmatmul.mubr.f32.gmra.mxu0 %v1630_v22 }
 0x231   : > { %v1631_v29 = vmax.f32 %v1329_v26, 0.0  ;;  %v1344_v31 = vadd.f32 %v4200_v27, %v5468_v2 }
 0x232   : > { %v1338_v32 = vpop.f32.mrf.mxu1 }
 0x233   : > { %v1339_v34 = vadd.f32 %v5468_v2, %v1338_v32  ;;  %4323 = vmatprep.mubr.f32.mxu0 %v1631_v29  ;;  %v1634_v38 = vmax.f32 %v1344_v31, 0.0 }
 0x234   : > { %v4203_v35 = vpop.f32.mrf.mxu1  ;;  %4324 = vmatmul.mubr.f32.gmra.mxu0 %v1632_v30 }
 0x235   : > { %v1633_v37 = vmax.f32 %v1339_v34, 0.0  ;;  %v1354_v39 = vadd.f32 %v4203_v35, %v5468_v2 }
 0x236   : > { %v1348_v40 = vpop.f32.mrf.mxu1 }
 0x237   : > { %v1349_v42 = vadd.f32 %v5468_v2, %v1348_v40  ;;  %4326 = vmatprep.mubr.f32.mxu0 %v1633_v37  ;;  %v1636_v18 = vmax.f32 %v1354_v39, 0.0 }
 0x238   : > { %v4206_v43 = vpop.f32.mrf.mxu1  ;;  %4327 = vmatmul.mubr.f32.gmra.mxu0 %v1634_v38 }
 0x239   : > { %v1635_v15 = vmax.f32 %v1349_v42, 0.0  ;;  %v1364_v44 = vadd.f32 %v4206_v43, %v5468_v2 }
 0x23a   : > { %v1358_v45 = vpop.f32.mrf.mxu1 }
 0x23b   : > { %v1359_v46 = vadd.f32 %v5468_v2, %v1358_v45  ;;  %4329 = vmatprep.mubr.f32.mxu0 %v1635_v15  ;;  %v1638_v50 = vmax.f32 %v1364_v44, 0.0 }
 0x23c   : > { %v4209_v48 = vpop.f32.mrf.mxu1  ;;  %4330 = vmatmul.mubr.f32.gmra.mxu0 %v1636_v18 }
 0x23d   : > { %v1637_v49 = vmax.f32 %v1359_v46, 0.0  ;;  %v1374_v51 = vadd.f32 %v4209_v48, %v5468_v2 }
 0x23e   : > { %v1368_v52 = vpop.f32.mrf.mxu1 }
 0x23f   : > { %v1369_v53 = vadd.f32 %v5468_v2, %v1368_v52  ;;  %4332 = vmatprep.mubr.f32.mxu0 %v1637_v49  ;;  %v1640_v56 = vmax.f32 %v1374_v51, 0.0 }
 0x240   : > { %v4212_v54 = vpop.f32.mrf.mxu1  ;;  %4333 = vmatmul.mubr.f32.gmra.mxu0 %v1638_v50 }
 0x241   : > { %v1639_v55 = vmax.f32 %v1369_v53, 0.0  ;;  %v1384_v57 = vadd.f32 %v4212_v54, %v5468_v2 }
 0x242   : > { %v1378_v58 = vpop.f32.mrf.mxu1 }
 0x243   : > { %v1379_v59 = vadd.f32 %v5468_v2, %v1378_v58  ;;  %4335 = vmatprep.mubr.f32.mxu0 %v1639_v55  ;;  %v1642_v62 = vmax.f32 %v1384_v57, 0.0 }
 0x244   : > { %v4215_v60 = vpop.f32.mrf.mxu1  ;;  %4336 = vmatmul.mubr.f32.gmra.mxu0 %v1640_v56 }
 0x245   : > { %v1641_v61 = vmax.f32 %v1379_v59, 0.0  ;;  %v1394_v47 = vadd.f32 %v4215_v60, %v5468_v2 }
 0x246   : > { %v1388_v63 = vpop.f32.mrf.mxu1 }
 0x247   : > { %v1389_v0 = vadd.f32 %v5468_v2, %v1388_v63  ;;  %4338 = vmatprep.mubr.f32.mxu0 %v1641_v61  ;;  %v1644_v4 = vmax.f32 %v1394_v47, 0.0 }
 0x248   : > { %v4218_v1 = vpop.f32.mrf.mxu1  ;;  %4339 = vmatmul.mubr.f32.gmra.mxu0 %v1642_v62 }
 0x249   : > { %v1643_v3 = vmax.f32 %v1389_v0, 0.0  ;;  %v1404_v5 = vadd.f32 %v4218_v1, %v5468_v2 }
 0x24a   : > { %v1398_v6 = vpop.f32.mrf.mxu1 }
 0x24b   : > { %v1399_v7 = vadd.f32 %v5468_v2, %v1398_v6  ;;  %4341 = vmatprep.mubr.f32.mxu0 %v1643_v3  ;;  %v1646_v10 = vmax.f32 %v1404_v5, 0.0 }
 0x24c   : > { %v4221_v8 = vpop.f32.mrf.mxu1  ;;  %4342 = vmatmul.mubr.f32.gmra.mxu0 %v1644_v4 }
 0x24d   : > { %v1645_v9 = vmax.f32 %v1399_v7, 0.0  ;;  %v1414_v11 = vadd.f32 %v4221_v8, %v5468_v2 }
 0x24e   : > { %v1408_v12 = vpop.f32.mrf.mxu1 }
 0x24f   : > { %v1409_v13 = vadd.f32 %v5468_v2, %v1408_v12  ;;  %4344 = vmatprep.mubr.f32.mxu0 %v1645_v9  ;;  %v1648_v17 = vmax.f32 %v1414_v11, 0.0 }
 0x250   : > { %v4224_v14 = vpop.f32.mrf.mxu1  ;;  %4345 = vmatmul.mubr.f32.gmra.mxu0 %v1646_v10 }
 0x251   : > { %v1647_v16 = vmax.f32 %v1409_v13, 0.0  ;;  %v1424_v19 = vadd.f32 %v4224_v14, %v5468_v2 }
 0x252   : > { %v1418_v20 = vpop.f32.mrf.mxu1 }
 0x253   : > { %v1419_v21 = vadd.f32 %v5468_v2, %v1418_v20  ;;  %4347 = vmatprep.mubr.f32.mxu0 %v1647_v16  ;;  %v1650_v24 = vmax.f32 %v1424_v19, 0.0 }
 0x254   : > { %v4227_v22 = vpop.f32.mrf.mxu1  ;;  %4348 = vmatmul.mubr.f32.gmra.mxu0 %v1648_v17 }
 0x255   : > { %v1649_v23 = vmax.f32 %v1419_v21, 0.0  ;;  %v1434_v25 = vadd.f32 %v4227_v22, %v5468_v2 }
 0x256   : > { %v1428_v26 = vpop.f32.mrf.mxu1 }
 0x257   : > { %v1429_v27 = vadd.f32 %v5468_v2, %v1428_v26  ;;  %4350 = vmatprep.mubr.f32.mxu0 %v1649_v23  ;;  %v1652_v30 = vmax.f32 %v1434_v25, 0.0 }
 0x258   : > { %v4230_v28 = vpop.f32.mrf.mxu1  ;;  %4351 = vmatmul.mubr.f32.gmra.mxu0 %v1650_v24 }
 0x259   : > { %v1651_v29 = vmax.f32 %v1429_v27, 0.0  ;;  %v1444_v31 = vadd.f32 %v4230_v28, %v5468_v2 }
 0x25a   : > { %v1438_v32 = vpop.f32.mrf.mxu1 }
 0x25b   : > { %v1439_v33 = vadd.f32 %v5468_v2, %v1438_v32  ;;  %4353 = vmatprep.mubr.f32.mxu0 %v1651_v29  ;;  %v1654_v36 = vmax.f32 %v1444_v31, 0.0 }
 0x25c   : > { %v4233_v34 = vpop.f32.mrf.mxu1  ;;  %4354 = vmatmul.mubr.f32.gmra.mxu0 %v1652_v30 }
 0x25d   : > { %v1653_v35 = vmax.f32 %v1439_v33, 0.0  ;;  %v1454_v37 = vadd.f32 %v4233_v34, %v5468_v2 }
 0x25e   : > { %v1448_v38 = vpop.f32.mrf.mxu1 }
 0x25f   : > { %v1449_v39 = vadd.f32 %v5468_v2, %v1448_v38  ;;  %4356 = vmatprep.mubr.f32.mxu0 %v1653_v35  ;;  %v1656_v42 = vmax.f32 %v1454_v37, 0.0 }
 0x260   : > { %v4236_v40 = vpop.f32.mrf.mxu1  ;;  %4357 = vmatmul.mubr.f32.gmra.mxu0 %v1654_v36 }
 0x261   : > { %v1655_v41 = vmax.f32 %v1449_v39, 0.0  ;;  %v1464_v43 = vadd.f32 %v4236_v40, %v5468_v2 }
 0x262   : > { %v1458_v15 = vpop.f32.mrf.mxu1 }
 0x263   : > { %v1459_v18 = vadd.f32 %v5468_v2, %v1458_v15  ;;  %4359 = vmatprep.mubr.f32.mxu0 %v1655_v41  ;;  %v1658_v46 = vmax.f32 %v1464_v43, 0.0 }
 0x264   : > { %v4239_v44 = vpop.f32.mrf.mxu1  ;;  %4360 = vmatmul.mubr.f32.gmra.mxu0 %v1656_v42 }
 0x265   : > { %v1657_v45 = vmax.f32 %v1459_v18, 0.0  ;;  %v1474_v48 = vadd.f32 %v4239_v44, %v5468_v2 }
 0x266   : > { %v1468_v49 = vpop.f32.mrf.mxu1 }
 0x267   : > { %v1469_v50 = vadd.f32 %v5468_v2, %v1468_v49  ;;  %4362 = vmatprep.mubr.f32.mxu0 %v1657_v45  ;;  %v1660_v53 = vmax.f32 %v1474_v48, 0.0 }
 0x268   : > { %v4242_v51 = vpop.f32.mrf.mxu1  ;;  %4363 = vmatmul.mubr.f32.gmra.mxu0 %v1658_v46 }
 0x269   : > { %v1659_v52 = vmax.f32 %v1469_v50, 0.0  ;;  %v1484_v54 = vadd.f32 %v4242_v51, %v5468_v2 }
 0x26a   : > { %v1478_v55 = vpop.f32.mrf.mxu1 }
 0x26b   : > { %v1479_v56 = vadd.f32 %v5468_v2, %v1478_v55  ;;  %4365 = vmatprep.mubr.f32.mxu0 %v1659_v52  ;;  %v1662_v59 = vmax.f32 %v1484_v54, 0.0 }
 0x26c   : > { %v4245_v57 = vpop.f32.mrf.mxu1  ;;  %4366 = vmatmul.mubr.f32.gmra.mxu0 %v1660_v53 }
 0x26d   : > { %v1661_v58 = vmax.f32 %v1479_v56, 0.0  ;;  %v1494_v60 = vadd.f32 %v4245_v57, %v5468_v2 }
 0x26e   : > { %v1488_v61 = vpop.f32.mrf.mxu1 }
 0x26f   : > { %v1489_v62 = vadd.f32 %v5468_v2, %v1488_v61  ;;  %4368 = vmatprep.mubr.f32.mxu0 %v1661_v58  ;;  %v1664_v0 = vmax.f32 %v1494_v60, 0.0 }
 0x270   : > { %v4248_v47 = vpop.f32.mrf.mxu1  ;;  %4369 = vmatmul.mubr.f32.gmra.mxu0 %v1662_v59 }
 0x271   : > { %v1663_v63 = vmax.f32 %v1489_v62, 0.0  ;;  %v1504_v1 = vadd.f32 %v4248_v47, %v5468_v2 }
 0x272   : > { %v1498_v3 = vpop.f32.mrf.mxu1 }
 0x273   : > { %v1499_v4 = vadd.f32 %v5468_v2, %v1498_v3  ;;  %4371 = vmatprep.mubr.f32.mxu0 %v1663_v63  ;;  %v1666_v7 = vmax.f32 %v1504_v1, 0.0 }
 0x274   : > { %v4251_v5 = vpop.f32.mrf.mxu1  ;;  %4372 = vmatmul.mubr.f32.gmra.mxu0 %v1664_v0 }
 0x275   : > { %v1665_v6 = vmax.f32 %v1499_v4, 0.0  ;;  %v1514_v8 = vadd.f32 %v4251_v5, %v5468_v2 }
 0x276   : > { %v1508_v9 = vpop.f32.mrf.mxu1 }
 0x277   : > { %v1509_v10 = vadd.f32 %v5468_v2, %v1508_v9  ;;  %4374 = vmatprep.mubr.f32.mxu0 %v1665_v6  ;;  %v1668_v13 = vmax.f32 %v1514_v8, 0.0 }
 0x278   : > { %v4254_v11 = vpop.f32.mrf.mxu1  ;;  %4375 = vmatmul.mubr.f32.gmra.mxu0 %v1666_v7 }
 0x279   : > { %v1667_v12 = vmax.f32 %v1509_v10, 0.0  ;;  %v1524_v14 = vadd.f32 %v4254_v11, %v5468_v2 }
 0x27a   : > { %v1518_v16 = vpop.f32.mrf.mxu1 }
 0x27b   : > { %v1519_v17 = vadd.f32 %v5468_v2, %v1518_v16  ;;  %4377 = vmatprep.mubr.f32.mxu0 %v1667_v12  ;;  %v1670_v21 = vmax.f32 %v1524_v14, 0.0 }
 0x27c   : > { %v4257_v19 = vpop.f32.mrf.mxu1  ;;  %4378 = vmatmul.mubr.f32.gmra.mxu0 %v1668_v13 }
 0x27d   : > { %v1669_v20 = vmax.f32 %v1519_v17, 0.0  ;;  %v1534_v22 = vadd.f32 %v4257_v19, %v5468_v2  ;;  %v5567_v17 = vld [vmem:[%s6356_s1 + $0x1a0] ss:$0 sm:$0xff] }
 0x27e   : > { %v1528_v23 = vpop.f32.mrf.mxu1 }
 0x27f   : > { %v1529_v24 = vadd.f32 %v5468_v2, %v1528_v23  ;;  %4380 = vmatprep.mubr.f32.mxu0 %v1669_v20  ;;  %v1672_v27 = vmax.f32 %v1534_v22, 0.0 }
 0x280   : > { %v4260_v25 = vpop.f32.mrf.mxu1  ;;  %4381 = vmatmul.mubr.f32.gmra.mxu0 %v1670_v21 }
 0x281   : > { %v1671_v26 = vmax.f32 %v1529_v24, 0.0  ;;  %v1544_v28 = vadd.f32 %v4260_v25, %v5468_v2 }
 0x282   : > { %v1538_v29 = vpop.f32.mrf.mxu1 }
 0x283   : > { %v1539_v30 = vadd.f32 %v5468_v2, %v1538_v29  ;;  %4383 = vmatprep.mubr.f32.mxu0 %v1671_v26  ;;  %v1674_v33 = vmax.f32 %v1544_v28, 0.0 }
 0x284   : > { %v4263_v31 = vpop.f32.mrf.mxu1  ;;  %4384 = vmatmul.mubr.f32.gmra.mxu0 %v1672_v27 }
 0x285   : > { %v1673_v32 = vmax.f32 %v1539_v30, 0.0  ;;  %v1554_v34 = vadd.f32 %v4263_v31, %v5468_v2 }
 0x286   : > { %v1548_v35 = vpop.f32.mrf.mxu1 }
 0x287   : > { %v1549_v36 = vadd.f32 %v5468_v2, %v1548_v35  ;;  %4386 = vmatprep.mubr.f32.mxu0 %v1673_v32  ;;  %v1676_v39 = vmax.f32 %v1554_v34, 0.0 }
 0x288   : > { %v4266_v37 = vpop.f32.mrf.mxu1  ;;  %4387 = vmatmul.mubr.f32.gmra.mxu0 %v1674_v33 }
 0x289   : > { %v1675_v38 = vmax.f32 %v1549_v36, 0.0  ;;  %v1564_v40 = vadd.f32 %v4266_v37, %v5468_v2 }
 0x28a   : > { %v1558_v41 = vpop.f32.mrf.mxu1 }
 0x28b   : > { %v1559_v42 = vadd.f32 %v5468_v2, %v1558_v41  ;;  %4389 = vmatprep.mubr.f32.mxu0 %v1675_v38  ;;  %v1678_v18 = vmax.f32 %v1564_v40, 0.0 }
 0x28c   : > { %v4269_v43 = vpop.f32.mrf.mxu1  ;;  %4390 = vmatmul.mubr.f32.gmra.mxu0 %v1676_v39 }
 0x28d   : > { %v1677_v15 = vmax.f32 %v1559_v42, 0.0  ;;  %v1574_v44 = vadd.f32 %v4269_v43, %v5468_v2 }
 0x28e   : > { %v1568_v45 = vpop.f32.mrf.mxu1 }
 0x28f   : > { %v1569_v46 = vadd.f32 %v5468_v2, %v1568_v45  ;;  %4392 = vmatprep.mubr.f32.mxu0 %v1677_v15  ;;  %v1680_v50 = vmax.f32 %v1574_v44, 0.0 }
 0x290   : > { %v4272_v48 = vpop.f32.mrf.mxu1  ;;  %4393 = vmatmul.mubr.f32.gmra.mxu0 %v1678_v18 }
 0x291   : > { %v1679_v49 = vmax.f32 %v1569_v46, 0.0  ;;  %v1584_v51 = vadd.f32 %v4272_v48, %v5468_v2 }
 0x292   : > { %v1578_v52 = vpop.f32.mrf.mxu1 }
 0x293   : > { %v1579_v53 = vadd.f32 %v5468_v2, %v1578_v52  ;;  %4395 = vmatprep.mubr.f32.mxu0 %v1679_v49  ;;  %v1682_v56 = vmax.f32 %v1584_v51, 0.0 }
 0x294   : > { %v4275_v54 = vpop.f32.mrf.mxu1  ;;  %4396 = vmatmul.mubr.f32.gmra.mxu0 %v1680_v50 }
 0x295   : > { %v1681_v55 = vmax.f32 %v1579_v53, 0.0  ;;  %v1594_v57 = vadd.f32 %v4275_v54, %v5468_v2 }
 0x296   : > { %v1588_v58 = vpop.f32.mrf.mxu1 }
 0x297   : > { %v1589_v59 = vadd.f32 %v5468_v2, %v1588_v58  ;;  %4398 = vmatprep.mubr.f32.mxu0 %v1681_v55  ;;  %v1684_v62 = vmax.f32 %v1594_v57, 0.0 }
 0x298   : > { %v4278_v60 = vpop.f32.mrf.mxu1  ;;  %4399 = vmatmul.mubr.f32.gmra.mxu0 %v1682_v56 }
 0x299   : > { %v1683_v61 = vmax.f32 %v1589_v59, 0.0  ;;  %v1604_v47 = vadd.f32 %v4278_v60, %v5468_v2 }
 0x29a   : > { %v1598_v63 = vpop.f32.mrf.mxu1 }
 0x29b   : > { %v1599_v0 = vadd.f32 %v5468_v2, %v1598_v63  ;;  %4401 = vmatprep.mubr.f32.mxu0 %v1683_v61  ;;  %v1686_v4 = vmax.f32 %v1604_v47, 0.0 }
 0x29c   : > { %v4281_v1 = vpop.f32.mrf.mxu1  ;;  %4402 = vmatmul.mubr.f32.gmra.mxu0 %v1684_v62 }
 0x29d   : > { %v1685_v3 = vmax.f32 %v1599_v0, 0.0  ;;  %v1614_v5 = vadd.f32 %v4281_v1, %v5468_v2 }
 0x29e   : > { %v1608_v6 = vpop.f32.mrf.mxu1 }
 0x29f   : > { %v1609_v7 = vadd.f32 %v5468_v2, %v1608_v6  ;;  %4404 = vmatprep.mubr.f32.mxu0 %v1685_v3  ;;  %v1688_v10 = vmax.f32 %v1614_v5, 0.0 }
 0x2a0   : > { %v4284_v8 = vpop.f32.mrf.mxu1  ;;  %4405 = vmatmul.mubr.f32.gmra.mxu0 %v1686_v4 }
 0x2a1   : > { %v1687_v9 = vmax.f32 %v1609_v7, 0.0  ;;  %v1624_v11 = vadd.f32 %v4284_v8, %v5468_v2 }
 0x2a2   : > { %v1618_v12 = vpop.f32.mrf.mxu1 }
 0x2a3   : > { %v1619_v13 = vadd.f32 %v5468_v2, %v1618_v12  ;;  %4407 = vmatprep.mubr.f32.mxu0 %v1687_v9  ;;  %v1690_v16 = vmax.f32 %v1624_v11, 0.0 }
 0x2a4   : > { %4408 = vmatmul.mubr.f32.gmra.mxu0 %v1688_v10 }
 0x2a5   : > { %v1689_v14 = vmax.f32 %v1619_v13, 0.0 }
 0x2a7   : > { %4410 = vmatprep.mubr.f32.mxu0 %v1689_v14 }
 0x2a8   : > { %4411 = vmatmul.mubr.f32.gmra.mxu0 %v1690_v16 }
 0x2ec   : > { %v4319_v19 = vpop.f32.mrf.mxu0 }
 0x2ed   : > { %v1784_v20 = vadd.f32 %v4319_v19, %v5567_v17 }
 0x2ee   : > { %v1778_v21 = vpop.f32.mrf.mxu0 }
 0x2ef   : > { %v1779_v22 = vadd.f32 %v5567_v17, %v1778_v21  ;;  %v2098_v2 = vmax.f32 %v1784_v20, 0.0 }
 0x2f0   : > { %v4322_v23 = vpop.f32.mrf.mxu0 }
 0x2f1   : > { %v2097_v24 = vmax.f32 %v1779_v22, 0.0  ;;  %v1794_v25 = vadd.f32 %v4322_v23, %v5567_v17 }
 0x2f2   : > { %v1788_v26 = vpop.f32.mrf.mxu0 }
 0x2f3   : > { %v1789_v27 = vadd.f32 %v5567_v17, %v1788_v26  ;;  %4445 = vmatprep.mubr.f32.mxu1 %v2097_v24  ;;  %v2100_v30 = vmax.f32 %v1794_v25, 0.0 }
 0x2f4   : > { %v4325_v28 = vpop.f32.mrf.mxu0  ;;  %4446 = vmatmul.mubr.f32.vlgmr.msra.gmra.mxu1 %v2098_v2 }
 0x2f5   : > { %v2099_v29 = vmax.f32 %v1789_v27, 0.0  ;;  %v1804_v31 = vadd.f32 %v4325_v28, %v5567_v17 }
 0x2f6   : > { %v1798_v32 = vpop.f32.mrf.mxu0 }
 0x2f7   : > { %v1799_v33 = vadd.f32 %v5567_v17, %v1798_v32  ;;  %4448 = vmatprep.mubr.f32.mxu1 %v2099_v29  ;;  %v2102_v36 = vmax.f32 %v1804_v31, 0.0 }
 0x2f8   : > { %v4328_v34 = vpop.f32.mrf.mxu0  ;;  %4449 = vmatmul.mubr.f32.gmra.mxu1 %v2100_v30 }
 0x2f9   : > { %v2101_v35 = vmax.f32 %v1799_v33, 0.0  ;;  %v1814_v37 = vadd.f32 %v4328_v34, %v5567_v17 }
 0x2fa   : > { %v1808_v38 = vpop.f32.mrf.mxu0 }
 0x2fb   : > { %v1809_v39 = vadd.f32 %v5567_v17, %v1808_v38  ;;  %4451 = vmatprep.mubr.f32.mxu1 %v2101_v35  ;;  %v2104_v42 = vmax.f32 %v1814_v37, 0.0 }
 0x2fc   : > { %v4331_v40 = vpop.f32.mrf.mxu0  ;;  %4452 = vmatmul.mubr.f32.gmra.mxu1 %v2102_v36 }
 0x2fd   : > { %v2103_v41 = vmax.f32 %v1809_v39, 0.0  ;;  %v1824_v43 = vadd.f32 %v4331_v40, %v5567_v17 }
 0x2fe   : > { %v1818_v15 = vpop.f32.mrf.mxu0 }
 0x2ff   : > { %v1819_v18 = vadd.f32 %v5567_v17, %v1818_v15  ;;  %4454 = vmatprep.mubr.f32.mxu1 %v2103_v41  ;;  %v2106_v46 = vmax.f32 %v1824_v43, 0.0 }
 0x300   : > { %v4334_v44 = vpop.f32.mrf.mxu0  ;;  %4455 = vmatmul.mubr.f32.gmra.mxu1 %v2104_v42 }
 0x301   : > { %v2105_v45 = vmax.f32 %v1819_v18, 0.0  ;;  %v1834_v48 = vadd.f32 %v4334_v44, %v5567_v17 }
 0x302   : > { %v1828_v49 = vpop.f32.mrf.mxu0 }
 0x303   : > { %v1829_v50 = vadd.f32 %v5567_v17, %v1828_v49  ;;  %4457 = vmatprep.mubr.f32.mxu1 %v2105_v45  ;;  %v2108_v53 = vmax.f32 %v1834_v48, 0.0 }
 0x304   : > { %v4337_v51 = vpop.f32.mrf.mxu0  ;;  %4458 = vmatmul.mubr.f32.gmra.mxu1 %v2106_v46 }
 0x305   : > { %v2107_v52 = vmax.f32 %v1829_v50, 0.0  ;;  %v1844_v54 = vadd.f32 %v4337_v51, %v5567_v17 }
 0x306   : > { %v1838_v55 = vpop.f32.mrf.mxu0 }
 0x307   : > { %v1839_v56 = vadd.f32 %v5567_v17, %v1838_v55  ;;  %4460 = vmatprep.mubr.f32.mxu1 %v2107_v52  ;;  %v2110_v59 = vmax.f32 %v1844_v54, 0.0 }
 0x308   : > { %v4340_v57 = vpop.f32.mrf.mxu0  ;;  %4461 = vmatmul.mubr.f32.gmra.mxu1 %v2108_v53 }
 0x309   : > { %v2109_v58 = vmax.f32 %v1839_v56, 0.0  ;;  %v1854_v60 = vadd.f32 %v4340_v57, %v5567_v17 }
 0x30a   : > { %v1848_v61 = vpop.f32.mrf.mxu0 }
 0x30b   : > { %v1849_v62 = vadd.f32 %v5567_v17, %v1848_v61  ;;  %4463 = vmatprep.mubr.f32.mxu1 %v2109_v58  ;;  %v2112_v0 = vmax.f32 %v1854_v60, 0.0 }
 0x30c   : > { %v4343_v47 = vpop.f32.mrf.mxu0  ;;  %4464 = vmatmul.mubr.f32.gmra.mxu1 %v2110_v59 }
 0x30d   : > { %v2111_v63 = vmax.f32 %v1849_v62, 0.0  ;;  %v1864_v1 = vadd.f32 %v4343_v47, %v5567_v17 }
 0x30e   : > { %v1858_v3 = vpop.f32.mrf.mxu0 }
 0x30f   : > { %v1859_v4 = vadd.f32 %v5567_v17, %v1858_v3  ;;  %4466 = vmatprep.mubr.f32.mxu1 %v2111_v63  ;;  %v2114_v7 = vmax.f32 %v1864_v1, 0.0 }
 0x310   : > { %v4346_v5 = vpop.f32.mrf.mxu0  ;;  %4467 = vmatmul.mubr.f32.gmra.mxu1 %v2112_v0 }
 0x311   : > { %v2113_v6 = vmax.f32 %v1859_v4, 0.0  ;;  %v1874_v8 = vadd.f32 %v4346_v5, %v5567_v17 }
 0x312   : > { %v1868_v9 = vpop.f32.mrf.mxu0 }
 0x313   : > { %v1869_v10 = vadd.f32 %v5567_v17, %v1868_v9  ;;  %4469 = vmatprep.mubr.f32.mxu1 %v2113_v6  ;;  %v2116_v13 = vmax.f32 %v1874_v8, 0.0 }
 0x314   : > { %v4349_v11 = vpop.f32.mrf.mxu0  ;;  %4470 = vmatmul.mubr.f32.gmra.mxu1 %v2114_v7 }
 0x315   : > { %v2115_v12 = vmax.f32 %v1869_v10, 0.0  ;;  %v1884_v14 = vadd.f32 %v4349_v11, %v5567_v17 }
 0x316   : > { %v1878_v16 = vpop.f32.mrf.mxu0 }
 0x317   : > { %v1879_v19 = vadd.f32 %v5567_v17, %v1878_v16  ;;  %4472 = vmatprep.mubr.f32.mxu1 %v2115_v12  ;;  %v2118_v22 = vmax.f32 %v1884_v14, 0.0 }
 0x318   : > { %v4352_v20 = vpop.f32.mrf.mxu0  ;;  %4473 = vmatmul.mubr.f32.gmra.mxu1 %v2116_v13 }
 0x319   : > { %v2117_v21 = vmax.f32 %v1879_v19, 0.0  ;;  %v1894_v23 = vadd.f32 %v4352_v20, %v5567_v17 }
 0x31a   : > { %v1888_v24 = vpop.f32.mrf.mxu0 }
 0x31b   : > { %v1889_v2 = vadd.f32 %v5567_v17, %v1888_v24  ;;  %4475 = vmatprep.mubr.f32.mxu1 %v2117_v21  ;;  %v2120_v27 = vmax.f32 %v1894_v23, 0.0 }
 0x31c   : > { %v4355_v25 = vpop.f32.mrf.mxu0  ;;  %4476 = vmatmul.mubr.f32.gmra.mxu1 %v2118_v22 }
 0x31d   : > { %v2119_v26 = vmax.f32 %v1889_v2, 0.0  ;;  %v1904_v28 = vadd.f32 %v4355_v25, %v5567_v17 }
 0x31e   : > { %v1898_v29 = vpop.f32.mrf.mxu0 }
 0x31f   : > { %v1899_v30 = vadd.f32 %v5567_v17, %v1898_v29  ;;  %4478 = vmatprep.mubr.f32.mxu1 %v2119_v26  ;;  %v2122_v33 = vmax.f32 %v1904_v28, 0.0 }
 0x320   : > { %v4358_v31 = vpop.f32.mrf.mxu0  ;;  %4479 = vmatmul.mubr.f32.gmra.mxu1 %v2120_v27 }
 0x321   : > { %v2121_v32 = vmax.f32 %v1899_v30, 0.0  ;;  %v1914_v34 = vadd.f32 %v4358_v31, %v5567_v17 }
 0x322   : > { %v1908_v35 = vpop.f32.mrf.mxu0 }
 0x323   : > { %v1909_v36 = vadd.f32 %v5567_v17, %v1908_v35  ;;  %4481 = vmatprep.mubr.f32.mxu1 %v2121_v32  ;;  %v2124_v39 = vmax.f32 %v1914_v34, 0.0 }
 0x324   : > { %v4361_v37 = vpop.f32.mrf.mxu0  ;;  %4482 = vmatmul.mubr.f32.gmra.mxu1 %v2122_v33 }
 0x325   : > { %v2123_v38 = vmax.f32 %v1909_v36, 0.0  ;;  %v1924_v40 = vadd.f32 %v4361_v37, %v5567_v17 }
 0x326   : > { %v1918_v41 = vpop.f32.mrf.mxu0 }
 0x327   : > { %v1919_v42 = vadd.f32 %v5567_v17, %v1918_v41  ;;  %4484 = vmatprep.mubr.f32.mxu1 %v2123_v38  ;;  %v2126_v18 = vmax.f32 %v1924_v40, 0.0 }
 0x328   : > { %v4364_v43 = vpop.f32.mrf.mxu0  ;;  %4485 = vmatmul.mubr.f32.gmra.mxu1 %v2124_v39 }
 0x329   : > { %v2125_v15 = vmax.f32 %v1919_v42, 0.0  ;;  %v1934_v44 = vadd.f32 %v4364_v43, %v5567_v17 }
 0x32a   : > { %v1928_v45 = vpop.f32.mrf.mxu0 }
 0x32b   : > { %v1929_v46 = vadd.f32 %v5567_v17, %v1928_v45  ;;  %4487 = vmatprep.mubr.f32.mxu1 %v2125_v15  ;;  %v2128_v50 = vmax.f32 %v1934_v44, 0.0 }
 0x32c   : > { %v4367_v48 = vpop.f32.mrf.mxu0  ;;  %4488 = vmatmul.mubr.f32.gmra.mxu1 %v2126_v18 }
 0x32d   : > { %v2127_v49 = vmax.f32 %v1929_v46, 0.0  ;;  %v1944_v51 = vadd.f32 %v4367_v48, %v5567_v17 }
 0x32e   : > { %v1938_v52 = vpop.f32.mrf.mxu0 }
 0x32f   : > { %v1939_v53 = vadd.f32 %v5567_v17, %v1938_v52  ;;  %4490 = vmatprep.mubr.f32.mxu1 %v2127_v49  ;;  %v2130_v56 = vmax.f32 %v1944_v51, 0.0 }
 0x330   : > { %v4370_v54 = vpop.f32.mrf.mxu0  ;;  %4491 = vmatmul.mubr.f32.gmra.mxu1 %v2128_v50 }
 0x331   : > { %v2129_v55 = vmax.f32 %v1939_v53, 0.0  ;;  %v1954_v57 = vadd.f32 %v4370_v54, %v5567_v17 }
 0x332   : > { %v1948_v58 = vpop.f32.mrf.mxu0 }
 0x333   : > { %v1949_v59 = vadd.f32 %v5567_v17, %v1948_v58  ;;  %4493 = vmatprep.mubr.f32.mxu1 %v2129_v55  ;;  %v2132_v62 = vmax.f32 %v1954_v57, 0.0 }
 0x334   : > { %v4373_v60 = vpop.f32.mrf.mxu0  ;;  %4494 = vmatmul.mubr.f32.gmra.mxu1 %v2130_v56 }
 0x335   : > { %v2131_v61 = vmax.f32 %v1949_v59, 0.0  ;;  %v1964_v47 = vadd.f32 %v4373_v60, %v5567_v17 }
 0x336   : > { %v1958_v63 = vpop.f32.mrf.mxu0 }
 0x337   : > { %v1959_v0 = vadd.f32 %v5567_v17, %v1958_v63  ;;  %4496 = vmatprep.mubr.f32.mxu1 %v2131_v61  ;;  %v2134_v4 = vmax.f32 %v1964_v47, 0.0 }
 0x338   : > { %v4376_v1 = vpop.f32.mrf.mxu0  ;;  %4497 = vmatmul.mubr.f32.gmra.mxu1 %v2132_v62 }
 0x339   : > { %v2133_v3 = vmax.f32 %v1959_v0, 0.0  ;;  %v1974_v5 = vadd.f32 %v4376_v1, %v5567_v17 }
 0x33a   : > { %v1968_v6 = vpop.f32.mrf.mxu0 }
 0x33b   : > { %v1969_v7 = vadd.f32 %v5567_v17, %v1968_v6  ;;  %4499 = vmatprep.mubr.f32.mxu1 %v2133_v3  ;;  %v2136_v10 = vmax.f32 %v1974_v5, 0.0 }
 0x33c   : > { %v4379_v8 = vpop.f32.mrf.mxu0  ;;  %4500 = vmatmul.mubr.f32.gmra.mxu1 %v2134_v4 }
 0x33d   : > { %v2135_v9 = vmax.f32 %v1969_v7, 0.0  ;;  %v1984_v11 = vadd.f32 %v4379_v8, %v5567_v17 }
 0x33e   : > { %v1978_v12 = vpop.f32.mrf.mxu0 }
 0x33f   : > { %v1979_v13 = vadd.f32 %v5567_v17, %v1978_v12  ;;  %4502 = vmatprep.mubr.f32.mxu1 %v2135_v9  ;;  %v2138_v19 = vmax.f32 %v1984_v11, 0.0 }
 0x340   : > { %v4382_v14 = vpop.f32.mrf.mxu0  ;;  %4503 = vmatmul.mubr.f32.gmra.mxu1 %v2136_v10 }
 0x341   : > { %v2137_v16 = vmax.f32 %v1979_v13, 0.0  ;;  %v1994_v20 = vadd.f32 %v4382_v14, %v5567_v17 }
 0x342   : > { %v1988_v21 = vpop.f32.mrf.mxu0 }
 0x343   : > { %v1989_v22 = vadd.f32 %v5567_v17, %v1988_v21  ;;  %4505 = vmatprep.mubr.f32.mxu1 %v2137_v16  ;;  %v2140_v2 = vmax.f32 %v1994_v20, 0.0 }
 0x344   : > { %v4385_v23 = vpop.f32.mrf.mxu0  ;;  %4506 = vmatmul.mubr.f32.gmra.mxu1 %v2138_v19 }
 0x345   : > { %v2139_v24 = vmax.f32 %v1989_v22, 0.0  ;;  %v2004_v25 = vadd.f32 %v4385_v23, %v5567_v17  ;;  %v5636_v22 = vld [vmem:[%s6356_s1 + $0x228] ss:$0 sm:$0xff] }
 0x346   : > { %v1998_v26 = vpop.f32.mrf.mxu0 }
 0x347   : > { %v1999_v27 = vadd.f32 %v5567_v17, %v1998_v26  ;;  %4508 = vmatprep.mubr.f32.mxu1 %v2139_v24  ;;  %v2142_v30 = vmax.f32 %v2004_v25, 0.0 }
 0x348   : > { %v4388_v28 = vpop.f32.mrf.mxu0  ;;  %4509 = vmatmul.mubr.f32.gmra.mxu1 %v2140_v2 }
 0x349   : > { %v2141_v29 = vmax.f32 %v1999_v27, 0.0  ;;  %v2014_v31 = vadd.f32 %v4388_v28, %v5567_v17 }
 0x34a   : > { %v2008_v32 = vpop.f32.mrf.mxu0 }
 0x34b   : > { %v2009_v33 = vadd.f32 %v5567_v17, %v2008_v32  ;;  %4511 = vmatprep.mubr.f32.mxu1 %v2141_v29  ;;  %v2144_v36 = vmax.f32 %v2014_v31, 0.0 }
 0x34c   : > { %v4391_v34 = vpop.f32.mrf.mxu0  ;;  %4512 = vmatmul.mubr.f32.gmra.mxu1 %v2142_v30 }
 0x34d   : > { %v2143_v35 = vmax.f32 %v2009_v33, 0.0  ;;  %v2024_v37 = vadd.f32 %v4391_v34, %v5567_v17 }
 0x34e   : > { %v2018_v38 = vpop.f32.mrf.mxu0 }
 0x34f   : > { %v2019_v39 = vadd.f32 %v5567_v17, %v2018_v38  ;;  %4514 = vmatprep.mubr.f32.mxu1 %v2143_v35  ;;  %v2146_v42 = vmax.f32 %v2024_v37, 0.0 }
 0x350   : > { %v4394_v40 = vpop.f32.mrf.mxu0  ;;  %4515 = vmatmul.mubr.f32.gmra.mxu1 %v2144_v36 }
 0x351   : > { %v2145_v41 = vmax.f32 %v2019_v39, 0.0  ;;  %v2034_v43 = vadd.f32 %v4394_v40, %v5567_v17 }
 0x352   : > { %v2028_v15 = vpop.f32.mrf.mxu0 }
 0x353   : > { %v2029_v18 = vadd.f32 %v5567_v17, %v2028_v15  ;;  %4517 = vmatprep.mubr.f32.mxu1 %v2145_v41  ;;  %v2148_v46 = vmax.f32 %v2034_v43, 0.0 }
 0x354   : > { %v4397_v44 = vpop.f32.mrf.mxu0  ;;  %4518 = vmatmul.mubr.f32.gmra.mxu1 %v2146_v42 }
 0x355   : > { %v2147_v45 = vmax.f32 %v2029_v18, 0.0  ;;  %v2044_v48 = vadd.f32 %v4397_v44, %v5567_v17 }
 0x356   : > { %v2038_v49 = vpop.f32.mrf.mxu0 }
 0x357   : > { %v2039_v50 = vadd.f32 %v5567_v17, %v2038_v49  ;;  %4520 = vmatprep.mubr.f32.mxu1 %v2147_v45  ;;  %v2150_v53 = vmax.f32 %v2044_v48, 0.0 }
 0x358   : > { %v4400_v51 = vpop.f32.mrf.mxu0  ;;  %4521 = vmatmul.mubr.f32.gmra.mxu1 %v2148_v46 }
 0x359   : > { %v2149_v52 = vmax.f32 %v2039_v50, 0.0  ;;  %v2054_v54 = vadd.f32 %v4400_v51, %v5567_v17 }
 0x35a   : > { %v2048_v55 = vpop.f32.mrf.mxu0 }
 0x35b   : > { %v2049_v56 = vadd.f32 %v5567_v17, %v2048_v55  ;;  %4523 = vmatprep.mubr.f32.mxu1 %v2149_v52  ;;  %v2152_v59 = vmax.f32 %v2054_v54, 0.0 }
 0x35c   : > { %v4403_v57 = vpop.f32.mrf.mxu0  ;;  %4524 = vmatmul.mubr.f32.gmra.mxu1 %v2150_v53 }
 0x35d   : > { %v2151_v58 = vmax.f32 %v2049_v56, 0.0  ;;  %v2064_v60 = vadd.f32 %v4403_v57, %v5567_v17 }
 0x35e   : > { %v2058_v61 = vpop.f32.mrf.mxu0 }
 0x35f   : > { %v2059_v62 = vadd.f32 %v5567_v17, %v2058_v61  ;;  %4526 = vmatprep.mubr.f32.mxu1 %v2151_v58  ;;  %v2154_v0 = vmax.f32 %v2064_v60, 0.0 }
 0x360   : > { %v4406_v47 = vpop.f32.mrf.mxu0  ;;  %4527 = vmatmul.mubr.f32.gmra.mxu1 %v2152_v59 }
 0x361   : > { %v2153_v63 = vmax.f32 %v2059_v62, 0.0  ;;  %v2074_v1 = vadd.f32 %v4406_v47, %v5567_v17 }
 0x362   : > { %v2068_v3 = vpop.f32.mrf.mxu0 }
 0x363   : > { %v2069_v4 = vadd.f32 %v5567_v17, %v2068_v3  ;;  %4529 = vmatprep.mubr.f32.mxu1 %v2153_v63  ;;  %v2156_v7 = vmax.f32 %v2074_v1, 0.0 }
 0x364   : > { %v4409_v5 = vpop.f32.mrf.mxu0  ;;  %4530 = vmatmul.mubr.f32.gmra.mxu1 %v2154_v0 }
 0x365   : > { %v2155_v6 = vmax.f32 %v2069_v4, 0.0  ;;  %v2084_v8 = vadd.f32 %v4409_v5, %v5567_v17 }
 0x366   : > { %v2078_v9 = vpop.f32.mrf.mxu0 }
 0x367   : > { %v2079_v10 = vadd.f32 %v5567_v17, %v2078_v9  ;;  %4532 = vmatprep.mubr.f32.mxu1 %v2155_v6  ;;  %v2158_v13 = vmax.f32 %v2084_v8, 0.0 }
 0x368   : > { %v4412_v11 = vpop.f32.mrf.mxu0  ;;  %4533 = vmatmul.mubr.f32.gmra.mxu1 %v2156_v7 }
 0x369   : > { %v2157_v12 = vmax.f32 %v2079_v10, 0.0  ;;  %v2094_v14 = vadd.f32 %v4412_v11, %v5567_v17 }
 0x36a   : > { %v2088_v16 = vpop.f32.mrf.mxu0 }
 0x36b   : > { %v2089_v19 = vadd.f32 %v5567_v17, %v2088_v16  ;;  %4535 = vmatprep.mubr.f32.mxu1 %v2157_v12  ;;  %v2160_v21 = vmax.f32 %v2094_v14, 0.0 }
 0x36c   : > { %4536 = vmatmul.mubr.f32.gmra.mxu1 %v2158_v13 }
 0x36d   : > { %v2159_v20 = vmax.f32 %v2089_v19, 0.0 }
 0x36f   : > { %4538 = vmatprep.mubr.f32.mxu1 %v2159_v20 }
 0x370   : > { %4539 = vmatmul.mubr.f32.gmra.mxu1 %v2160_v21 }
 0x3b4   : > { %v4447_v23 = vpop.f32.mrf.mxu1 }
 0x3b5   : > { %v2254_v24 = vadd.f32 %v4447_v23, %v5636_v22 }
 0x3b6   : > { %v2248_v2 = vpop.f32.mrf.mxu1 }
 0x3b7   : > { %v2568_v25 = vmax.f32 %v2254_v24, -30.0  ;;  %v2249_v26 = vadd.f32 %v5636_v22, %v2248_v2 }
 0x3b8   : > { %v4450_v27 = vpop.f32.mrf.mxu1 }
 0x3b9   : > { %v2632_v17 = vsub.f32 0.0, %v2568_v25  ;;  %v2567_v28 = vmax.f32 %v2249_v26, -30.0  ;;  %v2264_v29 = vadd.f32 %v4450_v27, %v5636_v22 }
 0x3ba   : > { %v2258_v30 = vpop.f32.mrf.mxu1 }
 0x3bb   : > { %v2697_v31 = vmul.f32 1.442695, %v2632_v17  ;;  %v2631_v32 = vsub.f32 0.0, %v2567_v28  ;;  %v2570_v33 = vmax.f32 %v2264_v29, -30.0  ;;  %v2259_v34 = vadd.f32 %v5636_v22, %v2258_v30 }
 0x3bc   : > { %v4453_v35 = vpop.f32.mrf.mxu1 }
 0x3bd   : > { %4632 = vpow2.f32 %v2697_v31  ;;  %v2695_v36 = vmul.f32 1.442695, %v2631_v32  ;;  %v2634_v37 = vsub.f32 0.0, %v2570_v33  ;;  %v2569_v38 = vmax.f32 %v2259_v34, -30.0 }
 0x3be   : > { %v2274_v39 = vadd.f32 %v4453_v35, %v5636_v22  ;;  %v2268_v40 = vpop.f32.mrf.mxu1 }
 0x3bf   : > { %4634 = vpow2.f32 %v2695_v36  ;;  %v2701_v41 = vmul.f32 1.442695, %v2634_v37  ;;  %v2633_v42 = vsub.f32 0.0, %v2569_v38  ;;  %v2269_v43 = vadd.f32 %v5636_v22, %v2268_v40 }
 0x3c0   : > { %v2572_v15 = vmax.f32 %v2274_v39, -30.0  ;;  %v4456_v18 = vpop.f32.mrf.mxu1 }
 0x3c1   : > { %4636 = vpow2.f32 %v2701_v41  ;;  %v2699_v44 = vmul.f32 1.442695, %v2633_v42  ;;  %v2571_v45 = vmax.f32 %v2269_v43, -30.0  ;;  %v2284_v46 = vadd.f32 %v4456_v18, %v5636_v22 }
 0x3c2   : > { %v2636_v48 = vsub.f32 0.0, %v2572_v15  ;;  %v2278_v49 = vpop.f32.mrf.mxu1 }
 0x3c3   : > { %4638 = vpow2.f32 %v2699_v44  ;;  %v2635_v50 = vsub.f32 0.0, %v2571_v45  ;;  %v2574_v51 = vmax.f32 %v2284_v46, -30.0  ;;  %v2279_v52 = vadd.f32 %v5636_v22, %v2278_v49 }
 0x3c4   : > { %v2705_v53 = vmul.f32 1.442695, %v2636_v48  ;;  %v4459_v54 = vpop.f32.mrf.mxu1 }
 0x3c5   : > { %v2703_v55 = vmul.f32 1.442695, %v2635_v50  ;;  %v2638_v56 = vsub.f32 0.0, %v2574_v51  ;;  %v2573_v57 = vmax.f32 %v2279_v52, -30.0  ;;  %v2294_v58 = vadd.f32 %v4459_v54, %v5636_v22 }
 0x3c6   : > { %4640 = vpow2.f32 %v2705_v53  ;;  %v2288_v59 = vpop.f32.mrf.mxu1 }
 0x3c7   : > { %4642 = vpow2.f32 %v2703_v55  ;;  %v2709_v60 = vmul.f32 1.442695, %v2638_v56  ;;  %v2637_v61 = vsub.f32 0.0, %v2573_v57  ;;  %v2576_v62 = vmax.f32 %v2294_v58, -30.0 }
 0x3c8   : > { %v2289_v47 = vadd.f32 %v5636_v22, %v2288_v59  ;;  %v4462_v63 = vpop.f32.mrf.mxu1 }
 0x3c9   : > { %4644 = vpow2.f32 %v2709_v60  ;;  %v2707_v0 = vmul.f32 1.442695, %v2637_v61  ;;  %v2640_v1 = vsub.f32 0.0, %v2576_v62  ;;  %v2304_v3 = vadd.f32 %v4462_v63, %v5636_v22 }
 0x3ca   : > { %v4633_v4 = vpop.eup %4632  ;;  %v2575_v5 = vmax.f32 %v2289_v47, -30.0  ;;  %v2298_v6 = vpop.f32.mrf.mxu1 }
 0x3cb   : > { %v5649_v7 = vadd.f32 1.0, %v4633_v4  ;;  %4646 = vpow2.f32 %v2707_v0  ;;  %v2713_v8 = vmul.f32 1.442695, %v2640_v1  ;;  %v2578_v9 = vmax.f32 %v2304_v3, -30.0 }
 0x3cc   : > { %v4635_v10 = vpop.eup %4634  ;;  %v2639_v11 = vsub.f32 0.0, %v2575_v5  ;;  %v2299_v12 = vadd.f32 %v5636_v22, %v2298_v6  ;;  %v4465_v13 = vpop.f32.mrf.mxu1 }
 0x3cd   : > { %4648 = vrcp.f32 %v5649_v7  ;;  %v5653_v14 = vadd.f32 1.0, %v4635_v10  ;;  %v2642_v16 = vsub.f32 0.0, %v2578_v9  ;;  %v2314_v19 = vadd.f32 %v4465_v13, %v5636_v22 }
 0x3ce   : > { %v4637_v20 = vpop.eup %4636  ;;  %4650 = vpow2.f32 %v2713_v8  ;;  %v2711_v21 = vmul.f32 1.442695, %v2639_v11  ;;  %v2577_v23 = vmax.f32 %v2299_v12, -30.0  ;;  %v2308_v24 = vpop.f32.mrf.mxu1 }
 0x3cf   : > { %4652 = vrcp.f32 %v5653_v14  ;;  %v5657_v2 = vadd.f32 1.0, %v4637_v20  ;;  %v2717_v25 = vmul.f32 1.442695, %v2642_v16  ;;  %v2580_v26 = vmax.f32 %v2314_v19, -30.0 }
 0x3d0   : > { %v4639_v27 = vpop.eup %4638  ;;  %4654 = vpow2.f32 %v2711_v21  ;;  %v2641_v17 = vsub.f32 0.0, %v2577_v23  ;;  %v2309_v28 = vadd.f32 %v5636_v22, %v2308_v24  ;;  %v4468_v29 = vpop.f32.mrf.mxu1 }
 0x3d1   : > { %4656 = vrcp.f32 %v5657_v2  ;;  %v5661_v30 = vadd.f32 1.0, %v4639_v27  ;;  %v2644_v31 = vsub.f32 0.0, %v2580_v26  ;;  %v2324_v32 = vadd.f32 %v4468_v29, %v5636_v22 }
 0x3d2   : > { %4658 = vpow2.f32 %v2717_v25  ;;  %v2715_v33 = vmul.f32 1.442695, %v2641_v17  ;;  %v2579_v34 = vmax.f32 %v2309_v28, -30.0  ;;  %v2318_v35 = vpop.f32.mrf.mxu1 }
 0x3d3   : > { %v4641_v36 = vpop.eup %4640  ;;  %4660 = vrcp.f32 %v5661_v30  ;;  %v2721_v37 = vmul.f32 1.442695, %v2644_v31  ;;  %v2582_v38 = vmax.f32 %v2324_v32, -30.0  ;;  %v2319_v39 = vadd.f32 %v5636_v22, %v2318_v35 }
 0x3d4   : > { %v4643_v40 = vpop.eup %4642  ;;  %v5666_v41 = vadd.f32 1.0, %v4641_v36  ;;  %4662 = vpow2.f32 %v2715_v33  ;;  %v2643_v42 = vsub.f32 0.0, %v2579_v34  ;;  %v4471_v43 = vpop.f32.mrf.mxu1 }
 0x3d5   : > { %v5668_v15 = vadd.f32 1.0, %v4643_v40  ;;  %4664 = vpow2.f32 %v2721_v37  ;;  %v2646_v18 = vsub.f32 0.0, %v2582_v38  ;;  %v2581_v44 = vmax.f32 %v2319_v39, -30.0 }
 0x3d6   : > { %v4645_v45 = vpop.eup %4644  ;;  %4666 = vrcp.f32 %v5666_v41  ;;  %v2719_v46 = vmul.f32 1.442695, %v2643_v42  ;;  %v2334_v48 = vadd.f32 %v4471_v43, %v5636_v22  ;;  %v2328_v49 = vpop.f32.mrf.mxu1 }
 0x3d7   : > { %4668 = vrcp.f32 %v5668_v15  ;;  %v5673_v50 = vadd.f32 1.0, %v4645_v45  ;;  %v2725_v51 = vmul.f32 1.442695, %v2646_v18  ;;  %v2645_v52 = vsub.f32 0.0, %v2581_v44 }
 0x3d8   : > { %v4647_v53 = vpop.eup %4646  ;;  %4670 = vpow2.f32 %v2719_v46  ;;  %v2584_v54 = vmax.f32 %v2334_v48, -30.0  ;;  %v2329_v55 = vadd.f32 %v5636_v22, %v2328_v49  ;;  %v4474_v56 = vpop.f32.mrf.mxu1 }
 0x3d9   : > { %4672 = vrcp.f32 %v5673_v50  ;;  %v5678_v57 = vadd.f32 1.0, %v4647_v53  ;;  %v2723_v58 = vmul.f32 1.442695, %v2645_v52  ;;  %v2344_v59 = vadd.f32 %v4474_v56, %v5636_v22 }
 0x3da   : > { %v4649_v60 = vpop.eup %4648  ;;  %4674 = vpow2.f32 %v2725_v51  ;;  %v2648_v61 = vsub.f32 0.0, %v2584_v54  ;;  %v2583_v62 = vmax.f32 %v2329_v55, -30.0  ;;  %v2338_v47 = vpop.f32.mrf.mxu1 }
 0x3db   : > { %v4651_v63 = vpop.eup %4650  ;;  %v2952_v0 = vmul.f32 %v4649_v60, %v5649_v7  ;;  %4676 = vrcp.f32 %v5678_v57  ;;  %v2586_v1 = vmax.f32 %v2344_v59, -30.0  ;;  %v2339_v3 = vadd.f32 %v5636_v22, %v2338_v47 }
 0x3dc   : > { %v4653_v4 = vpop.eup %4652  ;;  %v5686_v5 = vadd.f32 1.0, %v4651_v63  ;;  %4678 = vpow2.f32 %v2723_v58  ;;  %v2729_v6 = vmul.f32 1.442695, %v2648_v61  ;;  %v2647_v8 = vsub.f32 0.0, %v2583_v62  ;;  %v4477_v9 = vpop.f32.mrf.mxu1 }
 0x3dd   : > { %v4655_v10 = vpop.eup %4654  ;;  %v3016_v11 = vsub.f32 2.0, %v2952_v0  ;;  %v2951_v12 = vmul.f32 %v4653_v4, %v5653_v14  ;;  %v2650_v13 = vsub.f32 0.0, %v2586_v1  ;;  %v2585_v16 = vmax.f32 %v2339_v3, -30.0 }
 0x3de   : > { %v4657_v19 = vpop.eup %4656  ;;  %4680 = vrcp.f32 %v5686_v5  ;;  %v5690_v7 = vadd.f32 1.0, %v4655_v10  ;;  %v2727_v20 = vmul.f32 1.442695, %v2647_v8  ;;  %v2354_v21 = vadd.f32 %v4477_v9, %v5636_v22  ;;  %v2348_v23 = vpop.f32.mrf.mxu1 }
 0x3df   : > { %v4659_v24 = vpop.eup %4658  ;;  %v3080_v25 = vmul.f32 %v4649_v60, %v3016_v11  ;;  %v3015_v26 = vsub.f32 2.0, %v2951_v12  ;;  %v2954_v27 = vmul.f32 %v4657_v19, %v5657_v2  ;;  %4682 = vpow2.f32 %v2729_v6 }
 0x3e0   : > { %v4661_v17 = vpop.eup %4660  ;;  %4684 = vrcp.f32 %v5690_v7  ;;  %v5695_v14 = vadd.f32 1.0, %v4659_v24  ;;  %v2733_v28 = vmul.f32 1.442695, %v2650_v13  ;;  %v2649_v29 = vsub.f32 0.0, %v2585_v16  ;;  %v4480_v31 = vpop.f32.mrf.mxu1 }
 0x3e1   : > { %v4663_v32 = vpop.eup %4662  ;;  %3145 = vst.msk [vmem:[%s5698_s29 + $0x8] sm:$0xff] %vm3143_vm0, %v3080_v25  ;;  %v3079_v33 = vmul.f32 %v4653_v4, %v3015_v26  ;;  %v3018_v34 = vsub.f32 2.0, %v2954_v27  ;;  %v2953_v2 = vmul.f32 %v4661_v17, %v5661_v30  ;;  %4686 = vpow2.f32 %v2727_v20 }
 0x3e2   : > { %v4665_v35 = vpop.eup %4664  ;;  %4688 = vrcp.f32 %v5695_v14  ;;  %v5704_v36 = vadd.f32 1.0, %v4663_v32  ;;  %v2731_v37 = vmul.f32 1.442695, %v2649_v29  ;;  %v2588_v38 = vmax.f32 %v2354_v21, -30.0  ;;  %v2358_v39 = vpop.f32.mrf.mxu1 }
 0x3e3   : > { %v4667_v40 = vpop.eup %4666  ;;  %3144 = vst.msk [vmem:[%s5698_s29] sm:$0xff] %vm3143_vm0, %v3079_v33  ;;  %v3082_v42 = vmul.f32 %v4657_v19, %v3018_v34  ;;  %v3017_v43 = vsub.f32 2.0, %v2953_v2  ;;  %v5708_v18 = vadd.f32 1.0, %v4665_v35  ;;  %4690 = vpow2.f32 %v2733_v28 }
 0x3e4   : > { %v4669_v44 = vpop.eup %4668  ;;  %v2956_v30 = vmul.f32 %v4667_v40, %v5666_v41  ;;  %4692 = vrcp.f32 %v5704_v36  ;;  %v2652_v45 = vsub.f32 0.0, %v2588_v38  ;;  %v2349_v46 = vadd.f32 %v5636_v22, %v2348_v23  ;;  %v4483_v48 = vpop.f32.mrf.mxu1 }
 0x3e5   : > { %v4671_v49 = vpop.eup %4670  ;;  %3147 = vst.msk [vmem:[%s5698_s29 + $0x18] sm:$0xff] %vm3143_vm0, %v3082_v42  ;;  %v3081_v51 = vmul.f32 %v4661_v17, %v3017_v43  ;;  %v2955_v52 = vmul.f32 %v4669_v44, %v5668_v15  ;;  %4694 = vrcp.f32 %v5708_v18  ;;  %v2364_v53 = vadd.f32 %v4480_v31, %v5636_v22 }
 0x3e6   : > { %v4673_v54 = vpop.eup %4672  ;;  %v3020_v55 = vsub.f32 2.0, %v2956_v30  ;;  %v5718_v41 = vadd.f32 1.0, %v4671_v49  ;;  %4696 = vpow2.f32 %v2731_v37  ;;  %v2737_v56 = vmul.f32 1.442695, %v2652_v45  ;;  %v2368_v58 = vpop.f32.mrf.mxu1 }
 0x3e7   : > { %v4675_v59 = vpop.eup %4674  ;;  %3146 = vst.msk [vmem:[%s5698_s29 + $0x10] sm:$0xff] %vm3143_vm0, %v3081_v51  ;;  %v3019_v60 = vsub.f32 2.0, %v2955_v52  ;;  %v2958_v61 = vmul.f32 %v4673_v54, %v5673_v50  ;;  %v2587_v62 = vmax.f32 %v2349_v46, -30.0  ;;  %v2590_v15 = vmax.f32 %v2364_v53, -30.0 }
 0x3e8   : > { %v4677_v47 = vpop.eup %4676  ;;  %v3084_v63 = vmul.f32 %v4667_v40, %v3020_v55  ;;  %4698 = vrcp.f32 %v5718_v41  ;;  %v5724_v0 = vadd.f32 1.0, %v4675_v59  ;;  %v2359_v1 = vadd.f32 %v5636_v22, %v2358_v39  ;;  %v5727_v3 = vpop.f32.mrf.mxu1 }
 0x3e9   : > { %v4679_v4 = vpop.eup %4678  ;;  %v3083_v6 = vmul.f32 %v4669_v44, %v3019_v60  ;;  %v3022_v8 = vsub.f32 2.0, %v2958_v61  ;;  %v2957_v9 = vmul.f32 %v4677_v47, %v5678_v57  ;;  %4700 = vpow2.f32 %v2737_v56 }
 0x3ea   : > { %3149 = vst.msk [vmem:[%s5698_s29 + $0x28] sm:$0xff] %vm3143_vm0, %v3084_v63  ;;  %4702 = vrcp.f32 %v5724_v0  ;;  %v5733_v50 = vadd.f32 1.0, %v4679_v4  ;;  %v2651_v10 = vsub.f32 0.0, %v2587_v62  ;;  %v2654_v11 = vsub.f32 0.0, %v2590_v15  ;;  %v5735_v12 = vpop.f32.mrf.mxu1 }
 0x3eb   : > { %v4681_v13 = vpop.eup %4680  ;;  %3148 = vst.msk [vmem:[%s5698_s29 + $0x20] sm:$0xff] %vm3143_vm0, %v3083_v6  ;;  %v3086_v16 = vmul.f32 %v4673_v54, %v3022_v8  ;;  %v3021_v19 = vsub.f32 2.0, %v2957_v9  ;;  %v2589_v20 = vmax.f32 %v2359_v1, -30.0  ;;  %v2374_v57 = vadd.f32 %v4483_v48, %v5636_v22 }
 0x3ec   : > { %v4683_v21 = vpop.eup %4682  ;;  %v2960_v23 = vmul.f32 %v4681_v13, %v5686_v5  ;;  %4704 = vrcp.f32 %v5733_v50  ;;  %v2735_v24 = vmul.f32 1.442695, %v2651_v10  ;;  %v2741_v25 = vmul.f32 1.442695, %v2654_v11  ;;  %v4489_v26 = vpop.f32.mrf.mxu1 }
 0x3ed   : > { %v4685_v27 = vpop.eup %4684  ;;  %3151 = vst.msk [vmem:[%s5698_s29 + $0x38] sm:$0xff] %vm3143_vm0, %v3086_v16  ;;  %v3085_v17 = vmul.f32 %v4677_v47, %v3021_v19  ;;  %v5744_v28 = vadd.f32 1.0, %v4683_v21  ;;  %v2653_v29 = vsub.f32 0.0, %v2589_v20  ;;  %v2592_v31 = vmax.f32 %v2374_v57, -30.0 }
 0x3ee   : > { %v4687_v32 = vpop.eup %4686  ;;  %v3024_v33 = vsub.f32 2.0, %v2960_v23  ;;  %v2959_v34 = vmul.f32 %v4685_v27, %v5690_v7  ;;  %4706 = vpow2.f32 %v2735_v24  ;;  %v2369_v5 = vadd.f32 %v5636_v22, %v2368_v58  ;;  %v5748_v2 = vpop.f32.mrf.mxu1 }
 0x3ef   : > { %v4689_v35 = vpop.eup %4688  ;;  %3150 = vst.msk [vmem:[%s5698_s29 + $0x30] sm:$0xff] %vm3143_vm0, %v3085_v17  ;;  %4708 = vrcp.f32 %v5744_v28  ;;  %v5753_v37 = vadd.f32 1.0, %v4687_v32  ;;  %v2739_v38 = vmul.f32 1.442695, %v2653_v29  ;;  %v2656_v39 = vsub.f32 0.0, %v2592_v31 }
 0x3f0   : > { %v4691_v40 = vpop.eup %4690  ;;  %v3088_v42 = vmul.f32 %v4681_v13, %v3024_v33  ;;  %v3023_v43 = vsub.f32 2.0, %v2959_v34  ;;  %v2962_v7 = vmul.f32 %v4689_v35, %v5695_v14  ;;  %4710 = vpow2.f32 %v2741_v25  ;;  %v4492_v44 = vpop.f32.mrf.mxu1 }
 0x3f1   : > { %v4693_v30 = vpop.eup %4692  ;;  %4712 = vrcp.f32 %v5753_v37  ;;  %v5757_v45 = vadd.f32 1.0, %v4691_v40  ;;  %v2745_v46 = vmul.f32 1.442695, %v2656_v39  ;;  %v2591_v48 = vmax.f32 %v2369_v5, -30.0 }
 0x3f2   : > { %v4695_v49 = vpop.eup %4694  ;;  %3153 = vst.msk [vmem:[%s5698_s29 + $0x48] sm:$0xff] %vm3143_vm0, %v3088_v42  ;;  %v3087_v51 = vmul.f32 %v4685_v27, %v3023_v43  ;;  %v3026_v52 = vsub.f32 2.0, %v2962_v7  ;;  %v2961_v53 = vmul.f32 %v4693_v30, %v5704_v36  ;;  %4714 = vpow2.f32 %v2739_v38  ;;  %v5762_v54 = vpop.f32.mrf.mxu1 }
 0x3f3   : > { %v4697_v14 = vpop.eup %4696  ;;  %v2964_v55 = vmul.f32 %v4695_v49, %v5708_v18  ;;  %4716 = vrcp.f32 %v5757_v45  ;;  %v2655_v56 = vsub.f32 0.0, %v2591_v48  ;;  %v2384_v58 = vadd.f32 %v5727_v3, %v5636_v22 }
 0x3f4   : > { %3152 = vst.msk [vmem:[%s5698_s29 + $0x40] sm:$0xff] %vm3143_vm0, %v3087_v51  ;;  %v3090_v59 = vmul.f32 %v4689_v35, %v3026_v52  ;;  %v3025_v60 = vsub.f32 2.0, %v2961_v53  ;;  %v5770_v61 = vadd.f32 1.0, %v4697_v14  ;;  %4718 = vpow2.f32 %v2745_v46  ;;  %v5772_v36 = vpop.f32.mrf.mxu1 }
 0x3f5   : > { %v4699_v62 = vpop.eup %4698  ;;  %v3028_v15 = vsub.f32 2.0, %v2964_v55  ;;  %v2743_v18 = vmul.f32 1.442695, %v2655_v56  ;;  %v2594_v47 = vmax.f32 %v2384_v58, -30.0  ;;  %v2379_v63 = vadd.f32 %v5636_v22, %v5735_v12 }
 0x3f6   : > { %v4701_v1 = vpop.eup %4700  ;;  %3155 = vst.msk [vmem:[%s5698_s29 + $0x58] sm:$0xff] %vm3143_vm0, %v3090_v59  ;;  %v3089_v3 = vmul.f32 %v4693_v30, %v3025_v60  ;;  %v2963_v4 = vmul.f32 %v4699_v62, %v5718_v41  ;;  %4720 = vrcp.f32 %v5770_v61  ;;  %v2394_v6 = vadd.f32 %v4489_v26, %v5636_v22  ;;  %v5781_v8 = vpop.f32.mrf.mxu1 }
 0x3f7   : > { %v4703_v9 = vpop.eup %4702  ;;  %v3092_v10 = vmul.f32 %v4695_v49, %v3028_v15  ;;  %v5783_v11 = vadd.f32 1.0, %v4701_v1  ;;  %4722 = vpow2.f32 %v2743_v18  ;;  %v2658_v13 = vsub.f32 0.0, %v2594_v47 }
 0x3f8   : > { %3154 = vst.msk [vmem:[%s5698_s29 + $0x50] sm:$0xff] %vm3143_vm0, %v3089_v3  ;;  %v3027_v12 = vsub.f32 2.0, %v2963_v4  ;;  %v2966_v16 = vmul.f32 %v4703_v9, %v5724_v0  ;;  %v2593_v19 = vmax.f32 %v2379_v63, -30.0  ;;  %v2596_v41 = vmax.f32 %v2394_v6, -30.0  ;;  %v5788_v20 = vpop.f32.mrf.mxu1 }
 0x3f9   : > { %v4705_v57 = vpop.eup %4704  ;;  %3157 = vst.msk [vmem:[%s5698_s29 + $0x68] sm:$0xff] %vm3143_vm0, %v3092_v10  ;;  %4724 = vrcp.f32 %v5783_v11  ;;  %v2749_v21 = vmul.f32 1.442695, %v2658_v13  ;;  %v2389_v23 = vadd.f32 %v5636_v22, %v5748_v2  ;;  %v2404_v24 = vadd.f32 %v4492_v44, %v5636_v22 }
 0x3fa   : > { %v3091_v25 = vmul.f32 %v4699_v62, %v3027_v12  ;;  %v3030_v26 = vsub.f32 2.0, %v2966_v16  ;;  %v2965_v0 = vmul.f32 %v4705_v57, %v5733_v50  ;;  %v2657_v27 = vsub.f32 0.0, %v2593_v19  ;;  %v5797_v17 = vpop.f32.mrf.mxu1 }
 0x3fb   : > { %v4707_v29 = vpop.eup %4706  ;;  %4726 = vpow2.f32 %v2749_v21  ;;  %v2660_v31 = vsub.f32 0.0, %v2596_v41  ;;  %v2595_v32 = vmax.f32 %v2389_v23, -30.0  ;;  %v2598_v33 = vmax.f32 %v2404_v24, -30.0 }
 0x3fc   : > { %v4709_v34 = vpop.eup %4708  ;;  %3156 = vst.msk [vmem:[%s5698_s29 + $0x60] sm:$0xff] %vm3143_vm0, %v3091_v25  ;;  %v3094_v5 = vmul.f32 %v4703_v9, %v3030_v26  ;;  %v3029_v2 = vsub.f32 2.0, %v2965_v0  ;;  %v5801_v35 = vadd.f32 1.0, %v4707_v29  ;;  %v2747_v38 = vmul.f32 1.442695, %v2657_v27  ;;  %v5803_v39 = vpop.f32.mrf.mxu1 }
 0x3fd   : > { %v4711_v50 = vpop.eup %4710  ;;  %v2968_v40 = vmul.f32 %v4709_v34, %v5744_v28  ;;  %v2753_v42 = vmul.f32 1.442695, %v2660_v31  ;;  %v2659_v43 = vsub.f32 0.0, %v2595_v32  ;;  %v2662_v7 = vsub.f32 0.0, %v2598_v33 }
 0x3fe   : > { %v4713_v44 = vpop.eup %4712  ;;  %3159 = vst.msk [vmem:[%s5698_s29 + $0x78] sm:$0xff] %vm3143_vm0, %v3094_v5  ;;  %v3093_v30 = vmul.f32 %v4705_v57, %v3029_v2  ;;  %4728 = vrcp.f32 %v5801_v35  ;;  %v5809_v46 = vadd.f32 1.0, %v4711_v50  ;;  %v2399_v48 = vadd.f32 %v5636_v22, %v5762_v54  ;;  %v5813_v49 = vpop.f32.mrf.mxu1 }
 0x3ff   : > { %v4715_v51 = vpop.eup %4714  ;;  %v3032_v52 = vsub.f32 2.0, %v2968_v40  ;;  %v2967_v28 = vmul.f32 %v4713_v44, %v5753_v37  ;;  %4730 = vpow2.f32 %v2747_v38  ;;  %v2751_v53 = vmul.f32 1.442695, %v2659_v43 }
 0x400   : > { %v4717_v14 = vpop.eup %4716  ;;  %3158 = vst.msk [vmem:[%s5698_s29 + $0x70] sm:$0xff] %vm3143_vm0, %v3093_v30  ;;  %4732 = vrcp.f32 %v5809_v46  ;;  %v5819_v55 = vadd.f32 1.0, %v4715_v51  ;;  %v2757_v56 = vmul.f32 1.442695, %v2662_v7  ;;  %v2597_v58 = vmax.f32 %v2399_v48, -30.0  ;;  %v4504_v59 = vpop.f32.mrf.mxu1 }
 0x401   : > { %v4719_v54 = vpop.eup %4718  ;;  %v3096_v60 = vmul.f32 %v4709_v34, %v3032_v52  ;;  %v3031_v62 = vsub.f32 2.0, %v2967_v28  ;;  %v2970_v15 = vmul.f32 %v4717_v14, %v5757_v45  ;;  %4734 = vpow2.f32 %v2753_v42 }
 0x402   : > { %4736 = vrcp.f32 %v5819_v55  ;;  %v5823_v37 = vadd.f32 1.0, %v4719_v54  ;;  %v2661_v18 = vsub.f32 0.0, %v2597_v58  ;;  %v2414_v47 = vadd.f32 %v5772_v36, %v5636_v22  ;;  %v5827_v63 = vpop.f32.mrf.mxu1 }
 0x403   : > { %v4721_v1 = vpop.eup %4720  ;;  %3161 = vst.msk [vmem:[%s5698_s29 + $0x88] sm:$0xff] %vm3143_vm0, %v3096_v60  ;;  %v3095_v3 = vmul.f32 %v4713_v44, %v3031_v62  ;;  %v3034_v4 = vsub.f32 2.0, %v2970_v15  ;;  %4738 = vpow2.f32 %v2751_v53  ;;  %v2409_v45 = vadd.f32 %v5636_v22, %v5781_v8 }
 0x404   : > { %v4723_v6 = vpop.eup %4722  ;;  %v2969_v9 = vmul.f32 %v4721_v1, %v5770_v61  ;;  %4740 = vrcp.f32 %v5823_v37  ;;  %v2755_v10 = vmul.f32 1.442695, %v2661_v18  ;;  %v2600_v13 = vmax.f32 %v2414_v47, -30.0  ;;  %v5835_v36 = vpop.f32.mrf.mxu1 }
 0x405   : > { %3160 = vst.msk [vmem:[%s5698_s29 + $0x80] sm:$0xff] %vm3143_vm0, %v3095_v3  ;;  %v3098_v12 = vmul.f32 %v4717_v14, %v3034_v4  ;;  %v5839_v16 = vadd.f32 1.0, %v4723_v6  ;;  %4742 = vpow2.f32 %v2757_v56  ;;  %v2599_v19 = vmax.f32 %v2409_v45, -30.0 }
 0x406   : > { %v4725_v41 = vpop.eup %4724  ;;  %v3033_v57 = vsub.f32 2.0, %v2969_v9  ;;  %4744 = vpow2.f32 %v2755_v10  ;;  %v2664_v8 = vsub.f32 0.0, %v2600_v13  ;;  %v2424_v61 = vadd.f32 %v5788_v20, %v5636_v22  ;;  %v5843_v21 = vpop.f32.mrf.mxu1 }
 0x407   : > { %3163 = vst.msk [vmem:[%s5698_s29 + $0x98] sm:$0xff] %vm3143_vm0, %v3098_v12  ;;  %v2972_v23 = vmul.f32 %v4725_v41, %v5783_v11  ;;  %4746 = vrcp.f32 %v5839_v16  ;;  %v2663_v24 = vsub.f32 0.0, %v2599_v19  ;;  %v2419_v25 = vadd.f32 %v5636_v22, %v5797_v17 }
 0x408   : > { %v4727_v26 = vpop.eup %4726  ;;  %v3097_v0 = vmul.f32 %v4721_v1, %v3033_v57  ;;  %v2761_v27 = vmul.f32 1.442695, %v2664_v8  ;;  %v2602_v29 = vmax.f32 %v2424_v61, -30.0  ;;  %v2434_v20 = vadd.f32 %v5803_v39, %v5636_v22  ;;  %v5853_v31 = vpop.f32.mrf.mxu1 }
 0x409   : > { %v3036_v32 = vsub.f32 2.0, %v2972_v23  ;;  %v5855_v33 = vadd.f32 1.0, %v4727_v26  ;;  %v2759_v34 = vmul.f32 1.442695, %v2663_v24  ;;  %v2601_v11 = vmax.f32 %v2419_v25, -30.0 }
 0x40a   : > { %3162 = vst.msk [vmem:[%s5698_s29 + $0x90] sm:$0xff] %vm3143_vm0, %v3097_v0  ;;  %4748 = vpow2.f32 %v2761_v27  ;;  %v2666_v5 = vsub.f32 0.0, %v2602_v29  ;;  %v2604_v17 = vmax.f32 %v2434_v20, -30.0  ;;  %v2429_v2 = vadd.f32 %v5636_v22, %v5813_v49  ;;  %v5861_v38 = vpop.f32.mrf.mxu1 }
 0x40b   : > { %v4729_v50 = vpop.eup %4728  ;;  %v3100_v39 = vmul.f32 %v4725_v41, %v3036_v32  ;;  %4750 = vrcp.f32 %v5855_v33  ;;  %v2665_v40 = vsub.f32 0.0, %v2601_v11  ;;  %v2444_v42 = vadd.f32 %v4504_v59, %v5636_v22 }
 0x40c   : > { %v4731_v43 = vpop.eup %4730  ;;  %v2971_v7 = vmul.f32 %v4729_v50, %v5801_v35  ;;  %4752 = vpow2.f32 %v2759_v34  ;;  %v2765_v44 = vmul.f32 1.442695, %v2666_v5  ;;  %v2668_v30 = vsub.f32 0.0, %v2604_v17  ;;  %v5866_v48 = vpop.f32.mrf.mxu1 }
 0x40d   : > { %v4733_v51 = vpop.eup %4732  ;;  %3165 = vst.msk [vmem:[%s5698_s29 + $0xa8] sm:$0xff] %vm3143_vm0, %v3100_v39  ;;  %v5870_v49 = vadd.f32 1.0, %v4731_v43  ;;  %v2763_v52 = vmul.f32 1.442695, %v2665_v40  ;;  %v2603_v28 = vmax.f32 %v2429_v2, -30.0  ;;  %v2606_v53 = vmax.f32 %v2444_v42, -30.0 }
 0x40e   : > { %v4735_v14 = vpop.eup %4734  ;;  %v3035_v56 = vsub.f32 2.0, %v2971_v7  ;;  %v2974_v58 = vmul.f32 %v4733_v51, %v5809_v46  ;;  %4754 = vpow2.f32 %v2765_v44  ;;  %v2769_v59 = vmul.f32 1.442695, %v2668_v30  ;;  %v5873_v35 = vpop.f32.mrf.mxu1 }
 0x40f   : > { %v4737_v54 = vpop.eup %4736  ;;  %4756 = vrcp.f32 %v5870_v49  ;;  %v5876_v60 = vadd.f32 1.0, %v4735_v14  ;;  %v2667_v62 = vsub.f32 0.0, %v2603_v28  ;;  %v2670_v15 = vsub.f32 0.0, %v2606_v53 }
 0x410   : > { %v4739_v18 = vpop.eup %4738  ;;  %v3099_v47 = vmul.f32 %v4729_v50, %v3035_v56  ;;  %v3038_v1 = vsub.f32 2.0, %v2974_v58  ;;  %v2973_v3 = vmul.f32 %v4737_v54, %v5819_v55  ;;  %4758 = vpow2.f32 %v2763_v52  ;;  %v5879_v4 = vpop.f32.mrf.mxu1 }
 0x411   : > { %v4741_v46 = vpop.eup %4740  ;;  %4760 = vrcp.f32 %v5876_v60  ;;  %v5882_v45 = vadd.f32 1.0, %v4739_v18  ;;  %v2767_v6 = vmul.f32 1.442695, %v2667_v62  ;;  %v2773_v9 = vmul.f32 1.442695, %v2670_v15 }
 0x412   : > { %v4743_v10 = vpop.eup %4742  ;;  %3164 = vst.msk [vmem:[%s5698_s29 + $0xa0] sm:$0xff] %vm3143_vm0, %v3099_v47  ;;  %v3102_v13 = vmul.f32 %v4733_v51, %v3038_v1  ;;  %v3037_v12 = vsub.f32 2.0, %v2973_v3  ;;  %v2976_v19 = vmul.f32 %v4741_v46, %v5823_v37  ;;  %4762 = vpow2.f32 %v2769_v59  ;;  %v5887_v55 = vpop.f32.mrf.mxu1 }
 0x413   : > { %v4745_v41 = vpop.eup %4744  ;;  %4764 = vrcp.f32 %v5882_v45  ;;  %v5890_v57 = vadd.f32 1.0, %v4743_v10  ;;  %v2439_v8 = vadd.f32 %v5636_v22, %v5827_v63  ;;  %v2454_v61 = vadd.f32 %v5835_v36, %v5636_v22 }
 0x414   : > { %v4747_v23 = vpop.eup %4746  ;;  %3167 = vst.msk [vmem:[%s5698_s29 + $0xb8] sm:$0xff] %vm3143_vm0, %v3102_v13  ;;  %v3101_v24 = vmul.f32 %v4737_v54, %v3037_v12  ;;  %v3040_v37 = vsub.f32 2.0, %v2976_v19  ;;  %v5898_v25 = vadd.f32 1.0, %v4745_v41  ;;  %4766 = vpow2.f32 %v2767_v6  ;;  %v5900_v26 = vpop.f32.mrf.mxu1 }
 0x415   : > { %v2975_v0 = vmul.f32 %v4747_v23, %v5839_v16  ;;  %4768 = vrcp.f32 %v5890_v57  ;;  %v2605_v27 = vmax.f32 %v2439_v8, -30.0  ;;  %v2608_v63 = vmax.f32 %v2454_v61, -30.0 }
 0x416   : > { %3166 = vst.msk [vmem:[%s5698_s29 + $0xb0] sm:$0xff] %vm3143_vm0, %v3101_v24  ;;  %v3104_v36 = vmul.f32 %v4741_v46, %v3040_v37  ;;  %4770 = vrcp.f32 %v5898_v25  ;;  %v2449_v29 = vadd.f32 %v5636_v22, %v5843_v21  ;;  %v2464_v20 = vadd.f32 %v5853_v31, %v5636_v22  ;;  %v5911_v32 = vpop.f32.mrf.mxu1  ;;  %v5943_v46 = vld [vmem:[%s6356_s1 + $0x228] ss:$0 sm:$0xff] }
 0x417   : > { %v4749_v34 = vpop.eup %4748  ;;  %v3039_v16 = vsub.f32 2.0, %v2975_v0  ;;  %4772 = vpow2.f32 %v2773_v9  ;;  %v2669_v11 = vsub.f32 0.0, %v2605_v27  ;;  %v2672_v5 = vsub.f32 0.0, %v2608_v63 }
 0x418   : > { %v4751_v17 = vpop.eup %4750  ;;  %3169 = vst.msk [vmem:[%s5698_s29 + $0xc8] sm:$0xff] %vm3143_vm0, %v3104_v36  ;;  %v5915_v2 = vadd.f32 1.0, %v4749_v34  ;;  %v2607_v50 = vmax.f32 %v2449_v29, -30.0  ;;  %v2610_v39 = vmax.f32 %v2464_v20, -30.0  ;;  %v2459_v21 = vadd.f32 %v5636_v22, %v5861_v38  ;;  %v5919_v40 = vpop.f32.mrf.mxu1 }
 0x419   : > { %v4753_v31 = vpop.eup %4752  ;;  %v3103_v42 = vmul.f32 %v4747_v23, %v3039_v16  ;;  %v2978_v43 = vmul.f32 %v4751_v17, %v5855_v33  ;;  %v2771_v7 = vmul.f32 1.442695, %v2669_v11  ;;  %v2777_v44 = vmul.f32 1.442695, %v2672_v5 }
 0x41a   : > { %4774 = vrcp.f32 %v5915_v2  ;;  %v5923_v30 = vadd.f32 1.0, %v4753_v31  ;;  %v2671_v51 = vsub.f32 0.0, %v2607_v50  ;;  %v2674_v52 = vsub.f32 0.0, %v2610_v39  ;;  %v5925_v28 = vpop.f32.mrf.mxu1 }
 0x41b   : > { %v4755_v53 = vpop.eup %4754  ;;  %3168 = vst.msk [vmem:[%s5698_s29 + $0xc0] sm:$0xff] %vm3143_vm0, %v3103_v42  ;;  %v3042_v38 = vsub.f32 2.0, %v2978_v43  ;;  %4776 = vpow2.f32 %v2771_v7  ;;  %v2609_v14 = vmax.f32 %v2459_v21, -30.0  ;;  %v2474_v56 = vadd.f32 %v5866_v48, %v5636_v22 }
 0x41c   : > { %v4757_v33 = vpop.eup %4756  ;;  %4778 = vrcp.f32 %v5923_v30  ;;  %v5932_v58 = vadd.f32 1.0, %v4755_v53  ;;  %v2775_v59 = vmul.f32 1.442695, %v2671_v51  ;;  %v2781_v54 = vmul.f32 1.442695, %v2674_v52  ;;  %v5934_v62 = vpop.f32.mrf.mxu1 }
 0x41d   : > { %v4759_v15 = vpop.eup %4758  ;;  %v3106_v18 = vmul.f32 %v4751_v17, %v3042_v38  ;;  %v2977_v47 = vmul.f32 %v4757_v33, %v5870_v49  ;;  %4780 = vpow2.f32 %v2777_v44  ;;  %v2673_v1 = vsub.f32 0.0, %v2609_v14 }
 0x41e   : > { %v4761_v3 = vpop.eup %4760  ;;  %4782 = vrcp.f32 %v5932_v58  ;;  %v5938_v22 = vadd.f32 1.0, %v4759_v15  ;;  %v2612_v48 = vmax.f32 %v2474_v56, -30.0  ;;  %v2469_v6 = vadd.f32 %v5943_v46, %v5873_v35  ;;  %v5947_v9 = vpop.f32.mrf.mxu1 }
 0x41f   : > { %v4763_v10 = vpop.eup %4762  ;;  %3171 = vst.msk [vmem:[%s5698_s29 + $0xd8] sm:$0xff] %vm3143_vm0, %v3106_v18  ;;  %v3041_v49 = vsub.f32 2.0, %v2977_v47  ;;  %v2980_v13 = vmul.f32 %v4761_v3, %v5876_v60  ;;  %4784 = vpow2.f32 %v2775_v59  ;;  %v2779_v12 = vmul.f32 1.442695, %v2673_v1 }
 0x420   : > { %v4765_v19 = vpop.eup %4764  ;;  %4786 = vrcp.f32 %v5938_v22  ;;  %v5953_v41 = vadd.f32 1.0, %v4763_v10  ;;  %v2676_v8 = vsub.f32 0.0, %v2612_v48  ;;  %v2611_v61 = vmax.f32 %v2469_v6, -30.0  ;;  %v5959_v36 = vpop.f32.mrf.mxu1 }
 0x421   : > { %v4767_v23 = vpop.eup %4766  ;;  %v3105_v35 = vmul.f32 %v4757_v33, %v3041_v49  ;;  %v3044_v24 = vsub.f32 2.0, %v2980_v13  ;;  %v2979_v37 = vmul.f32 %v4765_v19, %v5882_v45  ;;  %4788 = vpow2.f32 %v2781_v54 }
 0x422   : > { %v4769_v0 = vpop.eup %4768  ;;  %4790 = vrcp.f32 %v5953_v41  ;;  %v5957_v60 = vadd.f32 1.0, %v4767_v23  ;;  %v2785_v27 = vmul.f32 1.442695, %v2676_v8  ;;  %v2675_v63 = vsub.f32 0.0, %v2611_v61  ;;  %v5974_v42 = vpop.f32.mrf.mxu1 }
 0x423   : > { %v4771_v29 = vpop.eup %4770  ;;  %3170 = vst.msk [vmem:[%s5698_s29 + $0xd0] sm:$0xff] %vm3143_vm0, %v3105_v35  ;;  %v3108_v20 = vmul.f32 %v4761_v3, %v3044_v24  ;;  %v3043_v34 = vsub.f32 2.0, %v2979_v37  ;;  %v2982_v16 = vmul.f32 %v4769_v0, %v5890_v57  ;;  %4792 = vpow2.f32 %v2779_v12 }
 0x424   : > { %v4773_v45 = vpop.eup %4772  ;;  %v2981_v11 = vmul.f32 %v4771_v29, %v5898_v25  ;;  %4794 = vrcp.f32 %v5957_v60  ;;  %v2783_v5 = vmul.f32 1.442695, %v2675_v63  ;;  %v2484_v17 = vadd.f32 %v5943_v46, %v5879_v4  ;;  %v5993_v47 = vpop.f32.mrf.mxu1 }
 0x425   : > { %3173 = vst.msk [vmem:[%s5698_s29 + $0xe8] sm:$0xff] %vm3143_vm0, %v3108_v20  ;;  %v3107_v50 = vmul.f32 %v4765_v19, %v3043_v34  ;;  %v3046_v39 = vsub.f32 2.0, %v2982_v16  ;;  %v5970_v21 = vadd.f32 1.0, %v4773_v45  ;;  %4796 = vpow2.f32 %v2785_v27 }
 0x426   : > { %v3045_v31 = vsub.f32 2.0, %v2981_v11  ;;  %4798 = vpow2.f32 %v2783_v5  ;;  %v2614_v57 = vmax.f32 %v2484_v17, -30.0  ;;  %v2479_v25 = vadd.f32 %v5943_v46, %v5887_v55 }
 0x427   : > { %v4775_v43 = vpop.eup %4774  ;;  %3172 = vst.msk [vmem:[%s5698_s29 + $0xe0] sm:$0xff] %vm3143_vm0, %v3107_v50  ;;  %v3110_v4 = vmul.f32 %v4769_v0, %v3046_v39  ;;  %4800 = vrcp.f32 %v5970_v21  ;;  %v2494_v7 = vadd.f32 %v5943_v46, %v5900_v26  ;;  %v2489_v44 = vadd.f32 %v5943_v46, %v5911_v32  ;;  %v6005_v0 = vpop.f32.mrf.mxu1 }
 0x428   : > { %v4777_v51 = vpop.eup %4776  ;;  %v3109_v52 = vmul.f32 %v4771_v29, %v3045_v31  ;;  %v2984_v53 = vmul.f32 %v4775_v43, %v5915_v2  ;;  %v2678_v55 = vsub.f32 0.0, %v2614_v57  ;;  %v2613_v38 = vmax.f32 %v2479_v25, -30.0 }
 0x429   : > { %v4779_v14 = vpop.eup %4778  ;;  %3175 = vst.msk [vmem:[%s5698_s29 + $0xf8] sm:$0xff] %vm3143_vm0, %v3110_v4  ;;  %v5986_v56 = vadd.f32 1.0, %v4777_v51  ;;  %v2616_v33 = vmax.f32 %v2494_v7, -30.0  ;;  %v2615_v59 = vmax.f32 %v2489_v44, -30.0  ;;  %v2504_v54 = vadd.f32 %v5943_v46, %v5919_v40  ;;  %v6021_v57 = vpop.f32.mrf.mxu1 }
 0x42a   : > { %v4781_v26 = vpop.eup %4780  ;;  %3174 = vst.msk [vmem:[%s5698_s29 + $0xf0] sm:$0xff] %vm3143_vm0, %v3109_v52  ;;  %v3048_v32 = vsub.f32 2.0, %v2984_v53  ;;  %v2983_v15 = vmul.f32 %v4779_v14, %v5923_v30  ;;  %v2789_v18 = vmul.f32 1.442695, %v2678_v55  ;;  %v2677_v2 = vsub.f32 0.0, %v2613_v38 }
 0x42b   : > { %v4783_v1 = vpop.eup %4782  ;;  %4802 = vrcp.f32 %v5986_v56  ;;  %v5996_v3 = vadd.f32 1.0, %v4781_v26  ;;  %v2680_v48 = vsub.f32 0.0, %v2616_v33  ;;  %v2679_v6 = vsub.f32 0.0, %v2615_v59  ;;  %v6041_v59 = vpop.f32.mrf.mxu1 }
 0x42c   : > { %v4785_v10 = vpop.eup %4784  ;;  %v3112_v40 = vmul.f32 %v4775_v43, %v3048_v32  ;;  %v3047_v49 = vsub.f32 2.0, %v2983_v15  ;;  %v2986_v13 = vmul.f32 %v4783_v1, %v5932_v58  ;;  %4804 = vpow2.f32 %v2789_v18 }
 0x42d   : > { %v4787_v12 = vpop.eup %4786  ;;  %4806 = vrcp.f32 %v5996_v3  ;;  %v6000_v30 = vadd.f32 1.0, %v4785_v10  ;;  %v2787_v19 = vmul.f32 1.442695, %v2677_v2  ;;  %v2793_v8 = vmul.f32 1.442695, %v2680_v48 }
 0x42e   : > { %v4789_v61 = vpop.eup %4788  ;;  %3177 = vst.msk [vmem:[%s5698_s29 + $0x108] sm:$0xff] %vm3143_vm0, %v3112_v40  ;;  %v3111_v23 = vmul.f32 %v4779_v14, %v3047_v49  ;;  %v3050_v35 = vsub.f32 2.0, %v2986_v13  ;;  %v2985_v24 = vmul.f32 %v4787_v12, %v5938_v22  ;;  %v2791_v37 = vmul.f32 1.442695, %v2679_v6  ;;  %v6052_v13 = vpop.f32.mrf.mxu1 }
 0x42f   : > { %v4791_v58 = vpop.eup %4790  ;;  %4808 = vrcp.f32 %v6000_v30  ;;  %v6008_v27 = vadd.f32 1.0, %v4789_v61  ;;  %v2618_v63 = vmax.f32 %v2504_v54, -30.0  ;;  %v2499_v29 = vadd.f32 %v5943_v46, %v5925_v28 }
 0x430   : > { %v4793_v20 = vpop.eup %4792  ;;  %3176 = vst.msk [vmem:[%s5698_s29 + $0x100] sm:$0xff] %vm3143_vm0, %v3111_v23  ;;  %v3114_v34 = vmul.f32 %v4783_v1, %v3050_v35  ;;  %v3049_v16 = vsub.f32 2.0, %v2985_v24  ;;  %v2988_v22 = vmul.f32 %v4791_v58, %v5953_v41  ;;  %4810 = vpow2.f32 %v2787_v19 }
 0x431   : > { %v4795_v45 = vpop.eup %4794  ;;  %4812 = vrcp.f32 %v6008_v27  ;;  %v6016_v11 = vadd.f32 1.0, %v4793_v20  ;;  %v2682_v5 = vsub.f32 0.0, %v2618_v63  ;;  %v2617_v17 = vmax.f32 %v2499_v29, -30.0 }
 0x432   : > { %v4797_v50 = vpop.eup %4796  ;;  %3179 = vst.msk [vmem:[%s5698_s29 + $0x118] sm:$0xff] %vm3143_vm0, %v3114_v34  ;;  %v3113_v28 = vmul.f32 %v4787_v12, %v3049_v16  ;;  %v3052_v39 = vsub.f32 2.0, %v2988_v22  ;;  %v2987_v31 = vmul.f32 %v4795_v45, %v5957_v60  ;;  %4814 = vpow2.f32 %v2793_v8  ;;  %v2548_v16 = vpop.f32.mrf.mxu1 }
 0x433   : > { %v4799_v41 = vpop.eup %4798  ;;  %4816 = vrcp.f32 %v6016_v11  ;;  %v6024_v25 = vadd.f32 1.0, %v4797_v50  ;;  %v2797_v43 = vmul.f32 1.442695, %v2682_v5  ;;  %v2681_v4 = vsub.f32 0.0, %v2617_v17 }
 0x434   : > { %v4801_v7 = vpop.eup %4800  ;;  %3178 = vst.msk [vmem:[%s5698_s29 + $0x110] sm:$0xff] %vm3143_vm0, %v3113_v28  ;;  %v3116_v44 = vmul.f32 %v4791_v58, %v3052_v39  ;;  %v3051_v51 = vsub.f32 2.0, %v2987_v31  ;;  %v6028_v52 = vadd.f32 1.0, %v4799_v41  ;;  %4818 = vpow2.f32 %v2791_v37 }
 0x435   : > { %v2990_v60 = vmul.f32 %v4801_v7, %v5970_v21  ;;  %4820 = vrcp.f32 %v6024_v25  ;;  %v2795_v53 = vmul.f32 1.442695, %v2681_v4  ;;  %v2514_v55 = vadd.f32 %v5943_v46, %v5934_v62 }
 0x436   : > { %3181 = vst.msk [vmem:[%s5698_s29 + $0x128] sm:$0xff] %vm3143_vm0, %v3116_v44  ;;  %v3115_v38 = vmul.f32 %v4795_v45, %v3051_v51  ;;  %4822 = vrcp.f32 %v6028_v52  ;;  %v2509_v14 = vadd.f32 %v5943_v46, %v5947_v9  ;;  %v2524_v33 = vadd.f32 %v5943_v46, %v5959_v36 }
 0x437   : > { %v3054_v21 = vsub.f32 2.0, %v2990_v60  ;;  %4824 = vpow2.f32 %v2797_v43  ;;  %v2620_v54 = vmax.f32 %v2514_v55, -30.0  ;;  %v2519_v26 = vadd.f32 %v5943_v46, %v5974_v42 }
 0x438   : > { %v4803_v62 = vpop.eup %4802  ;;  %3180 = vst.msk [vmem:[%s5698_s29 + $0x120] sm:$0xff] %vm3143_vm0, %v3115_v38  ;;  %4826 = vpow2.f32 %v2795_v53  ;;  %v2619_v32 = vmax.f32 %v2509_v14, -30.0  ;;  %v2622_v15 = vmax.f32 %v2524_v33, -30.0  ;;  %v2534_v9 = vadd.f32 %v5943_v46, %v5993_v47 }
 0x439   : > { %v4805_v18 = vpop.eup %4804  ;;  %v3118_v36 = vmul.f32 %v4801_v7, %v3054_v21  ;;  %v2989_v2 = vmul.f32 %v4803_v62, %v5986_v56  ;;  %v2684_v1 = vsub.f32 0.0, %v2620_v54  ;;  %v2621_v48 = vmax.f32 %v2519_v26, -30.0 }
 0x43a   : > { %v4807_v6 = vpop.eup %4806  ;;  %v6050_v10 = vadd.f32 1.0, %v4805_v18  ;;  %v2683_v42 = vsub.f32 0.0, %v2619_v32  ;;  %v2686_v40 = vsub.f32 0.0, %v2622_v15  ;;  %v2624_v49 = vmax.f32 %v2534_v9, -30.0 }
 0x43b   : > { %3183 = vst.msk [vmem:[%s5698_s29 + $0x138] sm:$0xff] %vm3143_vm0, %v3118_v36  ;;  %v3053_v12 = vsub.f32 2.0, %v2989_v2  ;;  %v2992_v19 = vmul.f32 %v4807_v6, %v5996_v3  ;;  %v2801_v47 = vmul.f32 1.442695, %v2684_v1  ;;  %v2685_v8 = vsub.f32 0.0, %v2621_v48 }
 0x43c   : > { %v4809_v61 = vpop.eup %4808  ;;  %4828 = vrcp.f32 %v6050_v10  ;;  %v2799_v56 = vmul.f32 1.442695, %v2683_v42  ;;  %v2805_v23 = vmul.f32 1.442695, %v2686_v40  ;;  %v2688_v35 = vsub.f32 0.0, %v2624_v49 }
 0x43d   : > { %v4811_v24 = vpop.eup %4810  ;;  %v3117_v37 = vmul.f32 %v4803_v62, %v3053_v12  ;;  %v3056_v58 = vsub.f32 2.0, %v2992_v19  ;;  %v2991_v63 = vmul.f32 %v4809_v61, %v6000_v30  ;;  %4830 = vpow2.f32 %v2801_v47 }
 0x43e   : > { %v4813_v29 = vpop.eup %4812  ;;  %v6059_v20 = vadd.f32 1.0, %v4811_v24  ;;  %4832 = vpow2.f32 %v2799_v56  ;;  %v2803_v3 = vmul.f32 1.442695, %v2685_v8  ;;  %v2809_v34 = vmul.f32 1.442695, %v2688_v35 }
 0x43f   : > { %v4815_v22 = vpop.eup %4814  ;;  %3182 = vst.msk [vmem:[%s5698_s29 + $0x130] sm:$0xff] %vm3143_vm0, %v3117_v37  ;;  %v3120_v45 = vmul.f32 %v4807_v6, %v3056_v58  ;;  %v3055_v5 = vsub.f32 2.0, %v2991_v63  ;;  %v2994_v17 = vmul.f32 %v4813_v29, %v6008_v27  ;;  %4834 = vpow2.f32 %v2805_v23 }
 0x440   : > { %v4817_v50 = vpop.eup %4816  ;;  %4836 = vrcp.f32 %v6059_v20  ;;  %v6065_v30 = vadd.f32 1.0, %v4815_v22  ;;  %v2529_v28 = vadd.f32 %v5943_v46, %v6005_v0  ;;  %v2544_v39 = vadd.f32 %v5943_v46, %v6021_v57  ;;  %v4540_v0 = vpop.f32.mrf.mxu1 }
 0x441   : > { %v4819_v31 = vpop.eup %4818  ;;  %3185 = vst.msk [vmem:[%s5698_s29 + $0x148] sm:$0xff] %vm3143_vm0, %v3120_v45  ;;  %v3119_v41 = vmul.f32 %v4809_v61, %v3055_v5  ;;  %v3058_v43 = vsub.f32 2.0, %v2994_v17  ;;  %v2993_v27 = vmul.f32 %v4817_v50, %v6016_v11  ;;  %4838 = vpow2.f32 %v2803_v3 }
 0x442   : > { %v4821_v4 = vpop.eup %4820  ;;  %4840 = vrcp.f32 %v6065_v30  ;;  %v6075_v7 = vadd.f32 1.0, %v4819_v31  ;;  %v2623_v44 = vmax.f32 %v2529_v28, -30.0  ;;  %v2626_v51 = vmax.f32 %v2544_v39, -30.0  ;;  %v2558_v18 = vpop.f32.mrf.mxu1 }
 0x443   : > { %v4823_v60 = vpop.eup %4822  ;;  %3184 = vst.msk [vmem:[%s5698_s29 + $0x140] sm:$0xff] %vm3143_vm0, %v3119_v41  ;;  %v3122_v57 = vmul.f32 %v4813_v29, %v3058_v43  ;;  %v3057_v53 = vsub.f32 2.0, %v2993_v27  ;;  %v2996_v55 = vmul.f32 %v4821_v4, %v6024_v25  ;;  %4842 = vpow2.f32 %v2809_v34 }
 0x444   : > { %v4825_v38 = vpop.eup %4824  ;;  %v2995_v11 = vmul.f32 %v4823_v60, %v6028_v52  ;;  %4844 = vrcp.f32 %v6075_v7  ;;  %v2687_v14 = vsub.f32 0.0, %v2623_v44  ;;  %v2690_v33 = vsub.f32 0.0, %v2626_v51 }
 0x445   : > { %v4827_v21 = vpop.eup %4826  ;;  %3187 = vst.msk [vmem:[%s5698_s29 + $0x158] sm:$0xff] %vm3143_vm0, %v3122_v57  ;;  %v3121_v54 = vmul.f32 %v4817_v50, %v3057_v53  ;;  %v3060_v26 = vsub.f32 2.0, %v2996_v55  ;;  %v6084_v62 = vadd.f32 1.0, %v4825_v38  ;;  %v2539_v32 = vadd.f32 %v5943_v46, %v6041_v59 }
 0x446   : > { %v3059_v25 = vsub.f32 2.0, %v2995_v11  ;;  %v6088_v15 = vadd.f32 1.0, %v4827_v21  ;;  %v2807_v9 = vmul.f32 1.442695, %v2687_v14  ;;  %v2813_v52 = vmul.f32 1.442695, %v2690_v33 }
 0x447   : > { %3186 = vst.msk [vmem:[%s5698_s29 + $0x150] sm:$0xff] %vm3143_vm0, %v3121_v54  ;;  %v3124_v36 = vmul.f32 %v4821_v4, %v3060_v26  ;;  %4846 = vrcp.f32 %v6084_v62  ;;  %v2625_v2 = vmax.f32 %v2539_v32, -30.0  ;;  %v2554_v1 = vadd.f32 %v5943_v46, %v6052_v13 }
 0x448   : > { %v3123_v48 = vmul.f32 %v4823_v60, %v3059_v25  ;;  %4848 = vrcp.f32 %v6088_v15  ;;  %v2549_v59 = vadd.f32 %v5943_v46, %v2548_v16  ;;  %v2564_v6 = vadd.f32 %v5943_v46, %v4540_v0 }
 0x449   : > { %v4829_v42 = vpop.eup %4828  ;;  %3189 = vst.msk [vmem:[%s5698_s29 + $0x168] sm:$0xff] %vm3143_vm0, %v3124_v36  ;;  %4850 = vpow2.f32 %v2807_v9  ;;  %v2689_v40 = vsub.f32 0.0, %v2625_v2  ;;  %v2628_v49 = vmax.f32 %v2554_v1, -30.0  ;;  %v2559_v12 = vadd.f32 %v5943_v46, %v2558_v18 }
 0x44a   : > { %v4831_v19 = vpop.eup %4830  ;;  %3188 = vst.msk [vmem:[%s5698_s29 + $0x160] sm:$0xff] %vm3143_vm0, %v3123_v48  ;;  %v2998_v13 = vmul.f32 %v4829_v42, %v6050_v10  ;;  %4852 = vpow2.f32 %v2813_v52  ;;  %v2627_v47 = vmax.f32 %v2549_v59, -30.0  ;;  %v2630_v8 = vmax.f32 %v2564_v6, -30.0 }
 0x44b   : > { %v4833_v61 = vpop.eup %4832  ;;  %v6104_v56 = vadd.f32 1.0, %v4831_v19  ;;  %v2692_v23 = vsub.f32 0.0, %v2628_v49  ;;  %v2629_v35 = vmax.f32 %v2559_v12, -30.0  ;;  %v2811_v63 = vmul.f32 1.442695, %v2689_v40 }
 0x44c   : > { %v4835_v24 = vpop.eup %4834  ;;  %v3062_v37 = vsub.f32 2.0, %v2998_v13  ;;  %v2875_v58 = vadd.f32 1.0, %v4833_v61  ;;  %v2691_v29 = vsub.f32 0.0, %v2627_v47  ;;  %v2694_v34 = vsub.f32 0.0, %v2630_v8 }
 0x44d   : > { %v4837_v46 = vpop.eup %4836  ;;  %4854 = vrcp.f32 %v6104_v56  ;;  %v2878_v3 = vadd.f32 1.0, %v4835_v24  ;;  %v2693_v10 = vsub.f32 0.0, %v2629_v35  ;;  %v2817_v5 = vmul.f32 1.442695, %v2692_v23 }
 0x44e   : > { %v4839_v16 = vpop.eup %4838  ;;  %v3126_v22 = vmul.f32 %v4829_v42, %v3062_v37  ;;  %v2997_v45 = vmul.f32 %v4837_v46, %v6059_v20  ;;  %4856 = vrcp.f32 %v2875_v58  ;;  %v2815_v41 = vmul.f32 1.442695, %v2691_v29 }
 0x44f   : > { %v4841_v17 = vpop.eup %4840  ;;  %4858 = vrcp.f32 %v2878_v3  ;;  %v2877_v50 = vadd.f32 1.0, %v4839_v16  ;;  %v2821_v4 = vmul.f32 1.442695, %v2694_v34  ;;  %v2819_v20 = vmul.f32 1.442695, %v2693_v10 }
 0x450   : > { %v4843_v28 = vpop.eup %4842  ;;  %3191 = vst.msk [vmem:[%s5698_s29 + $0x178] sm:$0xff] %vm3143_vm0, %v3126_v22  ;;  %v3061_v39 = vsub.f32 2.0, %v2997_v45  ;;  %v3000_v31 = vmul.f32 %v4841_v17, %v6065_v30  ;;  %4860 = vpow2.f32 %v2811_v63 }
 0x451   : > { %v4845_v43 = vpop.eup %4844  ;;  %4862 = vrcp.f32 %v2877_v50  ;;  %v2880_v27 = vadd.f32 1.0, %v4843_v28 }
 0x452   : > { %v3125_v44 = vmul.f32 %v4837_v46, %v3061_v39  ;;  %v3064_v51 = vsub.f32 2.0, %v3000_v31  ;;  %v2999_v0 = vmul.f32 %v4845_v43, %v6075_v7  ;;  %4864 = vpow2.f32 %v2817_v5 }
 0x453   : > { %4866 = vrcp.f32 %v2880_v27 }
 0x454   : > { %v4847_v60 = vpop.eup %4846  ;;  %3190 = vst.msk [vmem:[%s5698_s29 + $0x170] sm:$0xff] %vm3143_vm0, %v3125_v44  ;;  %v3128_v57 = vmul.f32 %v4841_v17, %v3064_v51  ;;  %v3063_v30 = vsub.f32 2.0, %v2999_v0  ;;  %4868 = vpow2.f32 %v2815_v41 }
 0x455   : > { %v4849_v53 = vpop.eup %4848  ;;  %v3002_v55 = vmul.f32 %v4847_v60, %v6084_v62  ;;  %4870 = vpow2.f32 %v2821_v4 }
 0x456   : > { %v4851_v38 = vpop.eup %4850  ;;  %3193 = vst.msk [vmem:[%s5698_s29 + $0x188] sm:$0xff] %vm3143_vm0, %v3128_v57  ;;  %v3127_v11 = vmul.f32 %v4845_v43, %v3063_v30  ;;  %v3001_v7 = vmul.f32 %v4849_v53, %v6088_v15  ;;  %4872 = vpow2.f32 %v2819_v20 }
 0x457   : > { %v4853_v14 = vpop.eup %4852  ;;  %v3066_v33 = vsub.f32 2.0, %v3002_v55  ;;  %v2879_v21 = vadd.f32 1.0, %v4851_v38 }
 0x458   : > { %3192 = vst.msk [vmem:[%s5698_s29 + $0x180] sm:$0xff] %vm3143_vm0, %v3127_v11  ;;  %v3065_v54 = vsub.f32 2.0, %v3001_v7  ;;  %v2882_v26 = vadd.f32 1.0, %v4853_v14 }
 0x459   : > { %v3130_v32 = vmul.f32 %v4847_v60, %v3066_v33  ;;  %4874 = vrcp.f32 %v2879_v21 }
 0x45a   : > { %v4855_v62 = vpop.eup %4854  ;;  %v3129_v25 = vmul.f32 %v4849_v53, %v3065_v54  ;;  %4876 = vrcp.f32 %v2882_v26 }
 0x45b   : > { %v4857_v9 = vpop.eup %4856  ;;  %3195 = vst.msk [vmem:[%s5698_s29 + $0x198] sm:$0xff] %vm3143_vm0, %v3130_v32  ;;  %v3004_v52 = vmul.f32 %v4855_v62, %v6104_v56 }
 0x45c   : > { %v4859_v15 = vpop.eup %4858  ;;  %3194 = vst.msk [vmem:[%s5698_s29 + $0x190] sm:$0xff] %vm3143_vm0, %v3129_v25  ;;  %v3003_v18 = vmul.f32 %v4857_v9, %v2875_v58 }
 0x45d   : > { %v4861_v36 = vpop.eup %4860  ;;  %v3068_v2 = vsub.f32 2.0, %v3004_v52  ;;  %v3006_v1 = vmul.f32 %v4859_v15, %v2878_v3 }
 0x45e   : > { %v4863_v48 = vpop.eup %4862  ;;  %v3067_v59 = vsub.f32 2.0, %v3003_v18  ;;  %v2881_v6 = vadd.f32 1.0, %v4861_v36 }
 0x45f   : > { %v4865_v42 = vpop.eup %4864  ;;  %v3132_v40 = vmul.f32 %v4855_v62, %v3068_v2  ;;  %v3070_v49 = vsub.f32 2.0, %v3006_v1  ;;  %v3005_v12 = vmul.f32 %v4863_v48, %v2877_v50 }
 0x460   : > { %v4867_v19 = vpop.eup %4866  ;;  %v3131_v13 = vmul.f32 %v4857_v9, %v3067_v59  ;;  %4878 = vrcp.f32 %v2881_v6  ;;  %v2884_v47 = vadd.f32 1.0, %v4865_v42 }
 0x461   : > { %v4869_v8 = vpop.eup %4868  ;;  %3197 = vst.msk [vmem:[%s5698_s29 + $0x1a8] sm:$0xff] %vm3143_vm0, %v3132_v40  ;;  %v3134_v61 = vmul.f32 %v4859_v15, %v3070_v49  ;;  %v3069_v56 = vsub.f32 2.0, %v3005_v12  ;;  %v3008_v23 = vmul.f32 %v4867_v19, %v2880_v27 }
 0x462   : > { %v4871_v35 = vpop.eup %4870  ;;  %3196 = vst.msk [vmem:[%s5698_s29 + $0x1a0] sm:$0xff] %vm3143_vm0, %v3131_v13  ;;  %4880 = vrcp.f32 %v2884_v47  ;;  %v2883_v24 = vadd.f32 1.0, %v4869_v8 }
 0x463   : > { %v4873_v37 = vpop.eup %4872  ;;  %3199 = vst.msk [vmem:[%s5698_s29 + $0x1b8] sm:$0xff] %vm3143_vm0, %v3134_v61  ;;  %v3133_v58 = vmul.f32 %v4863_v48, %v3069_v56  ;;  %v3072_v63 = vsub.f32 2.0, %v3008_v23  ;;  %v2886_v29 = vadd.f32 1.0, %v4871_v35 }
 0x464   : > { %4882 = vrcp.f32 %v2883_v24  ;;  %v2885_v46 = vadd.f32 1.0, %v4873_v37 }
 0x465   : > { %3198 = vst.msk [vmem:[%s5698_s29 + $0x1b0] sm:$0xff] %vm3143_vm0, %v3133_v58  ;;  %v3136_v3 = vmul.f32 %v4867_v19, %v3072_v63  ;;  %4884 = vrcp.f32 %v2886_v29 }
 0x466   : > { %v4875_v34 = vpop.eup %4874  ;;  %4886 = vrcp.f32 %v2885_v46 }
 0x467   : > { %v4877_v10 = vpop.eup %4876  ;;  %3201 = vst.msk [vmem:[%s5698_s29 + $0x1c8] sm:$0xff] %vm3143_vm0, %v3136_v3  ;;  %v3007_v16 = vmul.f32 %v4875_v34, %v2879_v21 }
 0x468   : > { %v3010_v22 = vmul.f32 %v4877_v10, %v2882_v26 }
 0x469   : > { %v3071_v45 = vsub.f32 2.0, %v3007_v16 }
 0x46a   : > { %v3074_v5 = vsub.f32 2.0, %v3010_v22 }
 0x46b   : > { %v3135_v17 = vmul.f32 %v4875_v34, %v3071_v45 }
 0x46c   : > { %v3138_v50 = vmul.f32 %v4877_v10, %v3074_v5 }
 0x46d   : > { %v4879_v28 = vpop.eup %4878  ;;  %3200 = vst.msk [vmem:[%s5698_s29 + $0x1c0] sm:$0xff] %vm3143_vm0, %v3135_v17 }
 0x46e   : > { %3203 = vst.msk [vmem:[%s5698_s29 + $0x1d8] sm:$0xff] %vm3143_vm0, %v3138_v50  ;;  %v3009_v39 = vmul.f32 %v4879_v28, %v2881_v6 }
 0x46f   : > { %v4881_v31 = vpop.eup %4880 }
 0x470   : > { %v3073_v41 = vsub.f32 2.0, %v3009_v39  ;;  %v3012_v43 = vmul.f32 %v4881_v31, %v2884_v47 }
 0x471   : > { %v4883_v27 = vpop.eup %4882 }
 0x472   : > { %v4885_v4 = vpop.eup %4884  ;;  %v3137_v20 = vmul.f32 %v4879_v28, %v3073_v41  ;;  %v3076_v44 = vsub.f32 2.0, %v3012_v43  ;;  %v3011_v51 = vmul.f32 %v4883_v27, %v2883_v24 }
 0x473   : > { %v4887_v0 = vpop.eup %4886  ;;  %v3014_v60 = vmul.f32 %v4885_v4, %v2886_v29 }
 0x474   : > { %3202 = vst.msk [vmem:[%s5698_s29 + $0x1d0] sm:$0xff] %vm3143_vm0, %v3137_v20  ;;  %v3140_v57 = vmul.f32 %v4881_v31, %v3076_v44  ;;  %v3075_v30 = vsub.f32 2.0, %v3011_v51  ;;  %v3013_v53 = vmul.f32 %v4887_v0, %v2885_v46 }
 0x475   : > { %v3078_v55 = vsub.f32 2.0, %v3014_v60 }
 0x476   : > { %3205 = vst.msk [vmem:[%s5698_s29 + $0x1e8] sm:$0xff] %vm3143_vm0, %v3140_v57  ;;  %v3139_v38 = vmul.f32 %v4883_v27, %v3075_v30  ;;  %v3077_v11 = vsub.f32 2.0, %v3013_v53  ;;  %3214 = sbr.rel (!%p5018_p4) target bundleno = 1211 (0x4bb), region = 32 }
 0x477   : > { %v3142_v7 = vmul.f32 %v4885_v4, %v3078_v55 }
 0x478   : > { %3204 = vst.msk [vmem:[%s5698_s29 + $0x1e0] sm:$0xff] %vm3143_vm0, %v3139_v38  ;;  %v3141_v14 = vmul.f32 %v4887_v0, %v3077_v11 }
 0x479   : > { %3207 = vst.msk [vmem:[%s5698_s29 + $0x1f8] sm:$0xff] %vm3143_vm0, %v3142_v7 }
 0x47a   : > { %3206 = vst.msk [vmem:[%s5698_s29 + $0x1f0] sm:$0xff] %vm3143_vm0, %v3141_v14 }
 0x47b   : > { %s6368_s21 = smov (!%p3217_p8, %s3216_s21), 64 }
 0x47c   : > { %s3691_s26 = sshll.u32 %s6368_s21, 7 }
 0x47d   : > { %p3694_p9 = scmp.eq.s32.totalorder %s3691_s26, 0 }
 0x47e   : > { %s6162_s27 = sshrl.u32 (!%p3694_p9), %s6368_s21, 6 }
 0x47f   : > { %3225 = sbr.rel (%p3694_p9) target bundleno = 1211 (0x4bb), region = 36  ;;  %p3695_p10 = scmp.le.s32.totalorder (!%p3694_p9), %s6162_s27, 0 }
 0x484   : > { %3632 = sbr.rel (%p3695_p10) target bundleno = 1194 (0x4aa), region = 112  ;;  %s6359_s12 = smov (!%p3695_p10), %s6156_s25 }
 0x485   : > { %s6360_s17 = smov (!%p3695_p10), %s5698_s29  ;;  %s6171_s18 = smov (!%p3695_p10), 0  }
 0x486   : > { %s6173_s28 = smov (!%p3695_p10), 0  }
 0x489 LB: >> { %v3414_v33 = vld [vmem:[%s4951_s17] sm:$0xff]  ;;  %v3416_v21 = vld [vmem:[%s4951_s17 + $0x8] sm:$0xff]  ;;  %v3418_v54 = vld [vmem:[%s4951_s17 + $0x10] sm:$0xff]  ;;  %s3542_s30 = sadd.s32 1, %s4955_s18  ;;  %s3408_s28 = sadd.s32 1, %s4959_s28   ;;  %s4959_s28 = sphi %s6173_s28, %s3408_s28   ;;  %s4955_s18 = sphi %s6171_s18, %s6363_s18   ;;  %s4951_s17 = sphi %s6360_s17, %s6362_s17   ;;  %s4947_s12 = sphi %s6359_s12, %s6361_s12  }
 0x48a   : >> { %3415 = vst [vmem:[%s4947_s12] sm:$0xff] %v3414_v33  ;;  %3417 = vst [vmem:[%s4947_s12 + $0x8] sm:$0xff] %v3416_v21  ;;  %v3420_v26 = vld [vmem:[%s4951_s17 + $0x18] sm:$0xff]  ;;  %v3422_v32 = vld [vmem:[%s4951_s17 + $0x20] sm:$0xff]  ;;  %p3543_p11 = scmp.ge.s32.totalorder %s3542_s30, %s6162_s27  ;;  %p3407_p12 = scmp.ge.s32.totalorder %s3408_s28, %s6162_s27 }
 0x48b   : >> { %3419 = vst [vmem:[%s4947_s12 + $0x10] sm:$0xff] %v3418_v54  ;;  %v3424_v62 = vld [vmem:[%s4951_s17 + $0x28] sm:$0xff]  ;;  %3421 = vst [vmem:[%s4947_s12 + $0x18] sm:$0xff] %v3420_v26  ;;  %v3426_v25 = vld [vmem:[%s4951_s17 + $0x30] sm:$0xff] }
 0x48c   : >> { %3423 = vst [vmem:[%s4947_s12 + $0x20] sm:$0xff] %v3422_v32  ;;  %3425 = vst [vmem:[%s4947_s12 + $0x28] sm:$0xff] %v3424_v62  ;;  %v3428_v9 = vld [vmem:[%s4951_s17 + $0x38] sm:$0xff]  ;;  %v3430_v52 = vld [vmem:[%s4951_s17 + $0x40] sm:$0xff]  ;;  %s6370_s30 = smov (%p3543_p11, %s3542_s30), 0 }
 0x48d   : >> { %3427 = vst [vmem:[%s4947_s12 + $0x30] sm:$0xff] %v3426_v25  ;;  %3429 = vst [vmem:[%s4947_s12 + $0x38] sm:$0xff] %v3428_v9  ;;  %v3432_v15 = vld [vmem:[%s4951_s17 + $0x48] sm:$0xff]  ;;  %v3434_v18 = vld [vmem:[%s4951_s17 + $0x50] sm:$0xff]  ;;  %s3696_s3 = sshll.u32 %s6370_s30, 9  ;;  %s6363_s18 = smov %s6370_s30 }
 0x48e   : >> { %3431 = vst [vmem:[%s4947_s12 + $0x40] sm:$0xff] %v3430_v52  ;;  %v3436_v36 = vld [vmem:[%s4951_s17 + $0x58] sm:$0xff]  ;;  %3433 = vst [vmem:[%s4947_s12 + $0x48] sm:$0xff] %v3432_v15  ;;  %v3438_v2 = vld [vmem:[%s4951_s17 + $0x60] sm:$0xff]  ;;  %s6229_s4 = scalar_lea.vmem %s5698_s29, %s3696_s3 [#allocation2]   ;;  %s6232_s5 = scalar_lea.vmem %s6156_s25, %s3696_s3  }
 0x48f   : >> { %3435 = vst [vmem:[%s4947_s12 + $0x50] sm:$0xff] %v3434_v18  ;;  %3437 = vst [vmem:[%s4947_s12 + $0x58] sm:$0xff] %v3436_v36  ;;  %v3440_v1 = vld [vmem:[%s4951_s17 + $0x68] sm:$0xff]  ;;  %v3442_v48 = vld [vmem:[%s4951_s17 + $0x70] sm:$0xff] }
 0x490   : >> { %3439 = vst [vmem:[%s4947_s12 + $0x60] sm:$0xff] %v3438_v2  ;;  %3441 = vst [vmem:[%s4947_s12 + $0x68] sm:$0xff] %v3440_v1  ;;  %v3444_v59 = vld [vmem:[%s4951_s17 + $0x78] sm:$0xff]  ;;  %v3446_v6 = vld [vmem:[%s4951_s17 + $0x80] sm:$0xff] }
 0x491   : >> { %3443 = vst [vmem:[%s4947_s12 + $0x70] sm:$0xff] %v3442_v48  ;;  %v3448_v42 = vld [vmem:[%s4951_s17 + $0x88] sm:$0xff]  ;;  %3445 = vst [vmem:[%s4947_s12 + $0x78] sm:$0xff] %v3444_v59  ;;  %v3450_v40 = vld [vmem:[%s4951_s17 + $0x90] sm:$0xff] }
 0x492   : >> { %3447 = vst [vmem:[%s4947_s12 + $0x80] sm:$0xff] %v3446_v6  ;;  %3449 = vst [vmem:[%s4947_s12 + $0x88] sm:$0xff] %v3448_v42  ;;  %v3452_v49 = vld [vmem:[%s4951_s17 + $0x98] sm:$0xff]  ;;  %v3454_v12 = vld [vmem:[%s4951_s17 + $0xa0] sm:$0xff] }
 0x493   : >> { %3451 = vst [vmem:[%s4947_s12 + $0x90] sm:$0xff] %v3450_v40  ;;  %3453 = vst [vmem:[%s4947_s12 + $0x98] sm:$0xff] %v3452_v49  ;;  %v3456_v19 = vld [vmem:[%s4951_s17 + $0xa8] sm:$0xff]  ;;  %v3458_v13 = vld [vmem:[%s4951_s17 + $0xb0] sm:$0xff] }
 0x494   : >> { %3455 = vst [vmem:[%s4947_s12 + $0xa0] sm:$0xff] %v3454_v12  ;;  %v3460_v47 = vld [vmem:[%s4951_s17 + $0xb8] sm:$0xff]  ;;  %3457 = vst [vmem:[%s4947_s12 + $0xa8] sm:$0xff] %v3456_v19  ;;  %v3462_v8 = vld [vmem:[%s4951_s17 + $0xc0] sm:$0xff] }
 0x495   : >> { %3459 = vst [vmem:[%s4947_s12 + $0xb0] sm:$0xff] %v3458_v13  ;;  %3461 = vst [vmem:[%s4947_s12 + $0xb8] sm:$0xff] %v3460_v47  ;;  %v3464_v61 = vld [vmem:[%s4951_s17 + $0xc8] sm:$0xff]  ;;  %v3466_v56 = vld [vmem:[%s4951_s17 + $0xd0] sm:$0xff] }
 0x496   : >> { %3463 = vst [vmem:[%s4947_s12 + $0xc0] sm:$0xff] %v3462_v8  ;;  %3465 = vst [vmem:[%s4947_s12 + $0xc8] sm:$0xff] %v3464_v61  ;;  %v3468_v23 = vld [vmem:[%s4951_s17 + $0xd8] sm:$0xff]  ;;  %v3470_v35 = vld [vmem:[%s4951_s17 + $0xe0] sm:$0xff] }
 0x497   : >> { %3467 = vst [vmem:[%s4947_s12 + $0xd0] sm:$0xff] %v3466_v56  ;;  %v3472_v24 = vld [vmem:[%s4951_s17 + $0xe8] sm:$0xff]  ;;  %3469 = vst [vmem:[%s4947_s12 + $0xd8] sm:$0xff] %v3468_v23  ;;  %v3474_v37 = vld [vmem:[%s4951_s17 + $0xf0] sm:$0xff] }
 0x498   : >> { %3471 = vst [vmem:[%s4947_s12 + $0xe0] sm:$0xff] %v3470_v35  ;;  %3473 = vst [vmem:[%s4947_s12 + $0xe8] sm:$0xff] %v3472_v24  ;;  %v3476_v58 = vld [vmem:[%s4951_s17 + $0xf8] sm:$0xff]  ;;  %v3478_v63 = vld [vmem:[%s4951_s17 + $0x100] sm:$0xff] }
 0x499   : >> { %3475 = vst [vmem:[%s4947_s12 + $0xf0] sm:$0xff] %v3474_v37  ;;  %3477 = vst [vmem:[%s4947_s12 + $0xf8] sm:$0xff] %v3476_v58  ;;  %v3480_v29 = vld [vmem:[%s4951_s17 + $0x108] sm:$0xff]  ;;  %v3482_v46 = vld [vmem:[%s4951_s17 + $0x110] sm:$0xff] }
 0x49a   : >> { %3479 = vst [vmem:[%s4947_s12 + $0x100] sm:$0xff] %v3478_v63  ;;  %v3484_v3 = vld [vmem:[%s4951_s17 + $0x118] sm:$0xff]  ;;  %3481 = vst [vmem:[%s4947_s12 + $0x108] sm:$0xff] %v3480_v29  ;;  %v3486_v34 = vld [vmem:[%s4951_s17 + $0x120] sm:$0xff] }
 0x49b   : >> { %3483 = vst [vmem:[%s4947_s12 + $0x110] sm:$0xff] %v3482_v46  ;;  %3485 = vst [vmem:[%s4947_s12 + $0x118] sm:$0xff] %v3484_v3  ;;  %v3488_v10 = vld [vmem:[%s4951_s17 + $0x128] sm:$0xff]  ;;  %v3490_v16 = vld [vmem:[%s4951_s17 + $0x130] sm:$0xff] }
 0x49c   : >> { %3487 = vst [vmem:[%s4947_s12 + $0x120] sm:$0xff] %v3486_v34  ;;  %3489 = vst [vmem:[%s4947_s12 + $0x128] sm:$0xff] %v3488_v10  ;;  %v3492_v22 = vld [vmem:[%s4951_s17 + $0x138] sm:$0xff]  ;;  %v3494_v45 = vld [vmem:[%s4951_s17 + $0x140] sm:$0xff] }
 0x49d   : >> { %3491 = vst [vmem:[%s4947_s12 + $0x130] sm:$0xff] %v3490_v16  ;;  %v3496_v5 = vld [vmem:[%s4951_s17 + $0x148] sm:$0xff]  ;;  %3493 = vst [vmem:[%s4947_s12 + $0x138] sm:$0xff] %v3492_v22  ;;  %v3498_v17 = vld [vmem:[%s4951_s17 + $0x150] sm:$0xff] }
 0x49e   : >> { %3495 = vst [vmem:[%s4947_s12 + $0x140] sm:$0xff] %v3494_v45  ;;  %3497 = vst [vmem:[%s4947_s12 + $0x148] sm:$0xff] %v3496_v5  ;;  %v3500_v50 = vld [vmem:[%s4951_s17 + $0x158] sm:$0xff]  ;;  %v3502_v28 = vld [vmem:[%s4951_s17 + $0x160] sm:$0xff] }
 0x49f   : >> { %3499 = vst [vmem:[%s4947_s12 + $0x150] sm:$0xff] %v3498_v17  ;;  %3501 = vst [vmem:[%s4947_s12 + $0x158] sm:$0xff] %v3500_v50  ;;  %v3504_v39 = vld [vmem:[%s4951_s17 + $0x168] sm:$0xff]  ;;  %v3506_v31 = vld [vmem:[%s4951_s17 + $0x170] sm:$0xff] }
 0x4a0   : >> { %3503 = vst [vmem:[%s4947_s12 + $0x160] sm:$0xff] %v3502_v28  ;;  %v3508_v41 = vld [vmem:[%s4951_s17 + $0x178] sm:$0xff]  ;;  %3505 = vst [vmem:[%s4947_s12 + $0x168] sm:$0xff] %v3504_v39  ;;  %v3510_v43 = vld [vmem:[%s4951_s17 + $0x180] sm:$0xff] }
 0x4a1   : >> { %3507 = vst [vmem:[%s4947_s12 + $0x170] sm:$0xff] %v3506_v31  ;;  %3509 = vst [vmem:[%s4947_s12 + $0x178] sm:$0xff] %v3508_v41  ;;  %v3512_v27 = vld [vmem:[%s4951_s17 + $0x188] sm:$0xff]  ;;  %v3514_v4 = vld [vmem:[%s4951_s17 + $0x190] sm:$0xff] }
 0x4a2   : >> { %3511 = vst [vmem:[%s4947_s12 + $0x180] sm:$0xff] %v3510_v43  ;;  %3513 = vst [vmem:[%s4947_s12 + $0x188] sm:$0xff] %v3512_v27  ;;  %v3516_v20 = vld [vmem:[%s4951_s17 + $0x198] sm:$0xff]  ;;  %v3518_v44 = vld [vmem:[%s4951_s17 + $0x1a0] sm:$0xff] }
 0x4a3   : >> { %3515 = vst [vmem:[%s4947_s12 + $0x190] sm:$0xff] %v3514_v4  ;;  %v3520_v51 = vld [vmem:[%s4951_s17 + $0x1a8] sm:$0xff]  ;;  %3517 = vst [vmem:[%s4947_s12 + $0x198] sm:$0xff] %v3516_v20  ;;  %v3522_v0 = vld [vmem:[%s4951_s17 + $0x1b0] sm:$0xff] }
 0x4a4   : >> { %3519 = vst [vmem:[%s4947_s12 + $0x1a0] sm:$0xff] %v3518_v44  ;;  %3521 = vst [vmem:[%s4947_s12 + $0x1a8] sm:$0xff] %v3520_v51  ;;  %v3524_v60 = vld [vmem:[%s4951_s17 + $0x1b8] sm:$0xff]  ;;  %v3526_v57 = vld [vmem:[%s4951_s17 + $0x1c0] sm:$0xff] }
 0x4a5   : >> { %3523 = vst [vmem:[%s4947_s12 + $0x1b0] sm:$0xff] %v3522_v0  ;;  %3525 = vst [vmem:[%s4947_s12 + $0x1b8] sm:$0xff] %v3524_v60  ;;  %v3528_v30 = vld [vmem:[%s4951_s17 + $0x1c8] sm:$0xff]  ;;  %v3530_v53 = vld [vmem:[%s4951_s17 + $0x1d0] sm:$0xff]  ;;  %3410 = sbr.rel (!%p3407_p12) target bundleno = 1161 (0x489), region = 118 }
 0x4a6   : >> { %3527 = vst [vmem:[%s4947_s12 + $0x1c0] sm:$0xff] %v3526_v57  ;;  %v3532_v55 = vld [vmem:[%s4951_s17 + $0x1d8] sm:$0xff]  ;;  %3529 = vst [vmem:[%s4947_s12 + $0x1c8] sm:$0xff] %v3528_v30  ;;  %v3534_v38 = vld [vmem:[%s4951_s17 + $0x1e0] sm:$0xff] }
 0x4a7   : >> { %3531 = vst [vmem:[%s4947_s12 + $0x1d0] sm:$0xff] %v3530_v53  ;;  %3533 = vst [vmem:[%s4947_s12 + $0x1d8] sm:$0xff] %v3532_v55  ;;  %v3536_v11 = vld [vmem:[%s4951_s17 + $0x1e8] sm:$0xff]  ;;  %v3538_v7 = vld [vmem:[%s4951_s17 + $0x1f0] sm:$0xff] }
 0x4a8   : >> { %3535 = vst [vmem:[%s4947_s12 + $0x1e0] sm:$0xff] %v3534_v38  ;;  %3537 = vst [vmem:[%s4947_s12 + $0x1e8] sm:$0xff] %v3536_v11  ;;  %v3540_v14 = vld [vmem:[%s4951_s17 + $0x1f8] sm:$0xff]  ;;  %s6362_s17 = smov %s6229_s4 }
 0x4a9   : >> { %3539 = vst [vmem:[%s4947_s12 + $0x1f0] sm:$0xff] %v3538_v7  ;;  %3541 = vst [vmem:[%s4947_s12 + $0x1f8] sm:$0xff] %v3540_v14  ;;  %s6361_s12 = smov %s6232_s5 }
 0x4aa PF: > { %s6337_s6 = sand.u32 63, %s6368_s21   ;;  %s3707_s7 = sshll.u32 %s6162_s27, 9 }
 0x4ab   : > { %s3553_s8 = scalar_lea.vmem %s5698_s29, %s3707_s7 [#allocation2]   ;;  %s3555_s11 = scalar_lea.vmem %s6156_s25, %s3707_s7  }
 0x4ac   : > { %p3701_p13 = scmp.le.s32.totalorder %s6337_s6, 0 }
 0x4ad   : > { %s4961_s14 = smov (!%p3701_p13), %s3555_s11   ;;  %s4965_s15 = smov (!%p3701_p13), %s3553_s8  }
 0x4ae   : > { %3646 = sbr.rel (%p3701_p13) target bundleno = 1211 (0x4bb), region = 123  ;;  %s4969_s9 = smov (!%p3701_p13), 0  }
 0x4af   : > { %s4973_s19 = smov (!%p3701_p13), 0  }
 0x4b3 LB: >> { %v3565_v33 = vld [vmem:[%s4967_s15] sm:$0xff]  ;;  %s3567_s20 = sadd.s32 1, %s4971_s9  ;;  %s3559_s19 = sadd.s32 1, %s4975_s19   ;;  %s4975_s19 = sphi %s4973_s19, %s3559_s19   ;;  %s4971_s9 = sphi %s4969_s9, %s4970_s9   ;;  %s4967_s15 = sphi %s4965_s15, %s3572_s15   ;;  %s4963_s14 = sphi %s4961_s14, %s3573_s14  }
 0x4b4   : >> { %3566 = vst [vmem:[%s4963_s14] sm:$0xff] %v3565_v33  ;;  %p3568_p0 = scmp.ge.s32.totalorder %s3567_s20, %s6337_s6  ;;  %p3558_p1 = scmp.ge.s32.totalorder %s3559_s19, %s6337_s6 }
 0x4b6   : >> { %s6372_s20 = smov (%p3568_p0, %s3567_s20), 0  ;;  %3561 = sbr.rel (!%p3558_p1) target bundleno = 1203 (0x4b3), region = 129 }
 0x4b7   : >> { %s3702_s29 = sshll.u32 %s6372_s20, 3  ;;  %s4970_s9 = smov %s6372_s20  }
 0x4b8   : >> { %s3572_s15 = scalar_lea.vmem %s3553_s8, %s3702_s29 [#allocation2]   ;;  %s3573_s14 = scalar_lea.vmem %s3555_s11, %s3702_s29  }
 0x4bb PF: > { %p9_p2 = scmp.ge.s32.totalorder %s5008_s13, 4   ;;  %s6364_s9 = smov %s4939_s10 }
 0x4bc   : > { %s6365_s10 = smov %s5016_s16  ;;  %s6366_s11 = smov %s5008_s13 }
 0x4bd   :  { %11 = sbr.rel (!%p9_p2) target bundleno = 2 (0x2), region = 140 }

</bundles_post_ra>
